<compile_context>
chip_gen: v6e
topology: v6e:2x2x1
jax: 0.10.0
libtpu: 0.0.40
codegen_flags: <defaults>
</compile_context>

<pallas_src>
import numpy as np
import jax
import jax.numpy as jnp
from jax import lax
from jax.experimental import pallas as pl
from jax.experimental.pallas import tpu as pltpu

N, C = 2, 8                     # batch, dim
D, H, W = 8, 8, 8               # 3D spatial extent
S = D * H * W                   # 512  = per-image flattened spatial axis (lanes)
NS = N * S                      # 1024 = both images lane-concatenated
EPS = 1e-5                      # nn.InstanceNorm3d default eps
TAPS = [(kd, kh, kw) for kd in (-1, 0, 1) for kh in (-1, 0, 1) for kw in (-1, 0, 1)]
TAPROWS = 27 * C                # 216 im2col rows
KROWS = TAPROWS + 8             # 224 rows: 216 taps + 8 ones-rows (folded bias), sublane aligned
MASKROWS = 32                   # 27 mask rows padded to a sublane multiple


def _build_masks_np():
    # Trace-time constants (review item #1): combined boundary mask for every tap,
    # tiled across the N lane-concatenated images.  0/1 in f32 so the kernel applies
    # it with a plain vmul.
    s = np.arange(S)
    d, h, w = s // (H * W), (s // W) % H, s % W
    m = np.zeros((MASKROWS, NS), np.float32)
    for t, (kd, kh, kw) in enumerate(TAPS):
        ok = ((d + kd >= 0) & (d + kd < D)
              & (h + kh >= 0) & (h + kh < H)
              & (w + kw >= 0) & (w + kw < W)).astype(np.float32)
        m[t] = np.tile(ok, N)
    return m


_MASKS_NP = _build_masks_np()


def _instance_norm_pair(y):
    # InstanceNorm3d(affine=False) for two lane-concatenated images: per-channel
    # (sublane row), per-image (512-lane half) statistics.  [y, y*y] stacked along
    # sublanes -> one fused lane-reduce per image half.
    yy = jnp.concatenate([y, y * y], axis=0)                 # (2C, NS)
    halves = []
    for n in range(N):                                       # static loop, lane-aligned slices
        lo, hi = n * S, (n + 1) * S
        st = jnp.sum(yy[:, lo:hi], axis=1, keepdims=True) * (1.0 / S)   # (2C, 1)
        mean, mean_sq = st[:C], st[C:]
        var = jnp.maximum(mean_sq - mean * mean, 0.0)        # cancellation guard
        halves.append((y[:, lo:hi] - mean) * lax.rsqrt(var + EPS))
    return jnp.concatenate(halves, axis=1)                   # (C, NS)


def resnet3d_block_kernel(x_ref, w_ref, mask_ref, o_ref, stack_ref):
    # x_ref:     (N, C, S)       lane-dense input (C -> sublanes, D*H*W -> lanes)
    # w_ref:     (2C, KROWS)     [W1; W2], bias folded into column TAPROWS
    # mask_ref:  (32, NS)        precomputed 0/1 boundary masks per tap
    # o_ref:     (N, C, S)
    # stack_ref: (KROWS, NS)     persistent im2col stack, reused by both convs
    x = jnp.concatenate([x_ref[n] for n in range(N)], axis=1)         # (C, NS)

    # Ones-rows feeding the folded-bias column; written once, shared by both convs.
    stack_ref[TAPROWS:KROWS, :] = jnp.ones((KROWS - TAPROWS, NS), jnp.float32)

    def conv3x3x3(src, w):
        # 27 taps = lane rolls (XLU) of the flattened volume; implicit zero padding
        # via the precomputed 0/1 mask (vld + vmul); channel mixing of all taps and
        # the bias in ONE MXU matmul (C, KROWS) @ (KROWS, NS) covering both images.
        for t, (kd, kh, kw) in enumerate(TAPS):
            off = kd * H * W + kh * W + kw                   # flat-index shift
            if off == 0:
                tap = src                                    # center tap: no roll, no mask
            else:
                rolled = pltpu.roll(src, shift=(-off) % NS, axis=1)
                tap = rolled * mask_ref[t:t + 1, :]
            stack_ref[t * C:(t + 1) * C, :] = tap            # sublane-aligned store
        return jnp.dot(w, stack_ref[...], preferred_element_type=jnp.float32)

    y = jnp.maximum(_instance_norm_pair(conv3x3x3(x, w_ref[:C, :])), 0.0)
    z = _instance_norm_pair(conv3x3x3(y, w_ref[C:, :]))
    out = x + z                                              # residual skip
    for n in range(N):
        o_ref[n] = out[:, n * S:(n + 1) * S]


@jax.jit
def resnet_3d_block(x_ncdhw, w_packed):
    x_flat = x_ncdhw.reshape(N, C, S)        # NCDHW -> (N, C, D*H*W); no transpose
    out = pl.pallas_call(
        resnet3d_block_kernel,
        out_shape=jax.ShapeDtypeStruct((N, C, S), jnp.float32),
        grid=(1,),
        in_specs=[
            pl.BlockSpec((N, C, S), lambda i: (0, 0, 0)),
            pl.BlockSpec((2 * C, KROWS), lambda i: (0, 0)),
            pl.BlockSpec((MASKROWS, NS), lambda i: (0, 0)),
        ],
        out_specs=pl.BlockSpec((N, C, S), lambda i: (0, 0, 0)),
        scratch_shapes=[pltpu.VMEM((KROWS, NS), jnp.float32)],
        compiler_params=pltpu.CompilerParams(dimension_semantics=("arbitrary",)),
    )(x_flat, w_packed, jnp.asarray(_MASKS_NP))
    return out.reshape(N, C, D, H, W)


def init_params(key):
    # Deterministic synthetic init matching the PyTorch parameter shapes:
    #   Conv3d(dim, dim, 3).weight : (C, C, 3, 3, 3),  .bias : (C,)
    ks = jax.random.split(key, 4)
    w1 = jax.random.normal(ks[0], (C, C, 3, 3, 3), jnp.float32) * 0.1
    b1 = jax.random.normal(ks[1], (C,), jnp.float32) * 0.1
    w2 = jax.random.normal(ks[2], (C, C, 3, 3, 3), jnp.float32) * 0.1
    b2 = jax.random.normal(ks[3], (C,), jnp.float32) * 0.1

    def pack(w, b):
        # (co, ci, kd, kh, kw) -> (co, t*C + ci), t = (kd*3 + kh)*3 + kw (TAPS order);
        # bias goes to column TAPROWS (multiplied by the ones-rows of the stack),
        # remaining KROWS-TAPROWS-1 columns are zero.
        m = jnp.transpose(w, (0, 2, 3, 4, 1)).reshape(C, TAPROWS)
        return jnp.concatenate(
            [m, b.reshape(C, 1), jnp.zeros((C, KROWS - TAPROWS - 1), jnp.float32)],
            axis=1)

    w_packed = jnp.concatenate([pack(w1, b1), pack(w2, b2)], axis=0)   # (2C, KROWS)
    return w_packed, (w1, b1, w2, b2)


def ref_forward(x, raw):
    # Pure-JAX reference of the PyTorch forward (NCDHW).
    w1, b1, w2, b2 = raw

    def conv3d(x, w, b):
        y = lax.conv_general_dilated(
            x, w, window_strides=(1, 1, 1),
            padding=((1, 1), (1, 1), (1, 1)),
            dimension_numbers=('NCDHW', 'OIDHW', 'NCDHW'))
        return y + b[None, :, None, None, None]

    def inorm(y):
        m = y.mean(axis=(2, 3, 4), keepdims=True)
        v = ((y - m) ** 2).mean(axis=(2, 3, 4), keepdims=True)
        return (y - m) * lax.rsqrt(v + EPS)

    y = jnp.maximum(inorm(conv3d(x, w1, b1)), 0.0)
    z = inorm(conv3d(y, w2, b2))
    return x + z


if __name__ == "__main__":
    key = jax.random.PRNGKey(0)
    kx, kp = jax.random.split(key)
    x = jax.random.normal(kx, (N, C, D, H, W), jnp.float32)
    w_packed, raw = init_params(kp)

    out = resnet_3d_block(x, w_packed)
    out = jax.block_until_ready(out)
    assert out.shape == (N, C, D, H, W)

    ref = ref_forward(x, raw)
    np.testing.assert_allclose(np.asarray(out), np.asarray(ref), rtol=1e-4, atol=1e-4)
    print("KERNEL_OK")
</pallas_src>

<mosaic_0001>
module attributes {stable_mosaic.version = 11 : i64} {
  func.func @resnet3d_block_kernel(%arg0: i32, %arg1: memref<2x8x512xf32, #tpu.memory_space<vmem>>, %arg2: memref<16x224xf32, #tpu.memory_space<vmem>>, %arg3: memref<32x1024xf32, #tpu.memory_space<vmem>>, %arg4: memref<2x8x512xf32, #tpu.memory_space<vmem>>, %arg5: memref<224x1024xf32, #tpu.memory_space<vmem>>) attributes {dimension_semantics = [#tpu.dimension_semantics<arbitrary>], iteration_bounds = array<i64: 1>, scalar_prefetch = 0 : i64, scratch_operands = 1 : i64, tpu.core_type = #tpu.core_type<tc>, window_params = [{pipeline_mode = #tpu.pipeline_mode<synchronous>, transform_indices = @transform_0, window_bounds = array<i64: 2, 8, 512>}, {pipeline_mode = #tpu.pipeline_mode<synchronous>, transform_indices = @transform_1, window_bounds = array<i64: 16, 224>}, {pipeline_mode = #tpu.pipeline_mode<synchronous>, transform_indices = @transform_2, window_bounds = array<i64: 32, 1024>}, {pipeline_mode = #tpu.pipeline_mode<synchronous>, transform_indices = @transform_3, window_bounds = array<i64: 2, 8, 512>}]} {
    %c0 = arith.constant 0 : index
    %c0_0 = arith.constant 0 : index
    %c0_1 = arith.constant 0 : index
    %0 = vector.load %arg1[%c0, %c0_0, %c0_1] : memref<2x8x512xf32, #tpu.memory_space<vmem>>, vector<1x8x512xf32>
    %1 = vector.shape_cast %0 : vector<1x8x512xf32> to vector<8x512xf32>
    %c1 = arith.constant 1 : index
    %c0_2 = arith.constant 0 : index
    %c0_3 = arith.constant 0 : index
    %2 = vector.load %arg1[%c1, %c0_2, %c0_3] : memref<2x8x512xf32, #tpu.memory_space<vmem>>, vector<1x8x512xf32>
    %3 = vector.shape_cast %2 : vector<1x8x512xf32> to vector<8x512xf32>
    %4 = tpu.concatenate %1, %3 in 1 : vector<8x512xf32>, vector<8x512xf32> -> vector<8x1024xf32>
    %cst = arith.constant 1.000000e+00 : f32
    %5 = vector.broadcast %cst : f32 to vector<8x1024xf32>
    %c216 = arith.constant 216 : index
    %c0_4 = arith.constant 0 : index
    %6 = vector.load %arg5[%c216, %c0_4] : memref<224x1024xf32, #tpu.memory_space<vmem>>, vector<8x1024xf32>
    tpu.vector_store %arg5[%c216, %c0_4], %5 {strides = array<i32>} : memref<224x1024xf32, #tpu.memory_space<vmem>>, vector<8x1024xf32>,
    %c0_5 = arith.constant 0 : index
    %c0_6 = arith.constant 0 : index
    %7 = vector.load %arg2[%c0_5, %c0_6] : memref<16x224xf32, #tpu.memory_space<vmem>>, vector<8x224xf32>
    %c73_i32 = arith.constant 73 : i32
    %8 = tpu.dynamic_rotate %4 by %c73_i32 dim 1 : vector<8x1024xf32>, i32 -> vector<8x1024xf32>
    %c0_7 = arith.constant 0 : index
    %c0_8 = arith.constant 0 : index
    %9 = vector.load %arg3[%c0_7, %c0_8] : memref<32x1024xf32, #tpu.memory_space<vmem>>, vector<1x1024xf32>
    %10 = vector.broadcast %9 : vector<1x1024xf32> to vector<8x1024xf32>
    %11 = arith.mulf %8, %10 : vector<8x1024xf32>
    %c0_9 = arith.constant 0 : index
    %c0_10 = arith.constant 0 : index
    %12 = vector.load %arg5[%c0_9, %c0_10] : memref<224x1024xf32, #tpu.memory_space<vmem>>, vector<8x1024xf32>
    tpu.vector_store %arg5[%c0_9, %c0_10], %11 {strides = array<i32>} : memref<224x1024xf32, #tpu.memory_space<vmem>>, vector<8x1024xf32>,
    %c72_i32 = arith.constant 72 : i32
    %13 = tpu.dynamic_rotate %4 by %c72_i32 dim 1 : vector<8x1024xf32>, i32 -> vector<8x1024xf32>
    %c1_11 = arith.constant 1 : index
    %c0_12 = arith.constant 0 : index
    %14 = vector.load %arg3[%c1_11, %c0_12] : memref<32x1024xf32, #tpu.memory_space<vmem>>, vector<1x1024xf32>
    %15 = vector.broadcast %14 : vector<1x1024xf32> to vector<8x1024xf32>
    %16 = arith.mulf %13, %15 : vector<8x1024xf32>
    %c8 = arith.constant 8 : index
    %c0_13 = arith.constant 0 : index
    %17 = vector.load %arg5[%c8, %c0_13] : memref<224x1024xf32, #tpu.memory_space<vmem>>, vector<8x1024xf32>
    tpu.vector_store %arg5[%c8, %c0_13], %16 {strides = array<i32>} : memref<224x1024xf32, #tpu.memory_space<vmem>>, vector<8x1024xf32>,
    %c71_i32 = arith.constant 71 : i32
    %18 = tpu.dynamic_rotate %4 by %c71_i32 dim 1 : vector<8x1024xf32>, i32 -> vector<8x1024xf32>
    %c2 = arith.constant 2 : index
    %c0_14 = arith.constant 0 : index
    %19 = vector.load %arg3[%c2, %c0_14] : memref<32x1024xf32, #tpu.memory_space<vmem>>, vector<1x1024xf32>
    %20 = vector.broadcast %19 : vector<1x1024xf32> to vector<8x1024xf32>
    %21 = arith.mulf %18, %20 : vector<8x1024xf32>
    %c16 = arith.constant 16 : index
    %c0_15 = arith.constant 0 : index
    %22 = vector.load %arg5[%c16, %c0_15] : memref<224x1024xf32, #tpu.memory_space<vmem>>, vector<8x1024xf32>
    tpu.vector_store %arg5[%c16, %c0_15], %21 {strides = array<i32>} : memref<224x1024xf32, #tpu.memory_space<vmem>>, vector<8x1024xf32>,
    %c65_i32 = arith.constant 65 : i32
    %23 = tpu.dynamic_rotate %4 by %c65_i32 dim 1 : vector<8x1024xf32>, i32 -> vector<8x1024xf32>
    %c3 = arith.constant 3 : index
    %c0_16 = arith.constant 0 : index
    %24 = vector.load %arg3[%c3, %c0_16] : memref<32x1024xf32, #tpu.memory_space<vmem>>, vector<1x1024xf32>
    %25 = vector.broadcast %24 : vector<1x1024xf32> to vector<8x1024xf32>
    %26 = arith.mulf %23, %25 : vector<8x1024xf32>
    %c24 = arith.constant 24 : index
    %c0_17 = arith.constant 0 : index
    %27 = vector.load %arg5[%c24, %c0_17] : memref<224x1024xf32, #tpu.memory_space<vmem>>, vector<8x1024xf32>
    tpu.vector_store %arg5[%c24, %c0_17], %26 {strides = array<i32>} : memref<224x1024xf32, #tpu.memory_space<vmem>>, vector<8x1024xf32>,
    %c64_i32 = arith.constant 64 : i32
    %28 = tpu.dynamic_rotate %4 by %c64_i32 dim 1 : vector<8x1024xf32>, i32 -> vector<8x1024xf32>
    %c4 = arith.constant 4 : index
    %c0_18 = arith.constant 0 : index
    %29 = vector.load %arg3[%c4, %c0_18] : memref<32x1024xf32, #tpu.memory_space<vmem>>, vector<1x1024xf32>
    %30 = vector.broadcast %29 : vector<1x1024xf32> to vector<8x1024xf32>
    %31 = arith.mulf %28, %30 : vector<8x1024xf32>
    %c32 = arith.constant 32 : index
    %c0_19 = arith.constant 0 : index
    %32 = vector.load %arg5[%c32, %c0_19] : memref<224x1024xf32, #tpu.memory_space<vmem>>, vector<8x1024xf32>
    tpu.vector_store %arg5[%c32, %c0_19], %31 {strides = array<i32>} : memref<224x1024xf32, #tpu.memory_space<vmem>>, vector<8x1024xf32>,
    %c63_i32 = arith.constant 63 : i32
    %33 = tpu.dynamic_rotate %4 by %c63_i32 dim 1 : vector<8x1024xf32>, i32 -> vector<8x1024xf32>
    %c5 = arith.constant 5 : index
    %c0_20 = arith.constant 0 : index
    %34 = vector.load %arg3[%c5, %c0_20] : memref<32x1024xf32, #tpu.memory_space<vmem>>, vector<1x1024xf32>
    %35 = vector.broadcast %34 : vector<1x1024xf32> to vector<8x1024xf32>
    %36 = arith.mulf %33, %35 : vector<8x1024xf32>
    %c40 = arith.constant 40 : index
    %c0_21 = arith.constant 0 : index
    %37 = vector.load %arg5[%c40, %c0_21] : memref<224x1024xf32, #tpu.memory_space<vmem>>, vector<8x1024xf32>
    tpu.vector_store %arg5[%c40, %c0_21], %36 {strides = array<i32>} : memref<224x1024xf32, #tpu.memory_space<vmem>>, vector<8x1024xf32>,
    %c57_i32 = arith.constant 57 : i32
    %38 = tpu.dynamic_rotate %4 by %c57_i32 dim 1 : vector<8x1024xf32>, i32 -> vector<8x1024xf32>
    %c6 = arith.constant 6 : index
    %c0_22 = arith.constant 0 : index
    %39 = vector.load %arg3[%c6, %c0_22] : memref<32x1024xf32, #tpu.memory_space<vmem>>, vector<1x1024xf32>
    %40 = vector.broadcast %39 : vector<1x1024xf32> to vector<8x1024xf32>
    %41 = arith.mulf %38, %40 : vector<8x1024xf32>
    %c48 = arith.constant 48 : index
    %c0_23 = arith.constant 0 : index
    %42 = vector.load %arg5[%c48, %c0_23] : memref<224x1024xf32, #tpu.memory_space<vmem>>, vector<8x1024xf32>
    tpu.vector_store %arg5[%c48, %c0_23], %41 {strides = array<i32>} : memref<224x1024xf32, #tpu.memory_space<vmem>>, vector<8x1024xf32>,
    %c56_i32 = arith.constant 56 : i32
    %43 = tpu.dynamic_rotate %4 by %c56_i32 dim 1 : vector<8x1024xf32>, i32 -> vector<8x1024xf32>
    %c7 = arith.constant 7 : index
    %c0_24 = arith.constant 0 : index
    %44 = vector.load %arg3[%c7, %c0_24] : memref<32x1024xf32, #tpu.memory_space<vmem>>, vector<1x1024xf32>
    %45 = vector.broadcast %44 : vector<1x1024xf32> to vector<8x1024xf32>
    %46 = arith.mulf %43, %45 : vector<8x1024xf32>
    %c56 = arith.constant 56 : index
    %c0_25 = arith.constant 0 : index
    %47 = vector.load %arg5[%c56, %c0_25] : memref<224x1024xf32, #tpu.memory_space<vmem>>, vector<8x1024xf32>
    tpu.vector_store %arg5[%c56, %c0_25], %46 {strides = array<i32>} : memref<224x1024xf32, #tpu.memory_space<vmem>>, vector<8x1024xf32>,
    %c55_i32 = arith.constant 55 : i32
    %48 = tpu.dynamic_rotate %4 by %c55_i32 dim 1 : vector<8x1024xf32>, i32 -> vector<8x1024xf32>
    %c8_26 = arith.constant 8 : index
    %c0_27 = arith.constant 0 : index
    %49 = vector.load %arg3[%c8_26, %c0_27] : memref<32x1024xf32, #tpu.memory_space<vmem>>, vector<1x1024xf32>
    %50 = vector.broadcast %49 : vector<1x1024xf32> to vector<8x1024xf32>
    %51 = arith.mulf %48, %50 : vector<8x1024xf32>
    %c64 = arith.constant 64 : index
    %c0_28 = arith.constant 0 : index
    %52 = vector.load %arg5[%c64, %c0_28] : memref<224x1024xf32, #tpu.memory_space<vmem>>, vector<8x1024xf32>
    tpu.vector_store %arg5[%c64, %c0_28], %51 {strides = array<i32>} : memref<224x1024xf32, #tpu.memory_space<vmem>>, vector<8x1024xf32>,
    %c9_i32 = arith.constant 9 : i32
    %53 = tpu.dynamic_rotate %4 by %c9_i32 dim 1 : vector<8x1024xf32>, i32 -> vector<8x1024xf32>
    %c9 = arith.constant 9 : index
    %c0_29 = arith.constant 0 : index
    %54 = vector.load %arg3[%c9, %c0_29] : memref<32x1024xf32, #tpu.memory_space<vmem>>, vector<1x1024xf32>
    %55 = vector.broadcast %54 : vector<1x1024xf32> to vector<8x1024xf32>
    %56 = arith.mulf %53, %55 : vector<8x1024xf32>
    %c72 = arith.constant 72 : index
    %c0_30 = arith.constant 0 : index
    %57 = vector.load %arg5[%c72, %c0_30] : memref<224x1024xf32, #tpu.memory_space<vmem>>, vector<8x1024xf32>
    tpu.vector_store %arg5[%c72, %c0_30], %56 {strides = array<i32>} : memref<224x1024xf32, #tpu.memory_space<vmem>>, vector<8x1024xf32>,
    %c8_i32 = arith.constant 8 : i32
    %58 = tpu.dynamic_rotate %4 by %c8_i32 dim 1 : vector<8x1024xf32>, i32 -> vector<8x1024xf32>
    %c10 = arith.constant 10 : index
    %c0_31 = arith.constant 0 : index
    %59 = vector.load %arg3[%c10, %c0_31] : memref<32x1024xf32, #tpu.memory_space<vmem>>, vector<1x1024xf32>
    %60 = vector.broadcast %59 : vector<1x1024xf32> to vector<8x1024xf32>
    %61 = arith.mulf %58, %60 : vector<8x1024xf32>
    %c80 = arith.constant 80 : index
    %c0_32 = arith.constant 0 : index
    %62 = vector.load %arg5[%c80, %c0_32] : memref<224x1024xf32, #tpu.memory_space<vmem>>, vector<8x1024xf32>
    tpu.vector_store %arg5[%c80, %c0_32], %61 {strides = array<i32>} : memref<224x1024xf32, #tpu.memory_space<vmem>>, vector<8x1024xf32>,
    %c7_i32 = arith.constant 7 : i32
    %63 = tpu.dynamic_rotate %4 by %c7_i32 dim 1 : vector<8x1024xf32>, i32 -> vector<8x1024xf32>
    %c11 = arith.constant 11 : index
    %c0_33 = arith.constant 0 : index
    %64 = vector.load %arg3[%c11, %c0_33] : memref<32x1024xf32, #tpu.memory_space<vmem>>, vector<1x1024xf32>
    %65 = vector.broadcast %64 : vector<1x1024xf32> to vector<8x1024xf32>
    %66 = arith.mulf %63, %65 : vector<8x1024xf32>
    %c88 = arith.constant 88 : index
    %c0_34 = arith.constant 0 : index
    %67 = vector.load %arg5[%c88, %c0_34] : memref<224x1024xf32, #tpu.memory_space<vmem>>, vector<8x1024xf32>
    tpu.vector_store %arg5[%c88, %c0_34], %66 {strides = array<i32>} : memref<224x1024xf32, #tpu.memory_space<vmem>>, vector<8x1024xf32>,
    %c1_i32 = arith.constant 1 : i32
    %68 = tpu.dynamic_rotate %4 by %c1_i32 dim 1 : vector<8x1024xf32>, i32 -> vector<8x1024xf32>
    %c12 = arith.constant 12 : index
    %c0_35 = arith.constant 0 : index
    %69 = vector.load %arg3[%c12, %c0_35] : memref<32x1024xf32, #tpu.memory_space<vmem>>, vector<1x1024xf32>
    %70 = vector.broadcast %69 : vector<1x1024xf32> to vector<8x1024xf32>
    %71 = arith.mulf %68, %70 : vector<8x1024xf32>
    %c96 = arith.constant 96 : index
    %c0_36 = arith.constant 0 : index
    %72 = vector.load %arg5[%c96, %c0_36] : memref<224x1024xf32, #tpu.memory_space<vmem>>, vector<8x1024xf32>
    tpu.vector_store %arg5[%c96, %c0_36], %71 {strides = array<i32>} : memref<224x1024xf32, #tpu.memory_space<vmem>>, vector<8x1024xf32>,
    %c104 = arith.constant 104 : index
    %c0_37 = arith.constant 0 : index
    %73 = vector.load %arg5[%c104, %c0_37] : memref<224x1024xf32, #tpu.memory_space<vmem>>, vector<8x1024xf32>
    tpu.vector_store %arg5[%c104, %c0_37], %4 {strides = array<i32>} : memref<224x1024xf32, #tpu.memory_space<vmem>>, vector<8x1024xf32>,
    %c1023_i32 = arith.constant 1023 : i32
    %74 = tpu.dynamic_rotate %4 by %c1023_i32 dim 1 : vector<8x1024xf32>, i32 -> vector<8x1024xf32>
    %c14 = arith.constant 14 : index
    %c0_38 = arith.constant 0 : index
    %75 = vector.load %arg3[%c14, %c0_38] : memref<32x1024xf32, #tpu.memory_space<vmem>>, vector<1x1024xf32>
    %76 = vector.broadcast %75 : vector<1x1024xf32> to vector<8x1024xf32>
    %77 = arith.mulf %74, %76 : vector<8x1024xf32>
    %c112 = arith.constant 112 : index
    %c0_39 = arith.constant 0 : index
    %78 = vector.load %arg5[%c112, %c0_39] : memref<224x1024xf32, #tpu.memory_space<vmem>>, vector<8x1024xf32>
    tpu.vector_store %arg5[%c112, %c0_39], %77 {strides = array<i32>} : memref<224x1024xf32, #tpu.memory_space<vmem>>, vector<8x1024xf32>,
    %c1017_i32 = arith.constant 1017 : i32
    %79 = tpu.dynamic_rotate %4 by %c1017_i32 dim 1 : vector<8x1024xf32>, i32 -> vector<8x1024xf32>
    %c15 = arith.constant 15 : index
    %c0_40 = arith.constant 0 : index
    %80 = vector.load %arg3[%c15, %c0_40] : memref<32x1024xf32, #tpu.memory_space<vmem>>, vector<1x1024xf32>
    %81 = vector.broadcast %80 : vector<1x1024xf32> to vector<8x1024xf32>
    %82 = arith.mulf %79, %81 : vector<8x1024xf32>
    %c120 = arith.constant 120 : index
    %c0_41 = arith.constant 0 : index
    %83 = vector.load %arg5[%c120, %c0_41] : memref<224x1024xf32, #tpu.memory_space<vmem>>, vector<8x1024xf32>
    tpu.vector_store %arg5[%c120, %c0_41], %82 {strides = array<i32>} : memref<224x1024xf32, #tpu.memory_space<vmem>>, vector<8x1024xf32>,
    %c1016_i32 = arith.constant 1016 : i32
    %84 = tpu.dynamic_rotate %4 by %c1016_i32 dim 1 : vector<8x1024xf32>, i32 -> vector<8x1024xf32>
    %c16_42 = arith.constant 16 : index
    %c0_43 = arith.constant 0 : index
    %85 = vector.load %arg3[%c16_42, %c0_43] : memref<32x1024xf32, #tpu.memory_space<vmem>>, vector<1x1024xf32>
    %86 = vector.broadcast %85 : vector<1x1024xf32> to vector<8x1024xf32>
    %87 = arith.mulf %84, %86 : vector<8x1024xf32>
    %c128 = arith.constant 128 : index
    %c0_44 = arith.constant 0 : index
    %88 = vector.load %arg5[%c128, %c0_44] : memref<224x1024xf32, #tpu.memory_space<vmem>>, vector<8x1024xf32>
    tpu.vector_store %arg5[%c128, %c0_44], %87 {strides = array<i32>} : memref<224x1024xf32, #tpu.memory_space<vmem>>, vector<8x1024xf32>,
    %c1015_i32 = arith.constant 1015 : i32
    %89 = tpu.dynamic_rotate %4 by %c1015_i32 dim 1 : vector<8x1024xf32>, i32 -> vector<8x1024xf32>
    %c17 = arith.constant 17 : index
    %c0_45 = arith.constant 0 : index
    %90 = vector.load %arg3[%c17, %c0_45] : memref<32x1024xf32, #tpu.memory_space<vmem>>, vector<1x1024xf32>
    %91 = vector.broadcast %90 : vector<1x1024xf32> to vector<8x1024xf32>
    %92 = arith.mulf %89, %91 : vector<8x1024xf32>
    %c136 = arith.constant 136 : index
    %c0_46 = arith.constant 0 : index
    %93 = vector.load %arg5[%c136, %c0_46] : memref<224x1024xf32, #tpu.memory_space<vmem>>, vector<8x1024xf32>
    tpu.vector_store %arg5[%c136, %c0_46], %92 {strides = array<i32>} : memref<224x1024xf32, #tpu.memory_space<vmem>>, vector<8x1024xf32>,
    %c969_i32 = arith.constant 969 : i32
    %94 = tpu.dynamic_rotate %4 by %c969_i32 dim 1 : vector<8x1024xf32>, i32 -> vector<8x1024xf32>
    %c18 = arith.constant 18 : index
    %c0_47 = arith.constant 0 : index
    %95 = vector.load %arg3[%c18, %c0_47] : memref<32x1024xf32, #tpu.memory_space<vmem>>, vector<1x1024xf32>
    %96 = vector.broadcast %95 : vector<1x1024xf32> to vector<8x1024xf32>
    %97 = arith.mulf %94, %96 : vector<8x1024xf32>
    %c144 = arith.constant 144 : index
    %c0_48 = arith.constant 0 : index
    %98 = vector.load %arg5[%c144, %c0_48] : memref<224x1024xf32, #tpu.memory_space<vmem>>, vector<8x1024xf32>
    tpu.vector_store %arg5[%c144, %c0_48], %97 {strides = array<i32>} : memref<224x1024xf32, #tpu.memory_space<vmem>>, vector<8x1024xf32>,
    %c968_i32 = arith.constant 968 : i32
    %99 = tpu.dynamic_rotate %4 by %c968_i32 dim 1 : vector<8x1024xf32>, i32 -> vector<8x1024xf32>
    %c19 = arith.constant 19 : index
    %c0_49 = arith.constant 0 : index
    %100 = vector.load %arg3[%c19, %c0_49] : memref<32x1024xf32, #tpu.memory_space<vmem>>, vector<1x1024xf32>
    %101 = vector.broadcast %100 : vector<1x1024xf32> to vector<8x1024xf32>
    %102 = arith.mulf %99, %101 : vector<8x1024xf32>
    %c152 = arith.constant 152 : index
    %c0_50 = arith.constant 0 : index
    %103 = vector.load %arg5[%c152, %c0_50] : memref<224x1024xf32, #tpu.memory_space<vmem>>, vector<8x1024xf32>
    tpu.vector_store %arg5[%c152, %c0_50], %102 {strides = array<i32>} : memref<224x1024xf32, #tpu.memory_space<vmem>>, vector<8x1024xf32>,
    %c967_i32 = arith.constant 967 : i32
    %104 = tpu.dynamic_rotate %4 by %c967_i32 dim 1 : vector<8x1024xf32>, i32 -> vector<8x1024xf32>
    %c20 = arith.constant 20 : index
    %c0_51 = arith.constant 0 : index
    %105 = vector.load %arg3[%c20, %c0_51] : memref<32x1024xf32, #tpu.memory_space<vmem>>, vector<1x1024xf32>
    %106 = vector.broadcast %105 : vector<1x1024xf32> to vector<8x1024xf32>
    %107 = arith.mulf %104, %106 : vector<8x1024xf32>
    %c160 = arith.constant 160 : index
    %c0_52 = arith.constant 0 : index
    %108 = vector.load %arg5[%c160, %c0_52] : memref<224x1024xf32, #tpu.memory_space<vmem>>, vector<8x1024xf32>
    tpu.vector_store %arg5[%c160, %c0_52], %107 {strides = array<i32>} : memref<224x1024xf32, #tpu.memory_space<vmem>>, vector<8x1024xf32>,
    %c961_i32 = arith.constant 961 : i32
    %109 = tpu.dynamic_rotate %4 by %c961_i32 dim 1 : vector<8x1024xf32>, i32 -> vector<8x1024xf32>
    %c21 = arith.constant 21 : index
    %c0_53 = arith.constant 0 : index
    %110 = vector.load %arg3[%c21, %c0_53] : memref<32x1024xf32, #tpu.memory_space<vmem>>, vector<1x1024xf32>
    %111 = vector.broadcast %110 : vector<1x1024xf32> to vector<8x1024xf32>
    %112 = arith.mulf %109, %111 : vector<8x1024xf32>
    %c168 = arith.constant 168 : index
    %c0_54 = arith.constant 0 : index
    %113 = vector.load %arg5[%c168, %c0_54] : memref<224x1024xf32, #tpu.memory_space<vmem>>, vector<8x1024xf32>
    tpu.vector_store %arg5[%c168, %c0_54], %112 {strides = array<i32>} : memref<224x1024xf32, #tpu.memory_space<vmem>>, vector<8x1024xf32>,
    %c960_i32 = arith.constant 960 : i32
    %114 = tpu.dynamic_rotate %4 by %c960_i32 dim 1 : vector<8x1024xf32>, i32 -> vector<8x1024xf32>
    %c22 = arith.constant 22 : index
    %c0_55 = arith.constant 0 : index
    %115 = vector.load %arg3[%c22, %c0_55] : memref<32x1024xf32, #tpu.memory_space<vmem>>, vector<1x1024xf32>
    %116 = vector.broadcast %115 : vector<1x1024xf32> to vector<8x1024xf32>
    %117 = arith.mulf %114, %116 : vector<8x1024xf32>
    %c176 = arith.constant 176 : index
    %c0_56 = arith.constant 0 : index
    %118 = vector.load %arg5[%c176, %c0_56] : memref<224x1024xf32, #tpu.memory_space<vmem>>, vector<8x1024xf32>
    tpu.vector_store %arg5[%c176, %c0_56], %117 {strides = array<i32>} : memref<224x1024xf32, #tpu.memory_space<vmem>>, vector<8x1024xf32>,
    %c959_i32 = arith.constant 959 : i32
    %119 = tpu.dynamic_rotate %4 by %c959_i32 dim 1 : vector<8x1024xf32>, i32 -> vector<8x1024xf32>
    %c23 = arith.constant 23 : index
    %c0_57 = arith.constant 0 : index
    %120 = vector.load %arg3[%c23, %c0_57] : memref<32x1024xf32, #tpu.memory_space<vmem>>, vector<1x1024xf32>
    %121 = vector.broadcast %120 : vector<1x1024xf32> to vector<8x1024xf32>
    %122 = arith.mulf %119, %121 : vector<8x1024xf32>
    %c184 = arith.constant 184 : index
    %c0_58 = arith.constant 0 : index
    %123 = vector.load %arg5[%c184, %c0_58] : memref<224x1024xf32, #tpu.memory_space<vmem>>, vector<8x1024xf32>
    tpu.vector_store %arg5[%c184, %c0_58], %122 {strides = array<i32>} : memref<224x1024xf32, #tpu.memory_space<vmem>>, vector<8x1024xf32>,
    %c953_i32 = arith.constant 953 : i32
    %124 = tpu.dynamic_rotate %4 by %c953_i32 dim 1 : vector<8x1024xf32>, i32 -> vector<8x1024xf32>
    %c24_59 = arith.constant 24 : index
    %c0_60 = arith.constant 0 : index
    %125 = vector.load %arg3[%c24_59, %c0_60] : memref<32x1024xf32, #tpu.memory_space<vmem>>, vector<1x1024xf32>
    %126 = vector.broadcast %125 : vector<1x1024xf32> to vector<8x1024xf32>
    %127 = arith.mulf %124, %126 : vector<8x1024xf32>
    %c192 = arith.constant 192 : index
    %c0_61 = arith.constant 0 : index
    %128 = vector.load %arg5[%c192, %c0_61] : memref<224x1024xf32, #tpu.memory_space<vmem>>, vector<8x1024xf32>
    tpu.vector_store %arg5[%c192, %c0_61], %127 {strides = array<i32>} : memref<224x1024xf32, #tpu.memory_space<vmem>>, vector<8x1024xf32>,
    %c952_i32 = arith.constant 952 : i32
    %129 = tpu.dynamic_rotate %4 by %c952_i32 dim 1 : vector<8x1024xf32>, i32 -> vector<8x1024xf32>
    %c25 = arith.constant 25 : index
    %c0_62 = arith.constant 0 : index
    %130 = vector.load %arg3[%c25, %c0_62] : memref<32x1024xf32, #tpu.memory_space<vmem>>, vector<1x1024xf32>
    %131 = vector.broadcast %130 : vector<1x1024xf32> to vector<8x1024xf32>
    %132 = arith.mulf %129, %131 : vector<8x1024xf32>
    %c200 = arith.constant 200 : index
    %c0_63 = arith.constant 0 : index
    %133 = vector.load %arg5[%c200, %c0_63] : memref<224x1024xf32, #tpu.memory_space<vmem>>, vector<8x1024xf32>
    tpu.vector_store %arg5[%c200, %c0_63], %132 {strides = array<i32>} : memref<224x1024xf32, #tpu.memory_space<vmem>>, vector<8x1024xf32>,
    %c951_i32 = arith.constant 951 : i32
    %134 = tpu.dynamic_rotate %4 by %c951_i32 dim 1 : vector<8x1024xf32>, i32 -> vector<8x1024xf32>
    %c26 = arith.constant 26 : index
    %c0_64 = arith.constant 0 : index
    %135 = vector.load %arg3[%c26, %c0_64] : memref<32x1024xf32, #tpu.memory_space<vmem>>, vector<1x1024xf32>
    %136 = vector.broadcast %135 : vector<1x1024xf32> to vector<8x1024xf32>
    %137 = arith.mulf %134, %136 : vector<8x1024xf32>
    %c208 = arith.constant 208 : index
    %c0_65 = arith.constant 0 : index
    %138 = vector.load %arg5[%c208, %c0_65] : memref<224x1024xf32, #tpu.memory_space<vmem>>, vector<8x1024xf32>
    tpu.vector_store %arg5[%c208, %c0_65], %137 {strides = array<i32>} : memref<224x1024xf32, #tpu.memory_space<vmem>>, vector<8x1024xf32>,
    %c0_66 = arith.constant 0 : index
    %c0_67 = arith.constant 0 : index
    %139 = vector.load %arg5[%c0_66, %c0_67] : memref<224x1024xf32, #tpu.memory_space<vmem>>, vector<224x1024xf32>
    %cst_68 = arith.constant dense<0.000000e+00> : vector<8x1024xf32>
    %140 = tpu.matmul %7, %139, %cst_68 {dimension_numbers = #tpu.dot_dimension_numbers<[1], [0], [0], [1], [0, 0, 1, 1], [], []>} : vector<8x224xf32>, vector<224x1024xf32>, vector<8x1024xf32> -> vector<8x1024xf32>
    %141 = arith.mulf %140, %140 : vector<8x1024xf32>
    %142 = tpu.concatenate %140, %141 in 0 : vector<8x1024xf32>, vector<8x1024xf32> -> vector<16x1024xf32>
    %143 = vector.extract_strided_slice %142 {offsets = [0, 0], sizes = [16, 512], strides = [1, 1]} : vector<16x1024xf32> to vector<16x512xf32>
    %cst_69 = arith.constant dense<0.000000e+00> : vector<16xf32>
    %144 = vector.multi_reduction <add>, %143, %cst_69 [1] : vector<16x512xf32> to vector<16xf32>
    %145 = vector.shape_cast %144 : vector<16xf32> to vector<16x1xf32>
    %cst_70 = arith.constant 0.001953125 : f32
    %146 = vector.broadcast %cst_70 : f32 to vector<16x1xf32>
    %147 = arith.mulf %145, %146 : vector<16x1xf32>
    %148 = vector.extract_strided_slice %147 {offsets = [0, 0], sizes = [8, 1], strides = [1, 1]} : vector<16x1xf32> to vector<8x1xf32>
    %149 = vector.extract_strided_slice %147 {offsets = [8, 0], sizes = [8, 1], strides = [1, 1]} : vector<16x1xf32> to vector<8x1xf32>
    %150 = arith.mulf %148, %148 : vector<8x1xf32>
    %151 = arith.subf %149, %150 : vector<8x1xf32>
    %cst_71 = arith.constant 0.000000e+00 : f32
    %152 = vector.broadcast %cst_71 : f32 to vector<8x1xf32>
    %153 = arith.maximumf %151, %152 : vector<8x1xf32>
    %154 = vector.extract_strided_slice %140 {offsets = [0, 0], sizes = [8, 512], strides = [1, 1]} : vector<8x1024xf32> to vector<8x512xf32>
    %155 = vector.broadcast %148 : vector<8x1xf32> to vector<8x512xf32>
    %156 = arith.subf %154, %155 : vector<8x512xf32>
    %cst_72 = arith.constant 9.99999974E-6 : f32
    %157 = vector.broadcast %cst_72 : f32 to vector<8x1xf32>
    %158 = arith.addf %153, %157 : vector<8x1xf32>
    %159 = math.rsqrt %158 : vector<8x1xf32>
    %160 = vector.broadcast %159 : vector<8x1xf32> to vector<8x512xf32>
    %161 = arith.mulf %156, %160 : vector<8x512xf32>
    %162 = vector.extract_strided_slice %142 {offsets = [0, 512], sizes = [16, 512], strides = [1, 1]} : vector<16x1024xf32> to vector<16x512xf32>
    %cst_73 = arith.constant dense<0.000000e+00> : vector<16xf32>
    %163 = vector.multi_reduction <add>, %162, %cst_73 [1] : vector<16x512xf32> to vector<16xf32>
    %164 = vector.shape_cast %163 : vector<16xf32> to vector<16x1xf32>
    %cst_74 = arith.constant 0.001953125 : f32
    %165 = vector.broadcast %cst_74 : f32 to vector<16x1xf32>
    %166 = arith.mulf %164, %165 : vector<16x1xf32>
    %167 = vector.extract_strided_slice %166 {offsets = [0, 0], sizes = [8, 1], strides = [1, 1]} : vector<16x1xf32> to vector<8x1xf32>
    %168 = vector.extract_strided_slice %166 {offsets = [8, 0], sizes = [8, 1], strides = [1, 1]} : vector<16x1xf32> to vector<8x1xf32>
    %169 = arith.mulf %167, %167 : vector<8x1xf32>
    %170 = arith.subf %168, %169 : vector<8x1xf32>
    %cst_75 = arith.constant 0.000000e+00 : f32
    %171 = vector.broadcast %cst_75 : f32 to vector<8x1xf32>
    %172 = arith.maximumf %170, %171 : vector<8x1xf32>
    %173 = vector.extract_strided_slice %140 {offsets = [0, 512], sizes = [8, 512], strides = [1, 1]} : vector<8x1024xf32> to vector<8x512xf32>
    %174 = vector.broadcast %167 : vector<8x1xf32> to vector<8x512xf32>
    %175 = arith.subf %173, %174 : vector<8x512xf32>
    %cst_76 = arith.constant 9.99999974E-6 : f32
    %176 = vector.broadcast %cst_76 : f32 to vector<8x1xf32>
    %177 = arith.addf %172, %176 : vector<8x1xf32>
    %178 = math.rsqrt %177 : vector<8x1xf32>
    %179 = vector.broadcast %178 : vector<8x1xf32> to vector<8x512xf32>
    %180 = arith.mulf %175, %179 : vector<8x512xf32>
    %181 = tpu.concatenate %161, %180 in 1 : vector<8x512xf32>, vector<8x512xf32> -> vector<8x1024xf32>
    %cst_77 = arith.constant 0.000000e+00 : f32
    %182 = vector.broadcast %cst_77 : f32 to vector<8x1024xf32>
    %183 = arith.maximumf %181, %182 : vector<8x1024xf32>
    %c8_78 = arith.constant 8 : index
    %c0_79 = arith.constant 0 : index
    %184 = vector.load %arg2[%c8_78, %c0_79] : memref<16x224xf32, #tpu.memory_space<vmem>>, vector<8x224xf32>
    %c73_i32_80 = arith.constant 73 : i32
    %185 = tpu.dynamic_rotate %183 by %c73_i32_80 dim 1 : vector<8x1024xf32>, i32 -> vector<8x1024xf32>
    %c0_81 = arith.constant 0 : index
    %c0_82 = arith.constant 0 : index
    %186 = vector.load %arg3[%c0_81, %c0_82] : memref<32x1024xf32, #tpu.memory_space<vmem>>, vector<1x1024xf32>
    %187 = vector.broadcast %186 : vector<1x1024xf32> to vector<8x1024xf32>
    %188 = arith.mulf %185, %187 : vector<8x1024xf32>
    %c0_83 = arith.constant 0 : index
    %c0_84 = arith.constant 0 : index
    %189 = vector.load %arg5[%c0_83, %c0_84] : memref<224x1024xf32, #tpu.memory_space<vmem>>, vector<8x1024xf32>
    tpu.vector_store %arg5[%c0_83, %c0_84], %188 {strides = array<i32>} : memref<224x1024xf32, #tpu.memory_space<vmem>>, vector<8x1024xf32>,
    %c72_i32_85 = arith.constant 72 : i32
    %190 = tpu.dynamic_rotate %183 by %c72_i32_85 dim 1 : vector<8x1024xf32>, i32 -> vector<8x1024xf32>
    %c1_86 = arith.constant 1 : index
    %c0_87 = arith.constant 0 : index
    %191 = vector.load %arg3[%c1_86, %c0_87] : memref<32x1024xf32, #tpu.memory_space<vmem>>, vector<1x1024xf32>
    %192 = vector.broadcast %191 : vector<1x1024xf32> to vector<8x1024xf32>
    %193 = arith.mulf %190, %192 : vector<8x1024xf32>
    %c8_88 = arith.constant 8 : index
    %c0_89 = arith.constant 0 : index
    %194 = vector.load %arg5[%c8_88, %c0_89] : memref<224x1024xf32, #tpu.memory_space<vmem>>, vector<8x1024xf32>
    tpu.vector_store %arg5[%c8_88, %c0_89], %193 {strides = array<i32>} : memref<224x1024xf32, #tpu.memory_space<vmem>>, vector<8x1024xf32>,
    %c71_i32_90 = arith.constant 71 : i32
    %195 = tpu.dynamic_rotate %183 by %c71_i32_90 dim 1 : vector<8x1024xf32>, i32 -> vector<8x1024xf32>
    %c2_91 = arith.constant 2 : index
    %c0_92 = arith.constant 0 : index
    %196 = vector.load %arg3[%c2_91, %c0_92] : memref<32x1024xf32, #tpu.memory_space<vmem>>, vector<1x1024xf32>
    %197 = vector.broadcast %196 : vector<1x1024xf32> to vector<8x1024xf32>
    %198 = arith.mulf %195, %197 : vector<8x1024xf32>
    %c16_93 = arith.constant 16 : index
    %c0_94 = arith.constant 0 : index
    %199 = vector.load %arg5[%c16_93, %c0_94] : memref<224x1024xf32, #tpu.memory_space<vmem>>, vector<8x1024xf32>
    tpu.vector_store %arg5[%c16_93, %c0_94], %198 {strides = array<i32>} : memref<224x1024xf32, #tpu.memory_space<vmem>>, vector<8x1024xf32>,
    %c65_i32_95 = arith.constant 65 : i32
    %200 = tpu.dynamic_rotate %183 by %c65_i32_95 dim 1 : vector<8x1024xf32>, i32 -> vector<8x1024xf32>
    %c3_96 = arith.constant 3 : index
    %c0_97 = arith.constant 0 : index
    %201 = vector.load %arg3[%c3_96, %c0_97] : memref<32x1024xf32, #tpu.memory_space<vmem>>, vector<1x1024xf32>
    %202 = vector.broadcast %201 : vector<1x1024xf32> to vector<8x1024xf32>
    %203 = arith.mulf %200, %202 : vector<8x1024xf32>
    %c24_98 = arith.constant 24 : index
    %c0_99 = arith.constant 0 : index
    %204 = vector.load %arg5[%c24_98, %c0_99] : memref<224x1024xf32, #tpu.memory_space<vmem>>, vector<8x1024xf32>
    tpu.vector_store %arg5[%c24_98, %c0_99], %203 {strides = array<i32>} : memref<224x1024xf32, #tpu.memory_space<vmem>>, vector<8x1024xf32>,
    %c64_i32_100 = arith.constant 64 : i32
    %205 = tpu.dynamic_rotate %183 by %c64_i32_100 dim 1 : vector<8x1024xf32>, i32 -> vector<8x1024xf32>
    %c4_101 = arith.constant 4 : index
    %c0_102 = arith.constant 0 : index
    %206 = vector.load %arg3[%c4_101, %c0_102] : memref<32x1024xf32, #tpu.memory_space<vmem>>, vector<1x1024xf32>
    %207 = vector.broadcast %206 : vector<1x1024xf32> to vector<8x1024xf32>
    %208 = arith.mulf %205, %207 : vector<8x1024xf32>
    %c32_103 = arith.constant 32 : index
    %c0_104 = arith.constant 0 : index
    %209 = vector.load %arg5[%c32_103, %c0_104] : memref<224x1024xf32, #tpu.memory_space<vmem>>, vector<8x1024xf32>
    tpu.vector_store %arg5[%c32_103, %c0_104], %208 {strides = array<i32>} : memref<224x1024xf32, #tpu.memory_space<vmem>>, vector<8x1024xf32>,
    %c63_i32_105 = arith.constant 63 : i32
    %210 = tpu.dynamic_rotate %183 by %c63_i32_105 dim 1 : vector<8x1024xf32>, i32 -> vector<8x1024xf32>
    %c5_106 = arith.constant 5 : index
    %c0_107 = arith.constant 0 : index
    %211 = vector.load %arg3[%c5_106, %c0_107] : memref<32x1024xf32, #tpu.memory_space<vmem>>, vector<1x1024xf32>
    %212 = vector.broadcast %211 : vector<1x1024xf32> to vector<8x1024xf32>
    %213 = arith.mulf %210, %212 : vector<8x1024xf32>
    %c40_108 = arith.constant 40 : index
    %c0_109 = arith.constant 0 : index
    %214 = vector.load %arg5[%c40_108, %c0_109] : memref<224x1024xf32, #tpu.memory_space<vmem>>, vector<8x1024xf32>
    tpu.vector_store %arg5[%c40_108, %c0_109], %213 {strides = array<i32>} : memref<224x1024xf32, #tpu.memory_space<vmem>>, vector<8x1024xf32>,
    %c57_i32_110 = arith.constant 57 : i32
    %215 = tpu.dynamic_rotate %183 by %c57_i32_110 dim 1 : vector<8x1024xf32>, i32 -> vector<8x1024xf32>
    %c6_111 = arith.constant 6 : index
    %c0_112 = arith.constant 0 : index
    %216 = vector.load %arg3[%c6_111, %c0_112] : memref<32x1024xf32, #tpu.memory_space<vmem>>, vector<1x1024xf32>
    %217 = vector.broadcast %216 : vector<1x1024xf32> to vector<8x1024xf32>
    %218 = arith.mulf %215, %217 : vector<8x1024xf32>
    %c48_113 = arith.constant 48 : index
    %c0_114 = arith.constant 0 : index
    %219 = vector.load %arg5[%c48_113, %c0_114] : memref<224x1024xf32, #tpu.memory_space<vmem>>, vector<8x1024xf32>
    tpu.vector_store %arg5[%c48_113, %c0_114], %218 {strides = array<i32>} : memref<224x1024xf32, #tpu.memory_space<vmem>>, vector<8x1024xf32>,
    %c56_i32_115 = arith.constant 56 : i32
    %220 = tpu.dynamic_rotate %183 by %c56_i32_115 dim 1 : vector<8x1024xf32>, i32 -> vector<8x1024xf32>
    %c7_116 = arith.constant 7 : index
    %c0_117 = arith.constant 0 : index
    %221 = vector.load %arg3[%c7_116, %c0_117] : memref<32x1024xf32, #tpu.memory_space<vmem>>, vector<1x1024xf32>
    %222 = vector.broadcast %221 : vector<1x1024xf32> to vector<8x1024xf32>
    %223 = arith.mulf %220, %222 : vector<8x1024xf32>
    %c56_118 = arith.constant 56 : index
    %c0_119 = arith.constant 0 : index
    %224 = vector.load %arg5[%c56_118, %c0_119] : memref<224x1024xf32, #tpu.memory_space<vmem>>, vector<8x1024xf32>
    tpu.vector_store %arg5[%c56_118, %c0_119], %223 {strides = array<i32>} : memref<224x1024xf32, #tpu.memory_space<vmem>>, vector<8x1024xf32>,
    %c55_i32_120 = arith.constant 55 : i32
    %225 = tpu.dynamic_rotate %183 by %c55_i32_120 dim 1 : vector<8x1024xf32>, i32 -> vector<8x1024xf32>
    %c8_121 = arith.constant 8 : index
    %c0_122 = arith.constant 0 : index
    %226 = vector.load %arg3[%c8_121, %c0_122] : memref<32x1024xf32, #tpu.memory_space<vmem>>, vector<1x1024xf32>
    %227 = vector.broadcast %226 : vector<1x1024xf32> to vector<8x1024xf32>
    %228 = arith.mulf %225, %227 : vector<8x1024xf32>
    %c64_123 = arith.constant 64 : index
    %c0_124 = arith.constant 0 : index
    %229 = vector.load %arg5[%c64_123, %c0_124] : memref<224x1024xf32, #tpu.memory_space<vmem>>, vector<8x1024xf32>
    tpu.vector_store %arg5[%c64_123, %c0_124], %228 {strides = array<i32>} : memref<224x1024xf32, #tpu.memory_space<vmem>>, vector<8x1024xf32>,
    %c9_i32_125 = arith.constant 9 : i32
    %230 = tpu.dynamic_rotate %183 by %c9_i32_125 dim 1 : vector<8x1024xf32>, i32 -> vector<8x1024xf32>
    %c9_126 = arith.constant 9 : index
    %c0_127 = arith.constant 0 : index
    %231 = vector.load %arg3[%c9_126, %c0_127] : memref<32x1024xf32, #tpu.memory_space<vmem>>, vector<1x1024xf32>
    %232 = vector.broadcast %231 : vector<1x1024xf32> to vector<8x1024xf32>
    %233 = arith.mulf %230, %232 : vector<8x1024xf32>
    %c72_128 = arith.constant 72 : index
    %c0_129 = arith.constant 0 : index
    %234 = vector.load %arg5[%c72_128, %c0_129] : memref<224x1024xf32, #tpu.memory_space<vmem>>, vector<8x1024xf32>
    tpu.vector_store %arg5[%c72_128, %c0_129], %233 {strides = array<i32>} : memref<224x1024xf32, #tpu.memory_space<vmem>>, vector<8x1024xf32>,
    %c8_i32_130 = arith.constant 8 : i32
    %235 = tpu.dynamic_rotate %183 by %c8_i32_130 dim 1 : vector<8x1024xf32>, i32 -> vector<8x1024xf32>
    %c10_131 = arith.constant 10 : index
    %c0_132 = arith.constant 0 : index
    %236 = vector.load %arg3[%c10_131, %c0_132] : memref<32x1024xf32, #tpu.memory_space<vmem>>, vector<1x1024xf32>
    %237 = vector.broadcast %236 : vector<1x1024xf32> to vector<8x1024xf32>
    %238 = arith.mulf %235, %237 : vector<8x1024xf32>
    %c80_133 = arith.constant 80 : index
    %c0_134 = arith.constant 0 : index
    %239 = vector.load %arg5[%c80_133, %c0_134] : memref<224x1024xf32, #tpu.memory_space<vmem>>, vector<8x1024xf32>
    tpu.vector_store %arg5[%c80_133, %c0_134], %238 {strides = array<i32>} : memref<224x1024xf32, #tpu.memory_space<vmem>>, vector<8x1024xf32>,
    %c7_i32_135 = arith.constant 7 : i32
    %240 = tpu.dynamic_rotate %183 by %c7_i32_135 dim 1 : vector<8x1024xf32>, i32 -> vector<8x1024xf32>
    %c11_136 = arith.constant 11 : index
    %c0_137 = arith.constant 0 : index
    %241 = vector.load %arg3[%c11_136, %c0_137] : memref<32x1024xf32, #tpu.memory_space<vmem>>, vector<1x1024xf32>
    %242 = vector.broadcast %241 : vector<1x1024xf32> to vector<8x1024xf32>
    %243 = arith.mulf %240, %242 : vector<8x1024xf32>
    %c88_138 = arith.constant 88 : index
    %c0_139 = arith.constant 0 : index
    %244 = vector.load %arg5[%c88_138, %c0_139] : memref<224x1024xf32, #tpu.memory_space<vmem>>, vector<8x1024xf32>
    tpu.vector_store %arg5[%c88_138, %c0_139], %243 {strides = array<i32>} : memref<224x1024xf32, #tpu.memory_space<vmem>>, vector<8x1024xf32>,
    %c1_i32_140 = arith.constant 1 : i32
    %245 = tpu.dynamic_rotate %183 by %c1_i32_140 dim 1 : vector<8x1024xf32>, i32 -> vector<8x1024xf32>
    %c12_141 = arith.constant 12 : index
    %c0_142 = arith.constant 0 : index
    %246 = vector.load %arg3[%c12_141, %c0_142] : memref<32x1024xf32, #tpu.memory_space<vmem>>, vector<1x1024xf32>
    %247 = vector.broadcast %246 : vector<1x1024xf32> to vector<8x1024xf32>
    %248 = arith.mulf %245, %247 : vector<8x1024xf32>
    %c96_143 = arith.constant 96 : index
    %c0_144 = arith.constant 0 : index
    %249 = vector.load %arg5[%c96_143, %c0_144] : memref<224x1024xf32, #tpu.memory_space<vmem>>, vector<8x1024xf32>
    tpu.vector_store %arg5[%c96_143, %c0_144], %248 {strides = array<i32>} : memref<224x1024xf32, #tpu.memory_space<vmem>>, vector<8x1024xf32>,
    %c104_145 = arith.constant 104 : index
    %c0_146 = arith.constant 0 : index
    %250 = vector.load %arg5[%c104_145, %c0_146] : memref<224x1024xf32, #tpu.memory_space<vmem>>, vector<8x1024xf32>
    tpu.vector_store %arg5[%c104_145, %c0_146], %183 {strides = array<i32>} : memref<224x1024xf32, #tpu.memory_space<vmem>>, vector<8x1024xf32>,
    %c1023_i32_147 = arith.constant 1023 : i32
    %251 = tpu.dynamic_rotate %183 by %c1023_i32_147 dim 1 : vector<8x1024xf32>, i32 -> vector<8x1024xf32>
    %c14_148 = arith.constant 14 : index
    %c0_149 = arith.constant 0 : index
    %252 = vector.load %arg3[%c14_148, %c0_149] : memref<32x1024xf32, #tpu.memory_space<vmem>>, vector<1x1024xf32>
    %253 = vector.broadcast %252 : vector<1x1024xf32> to vector<8x1024xf32>
    %254 = arith.mulf %251, %253 : vector<8x1024xf32>
    %c112_150 = arith.constant 112 : index
    %c0_151 = arith.constant 0 : index
    %255 = vector.load %arg5[%c112_150, %c0_151] : memref<224x1024xf32, #tpu.memory_space<vmem>>, vector<8x1024xf32>
    tpu.vector_store %arg5[%c112_150, %c0_151], %254 {strides = array<i32>} : memref<224x1024xf32, #tpu.memory_space<vmem>>, vector<8x1024xf32>,
    %c1017_i32_152 = arith.constant 1017 : i32
    %256 = tpu.dynamic_rotate %183 by %c1017_i32_152 dim 1 : vector<8x1024xf32>, i32 -> vector<8x1024xf32>
    %c15_153 = arith.constant 15 : index
    %c0_154 = arith.constant 0 : index
    %257 = vector.load %arg3[%c15_153, %c0_154] : memref<32x1024xf32, #tpu.memory_space<vmem>>, vector<1x1024xf32>
    %258 = vector.broadcast %257 : vector<1x1024xf32> to vector<8x1024xf32>
    %259 = arith.mulf %256, %258 : vector<8x1024xf32>
    %c120_155 = arith.constant 120 : index
    %c0_156 = arith.constant 0 : index
    %260 = vector.load %arg5[%c120_155, %c0_156] : memref<224x1024xf32, #tpu.memory_space<vmem>>, vector<8x1024xf32>
    tpu.vector_store %arg5[%c120_155, %c0_156], %259 {strides = array<i32>} : memref<224x1024xf32, #tpu.memory_space<vmem>>, vector<8x1024xf32>,
    %c1016_i32_157 = arith.constant 1016 : i32
    %261 = tpu.dynamic_rotate %183 by %c1016_i32_157 dim 1 : vector<8x1024xf32>, i32 -> vector<8x1024xf32>
    %c16_158 = arith.constant 16 : index
    %c0_159 = arith.constant 0 : index
    %262 = vector.load %arg3[%c16_158, %c0_159] : memref<32x1024xf32, #tpu.memory_space<vmem>>, vector<1x1024xf32>
    %263 = vector.broadcast %262 : vector<1x1024xf32> to vector<8x1024xf32>
    %264 = arith.mulf %261, %263 : vector<8x1024xf32>
    %c128_160 = arith.constant 128 : index
    %c0_161 = arith.constant 0 : index
    %265 = vector.load %arg5[%c128_160, %c0_161] : memref<224x1024xf32, #tpu.memory_space<vmem>>, vector<8x1024xf32>
    tpu.vector_store %arg5[%c128_160, %c0_161], %264 {strides = array<i32>} : memref<224x1024xf32, #tpu.memory_space<vmem>>, vector<8x1024xf32>,
    %c1015_i32_162 = arith.constant 1015 : i32
    %266 = tpu.dynamic_rotate %183 by %c1015_i32_162 dim 1 : vector<8x1024xf32>, i32 -> vector<8x1024xf32>
    %c17_163 = arith.constant 17 : index
    %c0_164 = arith.constant 0 : index
    %267 = vector.load %arg3[%c17_163, %c0_164] : memref<32x1024xf32, #tpu.memory_space<vmem>>, vector<1x1024xf32>
    %268 = vector.broadcast %267 : vector<1x1024xf32> to vector<8x1024xf32>
    %269 = arith.mulf %266, %268 : vector<8x1024xf32>
    %c136_165 = arith.constant 136 : index
    %c0_166 = arith.constant 0 : index
    %270 = vector.load %arg5[%c136_165, %c0_166] : memref<224x1024xf32, #tpu.memory_space<vmem>>, vector<8x1024xf32>
    tpu.vector_store %arg5[%c136_165, %c0_166], %269 {strides = array<i32>} : memref<224x1024xf32, #tpu.memory_space<vmem>>, vector<8x1024xf32>,
    %c969_i32_167 = arith.constant 969 : i32
    %271 = tpu.dynamic_rotate %183 by %c969_i32_167 dim 1 : vector<8x1024xf32>, i32 -> vector<8x1024xf32>
    %c18_168 = arith.constant 18 : index
    %c0_169 = arith.constant 0 : index
    %272 = vector.load %arg3[%c18_168, %c0_169] : memref<32x1024xf32, #tpu.memory_space<vmem>>, vector<1x1024xf32>
    %273 = vector.broadcast %272 : vector<1x1024xf32> to vector<8x1024xf32>
    %274 = arith.mulf %271, %273 : vector<8x1024xf32>
    %c144_170 = arith.constant 144 : index
    %c0_171 = arith.constant 0 : index
    %275 = vector.load %arg5[%c144_170, %c0_171] : memref<224x1024xf32, #tpu.memory_space<vmem>>, vector<8x1024xf32>
    tpu.vector_store %arg5[%c144_170, %c0_171], %274 {strides = array<i32>} : memref<224x1024xf32, #tpu.memory_space<vmem>>, vector<8x1024xf32>,
    %c968_i32_172 = arith.constant 968 : i32
    %276 = tpu.dynamic_rotate %183 by %c968_i32_172 dim 1 : vector<8x1024xf32>, i32 -> vector<8x1024xf32>
    %c19_173 = arith.constant 19 : index
    %c0_174 = arith.constant 0 : index
    %277 = vector.load %arg3[%c19_173, %c0_174] : memref<32x1024xf32, #tpu.memory_space<vmem>>, vector<1x1024xf32>
    %278 = vector.broadcast %277 : vector<1x1024xf32> to vector<8x1024xf32>
    %279 = arith.mulf %276, %278 : vector<8x1024xf32>
    %c152_175 = arith.constant 152 : index
    %c0_176 = arith.constant 0 : index
    %280 = vector.load %arg5[%c152_175, %c0_176] : memref<224x1024xf32, #tpu.memory_space<vmem>>, vector<8x1024xf32>
    tpu.vector_store %arg5[%c152_175, %c0_176], %279 {strides = array<i32>} : memref<224x1024xf32, #tpu.memory_space<vmem>>, vector<8x1024xf32>,
    %c967_i32_177 = arith.constant 967 : i32
    %281 = tpu.dynamic_rotate %183 by %c967_i32_177 dim 1 : vector<8x1024xf32>, i32 -> vector<8x1024xf32>
    %c20_178 = arith.constant 20 : index
    %c0_179 = arith.constant 0 : index
    %282 = vector.load %arg3[%c20_178, %c0_179] : memref<32x1024xf32, #tpu.memory_space<vmem>>, vector<1x1024xf32>
    %283 = vector.broadcast %282 : vector<1x1024xf32> to vector<8x1024xf32>
    %284 = arith.mulf %281, %283 : vector<8x1024xf32>
    %c160_180 = arith.constant 160 : index
    %c0_181 = arith.constant 0 : index
    %285 = vector.load %arg5[%c160_180, %c0_181] : memref<224x1024xf32, #tpu.memory_space<vmem>>, vector<8x1024xf32>
    tpu.vector_store %arg5[%c160_180, %c0_181], %284 {strides = array<i32>} : memref<224x1024xf32, #tpu.memory_space<vmem>>, vector<8x1024xf32>,
    %c961_i32_182 = arith.constant 961 : i32
    %286 = tpu.dynamic_rotate %183 by %c961_i32_182 dim 1 : vector<8x1024xf32>, i32 -> vector<8x1024xf32>
    %c21_183 = arith.constant 21 : index
    %c0_184 = arith.constant 0 : index
    %287 = vector.load %arg3[%c21_183, %c0_184] : memref<32x1024xf32, #tpu.memory_space<vmem>>, vector<1x1024xf32>
    %288 = vector.broadcast %287 : vector<1x1024xf32> to vector<8x1024xf32>
    %289 = arith.mulf %286, %288 : vector<8x1024xf32>
    %c168_185 = arith.constant 168 : index
    %c0_186 = arith.constant 0 : index
    %290 = vector.load %arg5[%c168_185, %c0_186] : memref<224x1024xf32, #tpu.memory_space<vmem>>, vector<8x1024xf32>
    tpu.vector_store %arg5[%c168_185, %c0_186], %289 {strides = array<i32>} : memref<224x1024xf32, #tpu.memory_space<vmem>>, vector<8x1024xf32>,
    %c960_i32_187 = arith.constant 960 : i32
    %291 = tpu.dynamic_rotate %183 by %c960_i32_187 dim 1 : vector<8x1024xf32>, i32 -> vector<8x1024xf32>
    %c22_188 = arith.constant 22 : index
    %c0_189 = arith.constant 0 : index
    %292 = vector.load %arg3[%c22_188, %c0_189] : memref<32x1024xf32, #tpu.memory_space<vmem>>, vector<1x1024xf32>
    %293 = vector.broadcast %292 : vector<1x1024xf32> to vector<8x1024xf32>
    %294 = arith.mulf %291, %293 : vector<8x1024xf32>
    %c176_190 = arith.constant 176 : index
    %c0_191 = arith.constant 0 : index
    %295 = vector.load %arg5[%c176_190, %c0_191] : memref<224x1024xf32, #tpu.memory_space<vmem>>, vector<8x1024xf32>
    tpu.vector_store %arg5[%c176_190, %c0_191], %294 {strides = array<i32>} : memref<224x1024xf32, #tpu.memory_space<vmem>>, vector<8x1024xf32>,
    %c959_i32_192 = arith.constant 959 : i32
    %296 = tpu.dynamic_rotate %183 by %c959_i32_192 dim 1 : vector<8x1024xf32>, i32 -> vector<8x1024xf32>
    %c23_193 = arith.constant 23 : index
    %c0_194 = arith.constant 0 : index
    %297 = vector.load %arg3[%c23_193, %c0_194] : memref<32x1024xf32, #tpu.memory_space<vmem>>, vector<1x1024xf32>
    %298 = vector.broadcast %297 : vector<1x1024xf32> to vector<8x1024xf32>
    %299 = arith.mulf %296, %298 : vector<8x1024xf32>
    %c184_195 = arith.constant 184 : index
    %c0_196 = arith.constant 0 : index
    %300 = vector.load %arg5[%c184_195, %c0_196] : memref<224x1024xf32, #tpu.memory_space<vmem>>, vector<8x1024xf32>
    tpu.vector_store %arg5[%c184_195, %c0_196], %299 {strides = array<i32>} : memref<224x1024xf32, #tpu.memory_space<vmem>>, vector<8x1024xf32>,
    %c953_i32_197 = arith.constant 953 : i32
    %301 = tpu.dynamic_rotate %183 by %c953_i32_197 dim 1 : vector<8x1024xf32>, i32 -> vector<8x1024xf32>
    %c24_198 = arith.constant 24 : index
    %c0_199 = arith.constant 0 : index
    %302 = vector.load %arg3[%c24_198, %c0_199] : memref<32x1024xf32, #tpu.memory_space<vmem>>, vector<1x1024xf32>
    %303 = vector.broadcast %302 : vector<1x1024xf32> to vector<8x1024xf32>
    %304 = arith.mulf %301, %303 : vector<8x1024xf32>
    %c192_200 = arith.constant 192 : index
    %c0_201 = arith.constant 0 : index
    %305 = vector.load %arg5[%c192_200, %c0_201] : memref<224x1024xf32, #tpu.memory_space<vmem>>, vector<8x1024xf32>
    tpu.vector_store %arg5[%c192_200, %c0_201], %304 {strides = array<i32>} : memref<224x1024xf32, #tpu.memory_space<vmem>>, vector<8x1024xf32>,
    %c952_i32_202 = arith.constant 952 : i32
    %306 = tpu.dynamic_rotate %183 by %c952_i32_202 dim 1 : vector<8x1024xf32>, i32 -> vector<8x1024xf32>
    %c25_203 = arith.constant 25 : index
    %c0_204 = arith.constant 0 : index
    %307 = vector.load %arg3[%c25_203, %c0_204] : memref<32x1024xf32, #tpu.memory_space<vmem>>, vector<1x1024xf32>
    %308 = vector.broadcast %307 : vector<1x1024xf32> to vector<8x1024xf32>
    %309 = arith.mulf %306, %308 : vector<8x1024xf32>
    %c200_205 = arith.constant 200 : index
    %c0_206 = arith.constant 0 : index
    %310 = vector.load %arg5[%c200_205, %c0_206] : memref<224x1024xf32, #tpu.memory_space<vmem>>, vector<8x1024xf32>
    tpu.vector_store %arg5[%c200_205, %c0_206], %309 {strides = array<i32>} : memref<224x1024xf32, #tpu.memory_space<vmem>>, vector<8x1024xf32>,
    %c951_i32_207 = arith.constant 951 : i32
    %311 = tpu.dynamic_rotate %183 by %c951_i32_207 dim 1 : vector<8x1024xf32>, i32 -> vector<8x1024xf32>
    %c26_208 = arith.constant 26 : index
    %c0_209 = arith.constant 0 : index
    %312 = vector.load %arg3[%c26_208, %c0_209] : memref<32x1024xf32, #tpu.memory_space<vmem>>, vector<1x1024xf32>
    %313 = vector.broadcast %312 : vector<1x1024xf32> to vector<8x1024xf32>
    %314 = arith.mulf %311, %313 : vector<8x1024xf32>
    %c208_210 = arith.constant 208 : index
    %c0_211 = arith.constant 0 : index
    %315 = vector.load %arg5[%c208_210, %c0_211] : memref<224x1024xf32, #tpu.memory_space<vmem>>, vector<8x1024xf32>
    tpu.vector_store %arg5[%c208_210, %c0_211], %314 {strides = array<i32>} : memref<224x1024xf32, #tpu.memory_space<vmem>>, vector<8x1024xf32>,
    %c0_212 = arith.constant 0 : index
    %c0_213 = arith.constant 0 : index
    %316 = vector.load %arg5[%c0_212, %c0_213] : memref<224x1024xf32, #tpu.memory_space<vmem>>, vector<224x1024xf32>
    %cst_214 = arith.constant dense<0.000000e+00> : vector<8x1024xf32>
    %317 = tpu.matmul %184, %316, %cst_214 {dimension_numbers = #tpu.dot_dimension_numbers<[1], [0], [0], [1], [0, 0, 1, 1], [], []>} : vector<8x224xf32>, vector<224x1024xf32>, vector<8x1024xf32> -> vector<8x1024xf32>
    %318 = arith.mulf %317, %317 : vector<8x1024xf32>
    %319 = tpu.concatenate %317, %318 in 0 : vector<8x1024xf32>, vector<8x1024xf32> -> vector<16x1024xf32>
    %320 = vector.extract_strided_slice %319 {offsets = [0, 0], sizes = [16, 512], strides = [1, 1]} : vector<16x1024xf32> to vector<16x512xf32>
    %cst_215 = arith.constant dense<0.000000e+00> : vector<16xf32>
    %321 = vector.multi_reduction <add>, %320, %cst_215 [1] : vector<16x512xf32> to vector<16xf32>
    %322 = vector.shape_cast %321 : vector<16xf32> to vector<16x1xf32>
    %cst_216 = arith.constant 0.001953125 : f32
    %323 = vector.broadcast %cst_216 : f32 to vector<16x1xf32>
    %324 = arith.mulf %322, %323 : vector<16x1xf32>
    %325 = vector.extract_strided_slice %324 {offsets = [0, 0], sizes = [8, 1], strides = [1, 1]} : vector<16x1xf32> to vector<8x1xf32>
    %326 = vector.extract_strided_slice %324 {offsets = [8, 0], sizes = [8, 1], strides = [1, 1]} : vector<16x1xf32> to vector<8x1xf32>
    %327 = arith.mulf %325, %325 : vector<8x1xf32>
    %328 = arith.subf %326, %327 : vector<8x1xf32>
    %cst_217 = arith.constant 0.000000e+00 : f32
    %329 = vector.broadcast %cst_217 : f32 to vector<8x1xf32>
    %330 = arith.maximumf %328, %329 : vector<8x1xf32>
    %331 = vector.extract_strided_slice %317 {offsets = [0, 0], sizes = [8, 512], strides = [1, 1]} : vector<8x1024xf32> to vector<8x512xf32>
    %332 = vector.broadcast %325 : vector<8x1xf32> to vector<8x512xf32>
    %333 = arith.subf %331, %332 : vector<8x512xf32>
    %cst_218 = arith.constant 9.99999974E-6 : f32
    %334 = vector.broadcast %cst_218 : f32 to vector<8x1xf32>
    %335 = arith.addf %330, %334 : vector<8x1xf32>
    %336 = math.rsqrt %335 : vector<8x1xf32>
    %337 = vector.broadcast %336 : vector<8x1xf32> to vector<8x512xf32>
    %338 = arith.mulf %333, %337 : vector<8x512xf32>
    %339 = vector.extract_strided_slice %319 {offsets = [0, 512], sizes = [16, 512], strides = [1, 1]} : vector<16x1024xf32> to vector<16x512xf32>
    %cst_219 = arith.constant dense<0.000000e+00> : vector<16xf32>
    %340 = vector.multi_reduction <add>, %339, %cst_219 [1] : vector<16x512xf32> to vector<16xf32>
    %341 = vector.shape_cast %340 : vector<16xf32> to vector<16x1xf32>
    %cst_220 = arith.constant 0.001953125 : f32
    %342 = vector.broadcast %cst_220 : f32 to vector<16x1xf32>
    %343 = arith.mulf %341, %342 : vector<16x1xf32>
    %344 = vector.extract_strided_slice %343 {offsets = [0, 0], sizes = [8, 1], strides = [1, 1]} : vector<16x1xf32> to vector<8x1xf32>
    %345 = vector.extract_strided_slice %343 {offsets = [8, 0], sizes = [8, 1], strides = [1, 1]} : vector<16x1xf32> to vector<8x1xf32>
    %346 = arith.mulf %344, %344 : vector<8x1xf32>
    %347 = arith.subf %345, %346 : vector<8x1xf32>
    %cst_221 = arith.constant 0.000000e+00 : f32
    %348 = vector.broadcast %cst_221 : f32 to vector<8x1xf32>
    %349 = arith.maximumf %347, %348 : vector<8x1xf32>
    %350 = vector.extract_strided_slice %317 {offsets = [0, 512], sizes = [8, 512], strides = [1, 1]} : vector<8x1024xf32> to vector<8x512xf32>
    %351 = vector.broadcast %344 : vector<8x1xf32> to vector<8x512xf32>
    %352 = arith.subf %350, %351 : vector<8x512xf32>
    %cst_222 = arith.constant 9.99999974E-6 : f32
    %353 = vector.broadcast %cst_222 : f32 to vector<8x1xf32>
    %354 = arith.addf %349, %353 : vector<8x1xf32>
    %355 = math.rsqrt %354 : vector<8x1xf32>
    %356 = vector.broadcast %355 : vector<8x1xf32> to vector<8x512xf32>
    %357 = arith.mulf %352, %356 : vector<8x512xf32>
    %358 = tpu.concatenate %338, %357 in 1 : vector<8x512xf32>, vector<8x512xf32> -> vector<8x1024xf32>
    %359 = arith.addf %4, %358 : vector<8x1024xf32>
    %360 = vector.extract_strided_slice %359 {offsets = [0, 0], sizes = [8, 512], strides = [1, 1]} : vector<8x1024xf32> to vector<8x512xf32>
    %c0_223 = arith.constant 0 : index
    %c0_224 = arith.constant 0 : index
    %c0_225 = arith.constant 0 : index
    %361 = vector.load %arg4[%c0_223, %c0_224, %c0_225] : memref<2x8x512xf32, #tpu.memory_space<vmem>>, vector<1x8x512xf32>
    %362 = vector.shape_cast %361 : vector<1x8x512xf32> to vector<8x512xf32>
    %363 = vector.shape_cast %360 : vector<8x512xf32> to vector<1x8x512xf32>
    tpu.vector_store %arg4[%c0_223, %c0_224, %c0_225], %363 {strides = array<i32>} : memref<2x8x512xf32, #tpu.memory_space<vmem>>, vector<1x8x512xf32>,
    %364 = vector.extract_strided_slice %359 {offsets = [0, 512], sizes = [8, 512], strides = [1, 1]} : vector<8x1024xf32> to vector<8x512xf32>
    %c1_226 = arith.constant 1 : index
    %c0_227 = arith.constant 0 : index
    %c0_228 = arith.constant 0 : index
    %365 = vector.load %arg4[%c1_226, %c0_227, %c0_228] : memref<2x8x512xf32, #tpu.memory_space<vmem>>, vector<1x8x512xf32>
    %366 = vector.shape_cast %365 : vector<1x8x512xf32> to vector<8x512xf32>
    %367 = vector.shape_cast %364 : vector<8x512xf32> to vector<1x8x512xf32>
    tpu.vector_store %arg4[%c1_226, %c0_227, %c0_228], %367 {strides = array<i32>} : memref<2x8x512xf32, #tpu.memory_space<vmem>>, vector<1x8x512xf32>,
    return
  }
  func.func @transform_0(%arg0: i32) -> (i32, i32, i32) {
    %c0_i32 = arith.constant 0 : i32
    %c0_i32_0 = arith.constant 0 : i32
    %c0_i32_1 = arith.constant 0 : i32
    %c0_i32_2 = arith.constant 0 : i32
    return %c0_i32, %c0_i32_0, %c0_i32_1 : i32, i32, i32
  }
  func.func @transform_1(%arg0: i32) -> (i32, i32) {
    %c0_i32 = arith.constant 0 : i32
    %c0_i32_0 = arith.constant 0 : i32
    %c0_i32_1 = arith.constant 0 : i32
    return %c0_i32, %c0_i32_0 : i32, i32
  }
  func.func @transform_2(%arg0: i32) -> (i32, i32) {
    %c0_i32 = arith.constant 0 : i32
    %c0_i32_0 = arith.constant 0 : i32
    %c0_i32_1 = arith.constant 0 : i32
    return %c0_i32, %c0_i32_0 : i32, i32
  }
  func.func @transform_3(%arg0: i32) -> (i32, i32, i32) {
    %c0_i32 = arith.constant 0 : i32
    %c0_i32_0 = arith.constant 0 : i32
    %c0_i32_1 = arith.constant 0 : i32
    %c0_i32_2 = arith.constant 0 : i32
    return %c0_i32, %c0_i32_0, %c0_i32_1 : i32, i32, i32
  }
}

</mosaic_0001>

<bundles_post_ra>
// kernel: resnet_3d_block.1
= control target key start
LH: loop header
LB: loop body
LE: loop exit
PB: predicated region body
PF: predicated region fallthrough
CT: control target
= control target key end

     0   :  { %s5354_s16 = smov 121   ;;  %s5355_s19 = smov 127   ;;  %v49_v6 = vlaneseq  ;;  %vm2277_vm7 = vcmask 785408   ;;  %s9605_s0 = inlined_call_operand.vmem [shape: f32[2,8,512], index: 0, kind: input, shape index: {}]   ;;  %s9606_s2 = inlined_call_operand.vmem [shape: f32[32,1024], index: 2, kind: input, shape index: {}]   ;;  %s9607_s1 = inlined_call_operand.vmem [shape: f32[16,224], index: 1, kind: input, shape index: {}]   ;;  %s9608_s3 = inlined_call_operand.vmem [shape: f32[2,8,512], index: 3, kind: output, shape index: {}]  }
   0x1   :  { %v5395_v0 = vld [vmem:[%s9605_s0 + $0x8] sm:$0xff]  ;;  %v5400_v1 = vld [vmem:[%s9605_s0] sm:$0xff]  ;;  %v5409_v2 = vld [vmem:[%s9605_s0 + $0x10] sm:$0xff]  ;;  %s5356_s24 = smov 1   ;;  %s5357_s27 = smov 7  }
   0x2   :  { %1248 = vrot.lane.b32.xlu0 %v5395_v0, %s5354_s16  ;;  %1246 = vrot.lane.b32.xlu1 %v5400_v1, %s5354_s16  ;;  %v5422_v3 = vld [vmem:[%s9605_s0 + $0x18] sm:$0xff]  ;;  %v5427_v4 = vld [vmem:[%s9605_s0 + $0x20] sm:$0xff]  ;;  %s5358_s28 = smov 8   ;;  %s5359_s29 = smov 9   ;;  %v5534_v7 = vshrl.u32 %v49_v6, 7  ;;  %v5542_v10 = vand.u32 127, %v49_v6 }
   0x3   :  { %v5444_v5 = vld [vmem:[%s9605_s0 + $0x38] sm:$0xff]  ;;  %s5360_s30 = smov 55   ;;  %s5361_s4 = smov 56  }
   0x4   :  { %s5362_s5 = smov 57   ;;  %s5363_s6 = smov 63   ;;  %9838 = vst [vmem:[#allocation3_spill] sm:$0xff] %v5534_v7  ;;  %v5229_v8 = vld [vmem:[%s9606_s2 + $0x47] ss:$8 sm:$0xf] }
   0x5   :  { %s5364_s7 = smov 64   ;;  %s5365_s8 = smov 65   ;;  %v5230_v9 = vld [vmem:[%s9606_s2 + $0x47] ss:$8 sm:$0xf0]  ;;  %v5549_v11 = vsub.s32 0, %v5534_v7 }
   0x6   :  { %1250 = vrot.lane.b32.xlu0 %v5409_v2, %s5354_s16  ;;  %1162 = vrot.lane.b32.xlu1 %v5395_v0, %s5355_s19  ;;  %s5366_s13 = smov 71   ;;  %v5552_v12 = vsub.s32 1, %v5534_v7  ;;  %v5554_v13 = vor.u32 %v5230_v9, %v5229_v8  ;;  %v5227_v14 = vld [vmem:[%s9606_s2 + $0x46] ss:$8 sm:$0xf]  ;;  %vm1262_vm0 = vcmp.lt.s32.totalorder %v5542_v10, 121 }
   0x7   :  { %9839 = vst [vmem:[#allocation4_spill] sm:$0xff] %v5549_v11  ;;  %v5228_v15 = vld [vmem:[%s9606_s2 + $0x46] ss:$8 sm:$0xf0]  ;;  %v5579_v24 = vsub.s32 2, %v5534_v7  ;;  %v5582_v25 = vsub.s32 3, %v5534_v7 }
   0x8   :  { %9840 = vst [vmem:[#allocation5_spill] sm:$0xff] %v5552_v12  ;;  %9841 = vst [vmem:[#allocation6_spill] sm:$0xff] %v5554_v13  ;;  %v1283_v18 = vrot.slane %v5554_v13, %v5552_v12  ;;  %v5571_v19 = vor.u32 %v5228_v15, %v5227_v14  ;;  %v1279_v20 = vrot.slane %v5554_v13, %v5549_v11  ;;  %s5367_s20 = smov 72   ;;  %vm1176_vm1 = vcmp.lt.s32.totalorder %v5542_v10, 127  ;;  %s5368_s26 = smov 73  }
   0x9   :  { %9844 = vst [vmem:[#allocation9_spill] sm:$0xff] %v5579_v24  ;;  %9845 = vst [vmem:[#allocation10_spill] sm:$0xff] %v5582_v25  ;;  %v5225_v31 = vld [vmem:[%s9606_s2 + $0x44] ss:$8 sm:$0xf]  ;;  %v1291_v37 = vrot.slane %v5554_v13, %v5582_v25  ;;  %v1287_v38 = vrot.slane %v5554_v13, %v5579_v24  ;;  %vm1082_vm2 = vcmp.lt.s32.totalorder %v5542_v10, 1 }
   0xa   :  { %1164 = vrot.lane.b32.xlu0 %v5409_v2, %s5355_s19  ;;  %1160 = vrot.lane.b32.xlu1 %v5400_v1, %s5355_s19  ;;  %9843 = vst [vmem:[#allocation8_spill] sm:$0xff] %v5571_v19  ;;  %v1197_v28 = vrot.slane %v5571_v19, %v5552_v12  ;;  %v1193_v29 = vrot.slane %v5571_v19, %v5549_v11  ;;  %v5226_v32 = vld [vmem:[%s9606_s2 + $0x44] ss:$8 sm:$0xf0]  ;;  %vm996_vm3 = vcmp.lt.s32.totalorder %v5542_v10, 7  ;;  %vm910_vm4 = vcmp.lt.s32.totalorder %v5542_v10, 8 }
   0xb   :  { %v5616_v41 = vor.u32 %v5226_v32, %v5225_v31  ;;  %v1205_v53 = vrot.slane %v5571_v19, %v5582_v25  ;;  %v1201_v54 = vrot.slane %v5571_v19, %v5579_v24  ;;  %v5223_v55 = vld [vmem:[%s9606_s2 + $0x43] ss:$8 sm:$0xf]  ;;  %v5221_v8 = vld [vmem:[%s9606_s2 + $0x42] ss:$8 sm:$0xf] }
   0xc   :  { %v5224_v56 = vld [vmem:[%s9606_s2 + $0x43] ss:$8 sm:$0xf0]  ;;  %v5222_v9 = vld [vmem:[%s9606_s2 + $0x42] ss:$8 sm:$0xf0] }
   0xd   :  { %9847 = vst [vmem:[#allocation12_spill] sm:$0xff] %v5616_v41  ;;  %v1103_v48 = vrot.slane %v5616_v41, %v5552_v12  ;;  %v5660_v61 = vor.u32 %v5224_v56, %v5223_v55  ;;  %v1099_v6 = vrot.slane %v5616_v41, %v5549_v11  ;;  %vm824_vm5 = vcmp.lt.s32.totalorder %v5542_v10, 9  ;;  %v5217_v56 = vld [vmem:[%s9606_s2 + $0x40] ss:$8 sm:$0xf]  ;;  %s5369_s14 = smov 119  }
   0xe   :  { %1252 = vrot.lane.b32.xlu0 %v5422_v3, %s5354_s16  ;;  %1254 = vrot.lane.b32.xlu1 %v5427_v4, %s5354_s16  ;;  %vm738_vm6 = vcmp.lt.s32.totalorder %v5542_v10, 55  ;;  %s5370_s25 = smov 120   ;;  %vm652_vm8 = vcmp.lt.s32.totalorder %v5542_v10, 56  ;;  %vm9692_vm9 = vcmp.lt.s32.totalorder %v5542_v10, 57  ;;  %vm9698_vm10 = vcmp.lt.s32.totalorder %v5542_v10, 63 }
   0xf   :  { %9850 = vst [vmem:[#allocation15_spill] sm:$0xff] %v5660_v61  ;;  %vm9697_vm11 = vcmp.lt.s32.totalorder %v5542_v10, 64  ;;  %vm9678_vm12 = vcmp.lt.s32.totalorder %v5542_v10, 65  ;;  %vm222_vm13 = vcmp.lt.s32.totalorder %v5542_v10, 71  ;;  %vm9679_vm14 = vcmp.lt.s32.totalorder %v5542_v10, 72 }
  0x10   :  { %vm51_vm15 = vcmp.lt.s32.totalorder %v5542_v10, 73  ;;  %v5242_v19 = vld [vmem:[%s9606_s2 + $0x85] ss:$8 sm:$0xf0] }
  0x12   :  { %1066 = vrot.lane.b32.xlu0 %v5400_v1, %s5356_s24  ;;  %1068 = vrot.lane.b32.xlu1 %v5395_v0, %s5356_s24 }
  0x16   :  { %1166 = vrot.lane.b32.xlu0 %v5422_v3, %s5355_s19  ;;  %1168 = vrot.lane.b32.xlu1 %v5427_v4, %s5355_s19 }
  0x1a   :  { %1080 = vrot.lane.b32.xlu0 %v5444_v5, %s5356_s24  ;;  %980 = vrot.lane.b32.xlu1 %v5400_v1, %s5357_s27 }
  0x1e   :  { %982 = vrot.lane.b32.xlu0 %v5395_v0, %s5357_s27  ;;  %994 = vrot.lane.b32.xlu1 %v5444_v5, %s5357_s27 }
  0x22   :  { %894 = vrot.lane.b32.xlu0 %v5400_v1, %s5358_s28  ;;  %896 = vrot.lane.b32.xlu1 %v5395_v0, %s5358_s28 }
  0x26   :  { %1070 = vrot.lane.b32.xlu0 %v5409_v2, %s5356_s24  ;;  %1072 = vrot.lane.b32.xlu1 %v5422_v3, %s5356_s24 }
  0x2a   :  { %908 = vrot.lane.b32.xlu0 %v5444_v5, %s5358_s28  ;;  %808 = vrot.lane.b32.xlu1 %v5400_v1, %s5359_s29 }
  0x2e   :  { %810 = vrot.lane.b32.xlu0 %v5395_v0, %s5359_s29  ;;  %984 = vrot.lane.b32.xlu1 %v5409_v2, %s5357_s27 }
  0x32   :  { %986 = vrot.lane.b32.xlu0 %v5422_v3, %s5357_s27  ;;  %822 = vrot.lane.b32.xlu1 %v5444_v5, %s5359_s29 }
  0x36   :  { %722 = vrot.lane.b32.xlu0 %v5400_v1, %s5360_s30  ;;  %724 = vrot.lane.b32.xlu1 %v5395_v0, %s5360_s30 }
  0x3a   :  { %898 = vrot.lane.b32.xlu0 %v5409_v2, %s5358_s28  ;;  %900 = vrot.lane.b32.xlu1 %v5422_v3, %s5358_s28 }
  0x3e   :  { %736 = vrot.lane.b32.xlu0 %v5444_v5, %s5360_s30  ;;  %636 = vrot.lane.b32.xlu1 %v5400_v1, %s5361_s4 }
  0x42   :  { %638 = vrot.lane.b32.xlu0 %v5395_v0, %s5361_s4  ;;  %812 = vrot.lane.b32.xlu1 %v5409_v2, %s5359_s29 }
  0x46   :  { %814 = vrot.lane.b32.xlu0 %v5422_v3, %s5359_s29  ;;  %650 = vrot.lane.b32.xlu1 %v5444_v5, %s5361_s4 }
  0x4a   :  { %550 = vrot.lane.b32.xlu0 %v5400_v1, %s5362_s5  ;;  %552 = vrot.lane.b32.xlu1 %v5395_v0, %s5362_s5 }
  0x4e   :  { %726 = vrot.lane.b32.xlu0 %v5409_v2, %s5360_s30  ;;  %728 = vrot.lane.b32.xlu1 %v5422_v3, %s5360_s30 }
  0x52   :  { %564 = vrot.lane.b32.xlu0 %v5444_v5, %s5362_s5  ;;  %464 = vrot.lane.b32.xlu1 %v5400_v1, %s5363_s6 }
  0x56   :  { %466 = vrot.lane.b32.xlu0 %v5395_v0, %s5363_s6  ;;  %640 = vrot.lane.b32.xlu1 %v5409_v2, %s5361_s4 }
  0x5a   :  { %642 = vrot.lane.b32.xlu0 %v5422_v3, %s5361_s4  ;;  %478 = vrot.lane.b32.xlu1 %v5444_v5, %s5363_s6 }
  0x5e   :  { %378 = vrot.lane.b32.xlu0 %v5400_v1, %s5364_s7  ;;  %380 = vrot.lane.b32.xlu1 %v5395_v0, %s5364_s7 }
  0x62   :  { %554 = vrot.lane.b32.xlu0 %v5409_v2, %s5362_s5  ;;  %556 = vrot.lane.b32.xlu1 %v5422_v3, %s5362_s5 }
  0x66   :  { %392 = vrot.lane.b32.xlu0 %v5444_v5, %s5364_s7  ;;  %292 = vrot.lane.b32.xlu1 %v5400_v1, %s5365_s8 }
  0x6a   :  { %294 = vrot.lane.b32.xlu0 %v5395_v0, %s5365_s8  ;;  %468 = vrot.lane.b32.xlu1 %v5409_v2, %s5363_s6 }
  0x6e   :  { %470 = vrot.lane.b32.xlu0 %v5422_v3, %s5363_s6  ;;  %306 = vrot.lane.b32.xlu1 %v5444_v5, %s5365_s8 }
  0x72   :  { %206 = vrot.lane.b32.xlu0 %v5400_v1, %s5366_s13  ;;  %208 = vrot.lane.b32.xlu1 %v5395_v0, %s5366_s13 }
  0x74   :  { %v1249_v16 = vpop.permute.xlu0 %1248  ;;  %v5562_v17 = vpop.permute.xlu1 %1246 }
  0x75   :  { %9842 = vst [vmem:[#allocation7_spill] sm:$0xff] %v5562_v17  ;;  %v1269_v23 = vsel %vm1262_vm0, %v5562_v17, %v1249_v16 }
  0x76   :  { %382 = vrot.lane.b32.xlu0 %v5409_v2, %s5364_s7  ;;  %384 = vrot.lane.b32.xlu1 %v5422_v3, %s5364_s7  ;;  %v1316_v30 = vmul.f32 %v1279_v20, %v1269_v23 }
  0x78   :  { %v1251_v21 = vpop.permute.xlu0 %1250  ;;  %v1163_v22 = vpop.permute.xlu1 %1162 }
  0x79   :  { %v1268_v26 = vsel %vm1262_vm0, %v1249_v16, %v1251_v21 }
  0x7a   :  { %220 = vrot.lane.b32.xlu0 %v5444_v5, %s5366_s13  ;;  %120 = vrot.lane.b32.xlu1 %v5400_v1, %s5367_s20  ;;  %v1317_v27 = vmul.f32 %v1283_v18, %v1268_v26  ;;  %v1017_v18 = vrot.slane %v5660_v61, %v5552_v12 }
  0x7c   :  { %2281 = vmatprep.subr.mxu0 %v1317_v27  ;;  %v1165_v33 = vpop.permute.xlu0 %1164  ;;  %v5601_v34 = vpop.permute.xlu1 %1160 }
  0x7d   :  { %9846 = vst [vmem:[#allocation11_spill] sm:$0xff] %v5601_v34  ;;  %v1182_v35 = vsel %vm1176_vm1, %v1163_v22, %v1165_v33  ;;  %v1183_v36 = vsel %vm1176_vm1, %v5601_v34, %v1163_v22  ;;  %2282 = vmatpush1.msra.mxu0 %v1316_v30  ;;  %v5688_v22 = vor.u32 %v5222_v9, %v5221_v8  ;;  %v5244_v34 = vld [vmem:[%s9606_s2 + $0x86] ss:$8 sm:$0xf0] }
  0x7e   :  { %122 = vrot.lane.b32.xlu0 %v5395_v0, %s5367_s20  ;;  %296 = vrot.lane.b32.xlu1 %v5409_v2, %s5365_s8  ;;  %v1231_v39 = vmul.f32 %v1197_v28, %v1182_v35  ;;  %v1230_v40 = vmul.f32 %v1193_v29, %v1183_v36  ;;  %v1025_v8 = vrot.slane %v5660_v61, %v5582_v25 }
  0x7f   :  { %9852 = vst [vmem:[#allocation17_spill] sm:$0xff] %v5688_v22  ;;  %v931_v31 = vrot.slane %v5688_v22, %v5552_v12 }
  0x80   :  { %v1253_v42 = vpop.permute.xlu0 %1252  ;;  %2283 = vmatprep.subr.mxu0 %v1231_v39  ;;  %v5618_v43 = vpop.permute.xlu1 %1254  ;;  %v5219_v39 = vld [vmem:[%s9606_s2 + $0x41] ss:$8 sm:$0xf] }
  0x81   :  { %9848 = vst [vmem:[#allocation13_spill] sm:$0xff] %v5618_v43  ;;  %2284 = vmatpush1.msra.mxu0 %v1230_v40  ;;  %v1266_v44 = vsel %vm1262_vm0, %v1253_v42, %v5618_v43  ;;  %v1267_v45 = vsel %vm1262_vm0, %v1251_v21, %v1253_v42  ;;  %v1013_v21 = vrot.slane %v5660_v61, %v5549_v11  ;;  %v5220_v40 = vld [vmem:[%s9606_s2 + $0x41] ss:$8 sm:$0xf0] }
  0x82   :  { %298 = vrot.lane.b32.xlu0 %v5422_v3, %s5365_s8  ;;  %134 = vrot.lane.b32.xlu1 %v5444_v5, %s5367_s20  ;;  %v1319_v46 = vmul.f32 %v1291_v37, %v1266_v44  ;;  %v1318_v47 = vmul.f32 %v1287_v38, %v1267_v45  ;;  %v1111_v37 = vrot.slane %v5616_v41, %v5582_v25 }
  0x83   :  { %2285 = vmatprep.subr.mxu0 %v5395_v0  ;;  %v1107_v38 = vrot.slane %v5616_v41, %v5579_v24 }
  0x84   :  { %v1067_v49 = vpop.permute.xlu0 %1066  ;;  %2352 = vmatprep.subr.mxu1 %v1319_v46  ;;  %v5633_v50 = vpop.permute.xlu1 %1068  ;;  %2286 = vmatpush1.msra.mxu0 %v5400_v1 }
  0x85   :  { %v1089_v51 = vsel %vm1082_vm2, %v1067_v49, %v5633_v50  ;;  %2353 = vmatpush1.msra.mxu1 %v1318_v47  ;;  %v927_v47 = vrot.slane %v5688_v22, %v5549_v11 }
  0x86   :  { %33 = vrot.lane.b32.xlu0 %v5400_v1, %s5368_s26  ;;  %35 = vrot.lane.b32.xlu1 %v5395_v0, %s5368_s26  ;;  %v1137_v52 = vmul.f32 %v1103_v48, %v1089_v51  ;;  %v5739_v51 = vor.u32 %v5220_v40, %v5219_v39  ;;  %v5215_v39 = vld [vmem:[%s9606_s2 + $0x7] ss:$8 sm:$0xf] }
  0x87   :  { %v5216_v40 = vld [vmem:[%s9606_s2 + $0x7] ss:$8 sm:$0xf0] }
  0x88   :  { %v1167_v57 = vpop.permute.xlu0 %1166  ;;  %2287 = vmatprep.subr.mxu0 %v1137_v52  ;;  %v5653_v58 = vpop.permute.xlu1 %1168  ;;  %9855 = vst [vmem:[#allocation20_spill] sm:$0xff] %v5739_v51  ;;  %v845_v55 = vrot.slane %v5739_v51, %v5552_v12 }
  0x89   :  { %9849 = vst [vmem:[#allocation14_spill] sm:$0xff] %v5653_v58  ;;  %v1181_v59 = vsel %vm1176_vm1, %v1165_v33, %v1167_v57  ;;  %v1180_v60 = vsel %vm1176_vm1, %v1167_v57, %v5653_v58  ;;  %v5218_v57 = vld [vmem:[%s9606_s2 + $0x40] ss:$8 sm:$0xf0] }
  0x8a   :  { %210 = vrot.lane.b32.xlu0 %v5409_v2, %s5366_s13  ;;  %212 = vrot.lane.b32.xlu1 %v5422_v3, %s5366_s13  ;;  %v1233_v62 = vmul.f32 %v1205_v53, %v1180_v60  ;;  %v1232_v63 = vmul.f32 %v1201_v54, %v1181_v59  ;;  %v5772_v9 = vor.u32 %v5218_v57, %v5217_v56  ;;  %v5858_v57 = vld [vmem:[%s9605_s0 + $0x28] sm:$0xff] }
  0x8c   :  { %v5674_v14 = vpop.permute.xlu0 %1080  ;;  %2354 = vmatprep.subr.mxu1 %v1233_v62  ;;  %v981_v15 = vpop.permute.xlu1 %980  ;;  %9857 = vst [vmem:[#allocation22_spill] sm:$0xff] %v5772_v9 }
  0x8d   :  { %9851 = vst [vmem:[#allocation16_spill] sm:$0xff] %v5674_v14  ;;  %v1090_v16 = vsel %vm1082_vm2, %v5674_v14, %v1067_v49  ;;  %2355 = vmatpush1.msra.mxu1 %v1232_v63  ;;  %v841_v63 = vrot.slane %v5739_v51, %v5549_v11  ;;  %v5247_v14 = vld [vmem:[%s9606_s2 + $0xc0] ss:$8 sm:$0xf] }
  0x8e   :  { %47 = vrot.lane.b32.xlu0 %v5444_v5, %s5368_s26  ;;  %124 = vrot.lane.b32.xlu1 %v5409_v2, %s5367_s20  ;;  %v1136_v20 = vmul.f32 %v1099_v6, %v1090_v16 }
  0x8f   :  { %2356 = vmatprep.subr.mxu1 %v5422_v3 }
  0x90   :  { %v983_v23 = vpop.permute.xlu0 %982  ;;  %2288 = vmatpush1.msra.mxu0 %v1136_v20  ;;  %v5691_v26 = vpop.permute.xlu1 %994  ;;  %2357 = vmatpush1.msra.mxu1 %v5409_v2 }
  0x91   :  { %9853 = vst [vmem:[#allocation18_spill] sm:$0xff] %v5691_v26  ;;  %v1003_v27 = vsel %vm996_vm3, %v981_v15, %v983_v23  ;;  %v1004_v28 = vsel %vm996_vm3, %v5691_v26, %v981_v15  ;;  %v1021_v15 = vrot.slane %v5660_v61, %v5579_v24  ;;  %v5243_v61 = vld [vmem:[%s9606_s2 + $0x86] ss:$8 sm:$0xf] }
  0x92   :  { %126 = vrot.lane.b32.xlu0 %v5422_v3, %s5367_s20  ;;  %37 = vrot.lane.b32.xlu1 %v5409_v2, %s5368_s26  ;;  %v1051_v29 = vmul.f32 %v1017_v18, %v1003_v27  ;;  %v1050_v30 = vmul.f32 %v1013_v21, %v1004_v28 }
  0x94   :  { %v895_v32 = vpop.permute.xlu0 %894  ;;  %2289 = vmatprep.subr.mxu0 %v1051_v29  ;;  %v5706_v33 = vpop.permute.xlu1 %896  ;;  %v759_v29 = vrot.slane %v5772_v9, %v5552_v12 }
  0x95   :  { %v917_v35 = vsel %vm910_vm4, %v895_v32, %v5706_v33  ;;  %2290 = vmatpush1.msra.mxu0 %v1050_v30 }
  0x96   :  { %39 = vrot.lane.b32.xlu0 %v5422_v3, %s5368_s26  ;;  %730 = vrot.lane.b32.xlu1 %v5427_v4, %s5360_s30  ;;  %v965_v36 = vmul.f32 %v931_v31, %v917_v35 }
  0x98   :  { %v1071_v42 = vpop.permute.xlu0 %1070  ;;  %2291 = vmatprep.subr.mxu0 %v965_v36  ;;  %v5725_v44 = vpop.permute.xlu1 %1072 }
  0x99   :  { %9854 = vst [vmem:[#allocation19_spill] sm:$0xff] %v5725_v44  ;;  %v1088_v45 = vsel %vm1082_vm2, %v5633_v50, %v1071_v42  ;;  %v1087_v46 = vsel %vm1082_vm2, %v1071_v42, %v5725_v44  ;;  %v5820_v42 = vld [vmem:[%s9607_s1 + $0x8] sm:$0xff] }
  0x9a   :  { %644 = vrot.lane.b32.xlu0 %v5427_v4, %s5361_s4  ;;  %558 = vrot.lane.b32.xlu1 %v5427_v4, %s5362_s5  ;;  %v1139_v48 = vmul.f32 %v1111_v37, %v1087_v46  ;;  %v1138_v49 = vmul.f32 %v1107_v38, %v1088_v45  ;;  %v939_v37 = vrot.slane %v5688_v22, %v5582_v25 }
  0x9b   :  { %v935_v38 = vrot.slane %v5688_v22, %v5579_v24  ;;  %9860 = vst [vmem:[#allocation25_spill] sm:$0xff] %v5820_v42  ;;  %5253 = vmatprep.mubr.msk.f32.mxu0 %vm2277_vm7, %v5820_v42  ;;  %5254 = vmatprep.mubr.msk.f32.mxu1 %vm2277_vm7, %v5820_v42 }
  0x9c   :  { %v5741_v52 = vpop.permute.xlu0 %908  ;;  %2358 = vmatprep.subr.mxu1 %v1139_v48  ;;  %v809_v50 = vpop.permute.xlu1 %808 }
  0x9d   :  { %9856 = vst [vmem:[#allocation21_spill] sm:$0xff] %v5741_v52  ;;  %v918_v53 = vsel %vm910_vm4, %v5741_v52, %v895_v32  ;;  %2359 = vmatpush1.msra.mxu1 %v1138_v49  ;;  %v755_v49 = vrot.slane %v5772_v9, %v5549_v11 }
  0x9e   :  { %472 = vrot.lane.b32.xlu0 %v5427_v4, %s5363_s6  ;;  %386 = vrot.lane.b32.xlu1 %v5427_v4, %s5364_s7  ;;  %v964_v54 = vmul.f32 %v927_v47, %v918_v53 }
  0xa0   :  { %v5759_v59 = vpop.permute.xlu0 %810  ;;  %2292 = vmatpush1.msra.mxu0 %v964_v54  ;;  %v985_v60 = vpop.permute.xlu1 %984 }
  0xa1   :  { %v831_v62 = vsel %vm824_vm5, %v809_v50, %v5759_v59  ;;  %v1002_v16 = vsel %vm996_vm3, %v983_v23, %v985_v60 }
  0xa2   :  { %300 = vrot.lane.b32.xlu0 %v5427_v4, %s5365_s8  ;;  %214 = vrot.lane.b32.xlu1 %v5427_v4, %s5366_s13  ;;  %v879_v6 = vmul.f32 %v845_v55, %v831_v62  ;;  %v1052_v30 = vmul.f32 %v1021_v15, %v1002_v16  ;;  %v5214_v62 = vld [vmem:[%s9606_s2 + $0x6] ss:$8 sm:$0xf0] }
  0xa4   :  { %v5778_v18 = vpop.permute.xlu0 %986  ;;  %2293 = vmatprep.subr.mxu0 %v879_v6  ;;  %v5780_v20 = vpop.permute.xlu1 %822 }
  0xa5   :  { %9858 = vst [vmem:[#allocation23_spill] sm:$0xff] %v5778_v18  ;;  %9859 = vst [vmem:[#allocation24_spill] sm:$0xff] %v5780_v20  ;;  %v1001_v21 = vsel %vm996_vm3, %v985_v60, %v5778_v18  ;;  %v832_v27 = vsel %vm824_vm5, %v5780_v20, %v809_v50  ;;  %v5863_v60 = vld [vmem:[%s9605_s0 + $0x30] sm:$0xff] }
  0xa6   :  { %128 = vrot.lane.b32.xlu0 %v5427_v4, %s5367_s20  ;;  %1420 = vrot.lane.b32.xlu1 %v5395_v0, %s5369_s14  ;;  %v878_v23 = vmul.f32 %v841_v63, %v832_v27  ;;  %v1053_v28 = vmul.f32 %v1025_v8, %v1001_v21  ;;  %v853_v21 = vrot.slane %v5739_v51, %v5582_v25 }
  0xa8   :  { %v723_v31 = vpop.permute.xlu0 %722  ;;  %2294 = vmatpush1.msra.mxu0 %v878_v23  ;;  %2360 = vmatprep.subr.mxu1 %v1053_v28  ;;  %v5795_v32 = vpop.permute.xlu1 %724  ;;  %v849_v23 = vrot.slane %v5739_v51, %v5579_v24 }
  0xa9   :  { %v5800_v35 = vsel %vm738_vm6, %v723_v31, %v5795_v32  ;;  %2361 = vmatpush1.msra.mxu1 %v1052_v30 }
  0xaa   :  { %1422 = vrot.lane.b32.xlu0 %v5409_v2, %s5369_s14  ;;  %1418 = vrot.lane.b32.xlu1 %v5400_v1, %s5369_s14  ;;  %v793_v36 = vmul.f32 %v759_v29, %v5800_v35 }
  0xac   :  { %v899_v45 = vpop.permute.xlu0 %898  ;;  %2295 = vmatprep.subr.mxu0 %v793_v36  ;;  %v5822_v46 = vpop.permute.xlu1 %900 }
  0xad   :  { %9861 = vst [vmem:[#allocation26_spill] sm:$0xff] %v5822_v46  ;;  %v916_v47 = vsel %vm910_vm4, %v5706_v33, %v899_v45  ;;  %v915_v48 = vsel %vm910_vm4, %v899_v45, %v5822_v46  ;;  %v5840_v33 = vor.u32 %v5216_v40, %v5215_v39 }
  0xae   :  { %41 = vrot.lane.b32.xlu0 %v5427_v4, %s5368_s26  ;;  %1334 = vrot.lane.b32.xlu1 %v5395_v0, %s5370_s25  ;;  %v967_v50 = vmul.f32 %v939_v37, %v915_v48  ;;  %v966_v53 = vmul.f32 %v935_v38, %v916_v47 }
  0xaf   :  { %9862 = vst [vmem:[#allocation27_spill] sm:$0xff] %v5840_v33  ;;  %v669_v15 = vrot.slane %v5840_v33, %v5549_v11 }
  0xb0   :  { %v5842_v54 = vpop.permute.xlu0 %736  ;;  %2362 = vmatprep.subr.mxu1 %v967_v50  ;;  %v637_v55 = vpop.permute.xlu1 %636  ;;  %v763_v50 = vrot.slane %v5772_v9, %v5579_v24 }
  0xb1   :  { %9863 = vst [vmem:[#allocation28_spill] sm:$0xff] %v5842_v54  ;;  %v5847_v56 = vsel %vm738_vm6, %v5842_v54, %v723_v31  ;;  %2363 = vmatpush1.msra.mxu1 %v966_v53  ;;  %v5211_v53 = vld [vmem:[%s9606_s2 + $0x5] ss:$8 sm:$0xf] }
  0xb2   :  { %9864 = vst [vmem:[#allocation29_spill] sm:$0xff] %v5847_v56  ;;  %1336 = vrot.lane.b32.xlu0 %v5409_v2, %s5370_s25  ;;  %1332 = vrot.lane.b32.xlu1 %v5400_v1, %s5370_s25  ;;  %v792_v0 = vmul.f32 %v755_v49, %v5847_v56  ;;  %v673_v2 = vrot.slane %v5840_v33, %v5552_v12  ;;  %v5213_v1 = vld [vmem:[%s9606_s2 + $0x6] ss:$8 sm:$0xf] }
  0xb3   :  { %v5889_v27 = vor.u32 %v5214_v62, %v5213_v1  ;;  %v767_v49 = vrot.slane %v5772_v9, %v5582_v25 }
  0xb4   :  { %v5873_v63 = vpop.permute.xlu0 %638  ;;  %2296 = vmatpush1.msra.mxu0 %v792_v0  ;;  %v813_v6 = vpop.permute.xlu1 %812 }
  0xb5   :  { %v5878_v8 = vsel %vm652_vm8, %v637_v55, %v5873_v63  ;;  %9865 = vst [vmem:[#allocation30_spill] sm:$0xff] %v5889_v27  ;;  %v830_v28 = vsel %vm824_vm5, %v5759_v59, %v813_v6  ;;  %v587_v38 = vrot.slane %v5889_v27, %v5552_v12 }
  0xb6   :  { %1256 = vrot.lane.b32.xlu0 %v5858_v57, %s5354_s16  ;;  %1258 = vrot.lane.b32.xlu1 %v5863_v60, %s5354_s16  ;;  %v707_v16 = vmul.f32 %v673_v2, %v5878_v8  ;;  %v880_v39 = vmul.f32 %v849_v23, %v830_v28 }
  0xb8   :  { %v5896_v29 = vpop.permute.xlu0 %814  ;;  %2297 = vmatprep.subr.mxu0 %v707_v16  ;;  %v5898_v30 = vpop.permute.xlu1 %650 }
  0xb9   :  { %9866 = vst [vmem:[#allocation31_spill] sm:$0xff] %v5896_v29  ;;  %9867 = vst [vmem:[#allocation32_spill] sm:$0xff] %v5898_v30  ;;  %v829_v31 = vsel %vm824_vm5, %v813_v6, %v5896_v29  ;;  %v5906_v36 = vsel %vm652_vm8, %v5898_v30, %v637_v55  ;;  %v5212_v55 = vld [vmem:[%s9606_s2 + $0x5] ss:$8 sm:$0xf0]  ;;  %v583_v6 = vrot.slane %v5889_v27, %v5549_v11 }
  0xba   :  { %9868 = vst [vmem:[#allocation33_spill] sm:$0xff] %v5906_v36  ;;  %1424 = vrot.lane.b32.xlu0 %v5422_v3, %s5369_s14  ;;  %1426 = vrot.lane.b32.xlu1 %v5427_v4, %s5369_s14  ;;  %v706_v59 = vmul.f32 %v669_v15, %v5906_v36  ;;  %v881_v37 = vmul.f32 %v853_v21, %v829_v31 }
  0xbc   :  { %v551_v40 = vpop.permute.xlu0 %550  ;;  %2298 = vmatpush1.msra.mxu0 %v706_v59  ;;  %2364 = vmatprep.subr.mxu1 %v881_v37  ;;  %v5916_v45 = vpop.permute.xlu1 %552  ;;  %v5209_v59 = vld [vmem:[%s9606_s2 + $0x4] ss:$8 sm:$0xf] }
  0xbd   :  { %v5921_v47 = vsel %vm9692_vm9, %v551_v40, %v5916_v45  ;;  %2365 = vmatpush1.msra.mxu1 %v880_v39  ;;  %v5210_v37 = vld [vmem:[%s9606_s2 + $0x4] ss:$8 sm:$0xf0] }
  0xbe   :  { %1170 = vrot.lane.b32.xlu0 %v5858_v57, %s5355_s19  ;;  %1172 = vrot.lane.b32.xlu1 %v5863_v60, %s5355_s19  ;;  %v621_v48 = vmul.f32 %v587_v38, %v5921_v47 }
  0xc0   :  { %v727_v0 = vpop.permute.xlu0 %726  ;;  %2299 = vmatprep.subr.mxu0 %v621_v48  ;;  %v5938_v2 = vpop.permute.xlu1 %728 }
  0xc1   :  { %v5943_v1 = vsel %vm738_vm6, %v5795_v32, %v727_v0  ;;  %v5948_v62 = vsel %vm738_vm6, %v727_v0, %v5938_v2  ;;  %v5958_v32 = vor.u32 %v5212_v55, %v5211_v53  ;;  %v5997_v53 = vor.u32 %v5210_v37, %v5209_v59 }
  0xc2   :  { %1338 = vrot.lane.b32.xlu0 %v5422_v3, %s5370_s25  ;;  %1340 = vrot.lane.b32.xlu1 %v5427_v4, %s5370_s25  ;;  %v795_v15 = vmul.f32 %v767_v49, %v5948_v62  ;;  %v794_v16 = vmul.f32 %v763_v50, %v5943_v1  ;;  %v681_v50 = vrot.slane %v5840_v33, %v5582_v25 }
  0xc3   :  { %9869 = vst [vmem:[#allocation34_spill] sm:$0xff] %v5958_v32  ;;  %v501_v31 = vrot.slane %v5958_v32, %v5552_v12  ;;  %v497_v48 = vrot.slane %v5958_v32, %v5549_v11  ;;  %9872 = vst [vmem:[#allocation37_spill] sm:$0xff] %v5997_v53  ;;  %v677_v55 = vrot.slane %v5840_v33, %v5579_v24 }
  0xc4   :  { %v5960_v21 = vpop.permute.xlu0 %564  ;;  %2366 = vmatprep.subr.mxu1 %v795_v15  ;;  %v465_v23 = vpop.permute.xlu1 %464 }
  0xc5   :  { %9870 = vst [vmem:[#allocation35_spill] sm:$0xff] %v5960_v21  ;;  %v5965_v28 = vsel %vm9692_vm9, %v5960_v21, %v551_v40  ;;  %2367 = vmatpush1.msra.mxu1 %v794_v16 }
  0xc6   :  { %9871 = vst [vmem:[#allocation36_spill] sm:$0xff] %v5965_v28  ;;  %1260 = vrot.lane.b32.xlu0 %v5444_v5, %s5354_s16  ;;  %1074 = vrot.lane.b32.xlu1 %v5427_v4, %s5356_s24  ;;  %v620_v3 = vmul.f32 %v583_v6, %v5965_v28  ;;  %v411_v28 = vrot.slane %v5997_v53, %v5549_v11 }
  0xc8   :  { %v5981_v38 = vpop.permute.xlu0 %466  ;;  %2300 = vmatpush1.msra.mxu0 %v620_v3  ;;  %v641_v39 = vpop.permute.xlu1 %640 }
  0xc9   :  { %v5986_v40 = vsel %vm9698_vm10, %v465_v23, %v5981_v38  ;;  %v6004_v0 = vsel %vm652_vm8, %v5873_v63, %v641_v39 }
  0xca   :  { %1076 = vrot.lane.b32.xlu0 %v5858_v57, %s5356_s24  ;;  %1174 = vrot.lane.b32.xlu1 %v5444_v5, %s5355_s19  ;;  %v535_v49 = vmul.f32 %v501_v31, %v5986_v40  ;;  %v415_v31 = vrot.slane %v5997_v53, %v5552_v12  ;;  %v708_v59 = vmul.f32 %v677_v55, %v6004_v0  ;;  %v5207_v55 = vld [vmem:[%s9606_s2 + $0x3] ss:$8 sm:$0xf] }
  0xcc   :  { %v6006_v6 = vpop.permute.xlu0 %642  ;;  %2301 = vmatprep.subr.mxu0 %v535_v49  ;;  %v6008_v15 = vpop.permute.xlu1 %478  ;;  %v595_v49 = vrot.slane %v5889_v27, %v5582_v25 }
  0xcd   :  { %9873 = vst [vmem:[#allocation38_spill] sm:$0xff] %v6008_v15  ;;  %v6013_v5 = vsel %vm652_vm8, %v641_v39, %v6006_v6  ;;  %v6018_v16 = vsel %vm9698_vm10, %v6008_v15, %v465_v23 }
  0xce   :  { %9874 = vst [vmem:[#allocation39_spill] sm:$0xff] %v6018_v16  ;;  %988 = vrot.lane.b32.xlu0 %v5427_v4, %s5357_s27  ;;  %990 = vrot.lane.b32.xlu1 %v5858_v57, %s5357_s27  ;;  %v534_v63 = vmul.f32 %v497_v48, %v6018_v16  ;;  %v709_v3 = vmul.f32 %v681_v50, %v6013_v5 }
  0xcf   :  { %v591_v50 = vrot.slane %v5889_v27, %v5579_v24 }
  0xd0   :  { %v379_v37 = vpop.permute.xlu0 %378  ;;  %2302 = vmatpush1.msra.mxu0 %v534_v63  ;;  %2368 = vmatprep.subr.mxu1 %v709_v3  ;;  %v6030_v23 = vpop.permute.xlu1 %380  ;;  %v5208_v63 = vld [vmem:[%s9606_s2 + $0x3] ss:$8 sm:$0xf0] }
  0xd1   :  { %v6035_v39 = vsel %vm9697_vm11, %v379_v37, %v6030_v23  ;;  %2369 = vmatpush1.msra.mxu1 %v708_v59 }
  0xd2   :  { %902 = vrot.lane.b32.xlu0 %v5427_v4, %s5358_s28  ;;  %904 = vrot.lane.b32.xlu1 %v5858_v57, %s5358_s28  ;;  %v449_v48 = vmul.f32 %v415_v31, %v6035_v39 }
  0xd4   :  { %v555_v3 = vpop.permute.xlu0 %554  ;;  %2303 = vmatprep.subr.mxu0 %v449_v48  ;;  %v6052_v59 = vpop.permute.xlu1 %556 }
  0xd5   :  { %v6057_v31 = vsel %vm9692_vm9, %v5916_v45, %v555_v3  ;;  %v6062_v16 = vsel %vm9692_vm9, %v555_v3, %v6052_v59  ;;  %v6072_v45 = vor.u32 %v5208_v63, %v5207_v55 }
  0xd6   :  { %1078 = vrot.lane.b32.xlu0 %v5863_v60, %s5356_s24  ;;  %816 = vrot.lane.b32.xlu1 %v5427_v4, %s5359_s29  ;;  %v623_v48 = vmul.f32 %v595_v49, %v6062_v16  ;;  %v622_v36 = vmul.f32 %v591_v50, %v6057_v31  ;;  %v5205_v50 = vld [vmem:[%s9606_s2 + $0x2] ss:$8 sm:$0xf] }
  0xd7   :  { %9875 = vst [vmem:[#allocation40_spill] sm:$0xff] %v6072_v45  ;;  %v329_v49 = vrot.slane %v6072_v45, %v5552_v12  ;;  %v333_v9 = vrot.slane %v6072_v45, %v5579_v24 }
  0xd8   :  { %v6074_v56 = vpop.permute.xlu0 %392  ;;  %2370 = vmatprep.subr.mxu1 %v623_v48  ;;  %v293_v3 = vpop.permute.xlu1 %292 }
  0xd9   :  { %9876 = vst [vmem:[#allocation41_spill] sm:$0xff] %v6074_v56  ;;  %v6079_v15 = vsel %vm9697_vm11, %v6074_v56, %v379_v37  ;;  %2371 = vmatpush1.msra.mxu1 %v622_v36  ;;  %v5206_v36 = vld [vmem:[%s9606_s2 + $0x2] ss:$8 sm:$0xf0]  ;;  %v505_v56 = vrot.slane %v5958_v32, %v5579_v24 }
  0xda   :  { %9877 = vst [vmem:[#allocation42_spill] sm:$0xff] %v6079_v15  ;;  %818 = vrot.lane.b32.xlu0 %v5858_v57, %s5359_s29  ;;  %992 = vrot.lane.b32.xlu1 %v5863_v60, %s5357_s27  ;;  %v448_v4 = vmul.f32 %v411_v28, %v6079_v15  ;;  %v325_v28 = vrot.slane %v6072_v45, %v5549_v11 }
  0xdb   :  { %v6111_v15 = vor.u32 %v5206_v36, %v5205_v50 }
  0xdc   :  { %v6095_v37 = vpop.permute.xlu0 %294  ;;  %2304 = vmatpush1.msra.mxu0 %v448_v4  ;;  %v469_v55 = vpop.permute.xlu1 %468  ;;  %v509_v4 = vrot.slane %v5958_v32, %v5582_v25 }
  0xdd   :  { %v6100_v63 = vsel %vm9678_vm12, %v293_v3, %v6095_v37  ;;  %9878 = vst [vmem:[#allocation43_spill] sm:$0xff] %v6111_v15  ;;  %v6118_v21 = vsel %vm9698_vm10, %v5981_v38, %v469_v55  ;;  %v239_v27 = vrot.slane %v6111_v15, %v5549_v11  ;;  %v251_v18 = vrot.slane %v6111_v15, %v5582_v25 }
  0xde   :  { %732 = vrot.lane.b32.xlu0 %v5858_v57, %s5360_s30  ;;  %906 = vrot.lane.b32.xlu1 %v5863_v60, %s5358_s28  ;;  %v363_v48 = vmul.f32 %v329_v49, %v6100_v63 }
  0xe0   :  { %v6120_v30 = vpop.permute.xlu0 %470  ;;  %2305 = vmatprep.subr.mxu0 %v363_v48  ;;  %v6122_v54 = vpop.permute.xlu1 %306  ;;  %v536_v48 = vmul.f32 %v505_v56, %v6118_v21  ;;  %v423_v56 = vrot.slane %v5997_v53, %v5582_v25 }
  0xe1   :  { %9879 = vst [vmem:[#allocation44_spill] sm:$0xff] %v6122_v54  ;;  %v6127_v49 = vsel %vm9698_vm10, %v469_v55, %v6120_v30  ;;  %v6132_v50 = vsel %vm9678_vm12, %v6122_v54, %v293_v3  ;;  %v243_v55 = vrot.slane %v6111_v15, %v5552_v12 }
  0xe2   :  { %9880 = vst [vmem:[#allocation45_spill] sm:$0xff] %v6132_v50  ;;  %646 = vrot.lane.b32.xlu0 %v5858_v57, %s5361_s4  ;;  %820 = vrot.lane.b32.xlu1 %v5863_v60, %s5359_s29  ;;  %v362_v38 = vmul.f32 %v325_v28, %v6132_v50  ;;  %v537_v36 = vmul.f32 %v509_v4, %v6127_v49 }
  0xe3   :  { %v419_v4 = vrot.slane %v5997_v53, %v5579_v24 }
  0xe4   :  { %v207_v32 = vpop.permute.xlu0 %206  ;;  %2306 = vmatpush1.msra.mxu0 %v362_v38  ;;  %2372 = vmatprep.subr.mxu1 %v537_v36  ;;  %v6144_v3 = vpop.permute.xlu1 %208  ;;  %v5203_v38 = vld [vmem:[%s9606_s2 + $0x1] ss:$8 sm:$0xf] }
  0xe5   :  { %v6149_v54 = vsel %vm222_vm13, %v207_v32, %v6144_v3  ;;  %2373 = vmatpush1.msra.mxu1 %v536_v48  ;;  %v5204_v36 = vld [vmem:[%s9606_s2 + $0x1] ss:$8 sm:$0xf0] }
  0xe6   :  { %560 = vrot.lane.b32.xlu0 %v5858_v57, %s5362_s5  ;;  %734 = vrot.lane.b32.xlu1 %v5863_v60, %s5360_s30  ;;  %v277_v28 = vmul.f32 %v243_v55, %v6149_v54 }
  0xe8   :  { %v383_v48 = vpop.permute.xlu0 %382  ;;  %2307 = vmatprep.subr.mxu0 %v277_v28  ;;  %v6166_v50 = vpop.permute.xlu1 %384 }
  0xe9   :  { %v6171_v55 = vsel %vm9697_vm11, %v6030_v23, %v383_v48  ;;  %v6176_v53 = vsel %vm9697_vm11, %v383_v48, %v6166_v50  ;;  %v6186_v23 = vor.u32 %v5204_v36, %v5203_v38  ;;  %v60_v38 = vld [vmem:[%s9606_s2] ss:$8 sm:$0xf] }
  0xea   :  { %9881 = vst [vmem:[#allocation46_spill] sm:$0xff] %v6176_v53  ;;  %474 = vrot.lane.b32.xlu0 %v5858_v57, %s5363_s6  ;;  %648 = vrot.lane.b32.xlu1 %v5863_v60, %s5361_s4  ;;  %v451_v28 = vmul.f32 %v423_v56, %v6176_v53  ;;  %v450_v20 = vmul.f32 %v419_v4, %v6171_v55 }
  0xeb   :  { %9882 = vst [vmem:[#allocation47_spill] sm:$0xff] %v6186_v23  ;;  %v157_v4 = vrot.slane %v6186_v23, %v5552_v12 }
  0xec   :  { %v6188_v52 = vpop.permute.xlu0 %220  ;;  %2374 = vmatprep.subr.mxu1 %v451_v28  ;;  %v121_v48 = vpop.permute.xlu1 %120 }
  0xed   :  { %9883 = vst [vmem:[#allocation48_spill] sm:$0xff] %v6188_v52  ;;  %v6193_v33 = vsel %vm222_vm13, %v6188_v52, %v207_v32  ;;  %2375 = vmatpush1.msra.mxu1 %v450_v20  ;;  %v61_v20 = vld [vmem:[%s9606_s2] ss:$8 sm:$0xf0] }
  0xee   :  { %9884 = vst [vmem:[#allocation49_spill] sm:$0xff] %v6193_v33  ;;  %388 = vrot.lane.b32.xlu0 %v5858_v57, %s5364_s7  ;;  %562 = vrot.lane.b32.xlu1 %v5863_v60, %s5362_s5  ;;  %v276_v56 = vmul.f32 %v239_v27, %v6193_v33  ;;  %v153_v27 = vrot.slane %v6186_v23, %v5549_v11 }
  0xef   :  { %v6225_v52 = vor.u32 %v61_v20, %v60_v38 }
  0xf0   :  { %v6209_v32 = vpop.permute.xlu0 %122  ;;  %2308 = vmatpush1.msra.mxu0 %v276_v56  ;;  %v297_v36 = vpop.permute.xlu1 %296  ;;  %v337_v56 = vrot.slane %v6072_v45, %v5582_v25 }
  0xf1   :  { %v6214_v28 = vsel %vm9679_vm14, %v121_v48, %v6209_v32  ;;  %v6232_v26 = vsel %vm9678_vm12, %v6095_v37, %v297_v36  ;;  %v71_v20 = vrot.slane %v6225_v52, %v5552_v12 }
  0xf2   :  { %302 = vrot.lane.b32.xlu0 %v5858_v57, %s5365_s8  ;;  %476 = vrot.lane.b32.xlu1 %v5863_v60, %s5363_s6  ;;  %v191_v33 = vmul.f32 %v157_v4, %v6214_v28 }
  0xf4   :  { %v6234_v29 = vpop.permute.xlu0 %298  ;;  %2309 = vmatprep.subr.mxu0 %v191_v33  ;;  %v6236_v51 = vpop.permute.xlu1 %134 }
  0xf5   :  { %9885 = vst [vmem:[#allocation50_spill] sm:$0xff] %v6236_v51  ;;  %v6241_v4 = vsel %vm9678_vm12, %v297_v36, %v6234_v29  ;;  %v6246_v38 = vsel %vm9679_vm14, %v6236_v51, %v121_v48  ;;  %v5251_v48 = vld [vmem:[%s9606_s2 + $0xc2] ss:$8 sm:$0xf]  ;;  %v364_v51 = vmul.f32 %v333_v9, %v6232_v26 }
  0xf6   :  { %9886 = vst [vmem:[#allocation51_spill] sm:$0xff] %v6241_v4  ;;  %9887 = vst [vmem:[#allocation52_spill] sm:$0xff] %v6246_v38  ;;  %216 = vrot.lane.b32.xlu0 %v5858_v57, %s5366_s13  ;;  %390 = vrot.lane.b32.xlu1 %v5863_v60, %s5364_s7  ;;  %v190_v33 = vmul.f32 %v153_v27, %v6246_v38  ;;  %v365_v37 = vmul.f32 %v337_v56, %v6241_v4  ;;  %v5252_v36 = vld [vmem:[%s9606_s2 + $0xc2] ss:$8 sm:$0xf0] }
  0xf7   :  { %v5249_v27 = vld [vmem:[%s9606_s2 + $0xc1] ss:$8 sm:$0xf]  ;;  %v5248_v9 = vld [vmem:[%s9606_s2 + $0xc0] ss:$8 sm:$0xf0]  ;;  %v6304_v44 = vor.u32 %v5252_v36, %v5251_v48  ;;  %v6330_v36 = vor.u32 %v5244_v34, %v5243_v61  ;;  %v67_v34 = vrot.slane %v6225_v52, %v5549_v11 }
  0xf8   :  { %v5250_v56 = vld [vmem:[%s9606_s2 + $0xc1] ss:$8 sm:$0xf0]  ;;  %v34_v38 = vpop.permute.xlu0 %33  ;;  %2310 = vmatpush1.msra.mxu0 %v190_v33  ;;  %2376 = vmatprep.subr.mxu1 %v365_v37  ;;  %v6270_v45 = vpop.permute.xlu1 %35  ;;  %v5245_v33 = vld [vmem:[%s9606_s2 + $0x87] ss:$8 sm:$0xf]  ;;  %v6308_v17 = vor.u32 %v5248_v9, %v5247_v14 }
  0xf9   :  { %v6281_v46 = vsel %vm51_vm15, %v34_v38, %v6270_v45  ;;  %2377 = vmatpush1.msra.mxu1 %v364_v51  ;;  %v5246_v37 = vld [vmem:[%s9606_s2 + $0x87] ss:$8 sm:$0xf0]  ;;  %v247_v51 = vrot.slane %v6111_v15, %v5579_v24  ;;  %v6306_v41 = vor.u32 %v5250_v56, %v5249_v27  ;;  %v5241_v15 = vld [vmem:[%s9606_s2 + $0x85] ss:$8 sm:$0xf]  ;;  %v2000_v61 = vrot.slane %v6304_v44, %v5549_v11 }
  0xfa   :  { %9888 = vst [vmem:[#allocation53_spill] sm:$0xff] %v6281_v46  ;;  %130 = vrot.lane.b32.xlu0 %v5858_v57, %s5367_s20  ;;  %304 = vrot.lane.b32.xlu1 %v5863_v60, %s5365_s8  ;;  %v105_v22 = vmul.f32 %v71_v20, %v6281_v46  ;;  %v5239_v27 = vld [vmem:[%s9606_s2 + $0x84] ss:$8 sm:$0xf]  ;;  %v1882_v43 = vrot.slane %v6308_v17, %v5552_v12 }
  0xfb   :  { %v5240_v56 = vld [vmem:[%s9606_s2 + $0x84] ss:$8 sm:$0xf0]  ;;  %v5235_v4 = vld [vmem:[%s9606_s2 + $0x82] ss:$8 sm:$0xf] }
  0xfc   :  { %v211_v20 = vpop.permute.xlu0 %210  ;;  %2311 = vmatprep.subr.mxu0 %v105_v22  ;;  %v6310_v58 = vpop.permute.xlu1 %212  ;;  %v6328_v22 = vor.u32 %v5246_v37, %v5245_v33  ;;  %v1939_v33 = vrot.slane %v6306_v41, %v5549_v11  ;;  %v6360_v13 = vor.u32 %v5240_v56, %v5239_v27  ;;  %v165_v27 = vrot.slane %v6186_v23, %v5582_v25 }
  0xfd   :  { %9889 = vst [vmem:[#allocation54_spill] sm:$0xff] %v6310_v58  ;;  %v6321_v48 = vsel %vm222_vm13, %v6144_v3, %v211_v20  ;;  %v6326_v14 = vsel %vm222_vm13, %v211_v20, %v6310_v58  ;;  %v75_v58 = vrot.slane %v6225_v52, %v5579_v24 }
  0xfe   :  { %9890 = vst [vmem:[#allocation55_spill] sm:$0xff] %v6326_v14  ;;  %43 = vrot.lane.b32.xlu0 %v5858_v57, %s5368_s26  ;;  %218 = vrot.lane.b32.xlu1 %v5863_v60, %s5366_s13  ;;  %v279_v3 = vmul.f32 %v251_v18, %v6326_v14  ;;  %v278_v9 = vmul.f32 %v247_v51, %v6321_v48 }
  0xff   :  { %v2004_v18 = vrot.slane %v6304_v44, %v5552_v12  ;;  %v6356_v51 = vor.u32 %v5242_v19, %v5241_v15  ;;  %v5237_v15 = vld [vmem:[%s9606_s2 + $0x83] ss:$8 sm:$0xf]  ;;  %v161_v19 = vrot.slane %v6186_v23, %v5579_v24  ;;  %v1821_v37 = vrot.slane %v6328_v22, %v5552_v12 }
 0x100   :  { %v6352_v20 = vpop.permute.xlu0 %47  ;;  %2378 = vmatprep.subr.mxu1 %v279_v3  ;;  %v125_v42 = vpop.permute.xlu1 %124  ;;  %v1943_v3 = vrot.slane %v6306_v41, %v5552_v12  ;;  %v9674_v23 = vmov 1.0   ;;  %v1760_v14 = vrot.slane %v6330_v36, %v5552_v12 }
 0x101   :  { %9891 = vst [vmem:[#allocation56_spill] sm:$0xff] %v6352_v20  ;;  %v6365_v7 = vsel %vm51_vm15, %v6352_v20, %v34_v38  ;;  %2379 = vmatpush1.msra.mxu1 %v278_v9  ;;  %v5238_v9 = vld [vmem:[%s9606_s2 + $0x83] ss:$8 sm:$0xf0]  ;;  %v6399_v56 = vsel %vm9679_vm14, %v6209_v32, %v125_v42 }
 0x102   :  { %9892 = vst [vmem:[#allocation57_spill] sm:$0xff] %v6365_v7  ;;  %132 = vrot.lane.b32.xlu0 %v5863_v60, %s5367_s20  ;;  %45 = vrot.lane.b32.xlu1 %v5863_v60, %s5368_s26  ;;  %v104_v38 = vmul.f32 %v67_v34, %v6365_v7  ;;  %v5236_v34 = vld [vmem:[%s9606_s2 + $0x82] ss:$8 sm:$0xf0]  ;;  %v6423_v53 = vor.u32 %v5238_v9, %v5237_v15 }
 0x103   :  { %v2037_v15 = vmul.f32 %v2000_v61, %v5800_v35  ;;  %v192_v9 = vmul.f32 %v161_v19, %v6399_v56  ;;  %v6440_v46 = vor.u32 %v5236_v34, %v5235_v4  ;;  %v1977_v35 = vmul.f32 %v1943_v3, %v6004_v0 }
 0x104   :  { %v6401_v7 = vpop.permute.xlu0 %126  ;;  %2312 = vmatpush1.msra.mxu0 %v104_v38  ;;  %v38_v20 = vpop.permute.xlu1 %37  ;;  %v1699_v61 = vrot.slane %v6356_v51, %v5552_v12  ;;  %v1573_v19 = vrot.slane %v6423_v53, %v5549_v11  ;;  %v1916_v0 = vmul.f32 %v1882_v43, %v6057_v31  ;;  %v1703_v34 = vrot.slane %v6356_v51, %v5579_v24 }
 0x105   :  { %9893 = vst [vmem:[#allocation58_spill] sm:$0xff] %v6401_v7  ;;  %v6418_v38 = vsel %vm9679_vm14, %v125_v42, %v6401_v7  ;;  %2321 = vmatprep.subr.mxu0 %v9674_v23  ;;  %v2038_v42 = vmul.f32 %v2004_v18, %v5943_v1  ;;  %v79_v23 = vrot.slane %v6225_v52, %v5582_v25  ;;  %v9894_v7 = vmov 1.0  }
 0x106   :  { %1428 = vrot.lane.b32.xlu0 %v5858_v57, %s5369_s14  ;;  %1430 = vrot.lane.b32.xlu1 %v5863_v60, %s5369_s14  ;;  %v193_v32 = vmul.f32 %v165_v27, %v6418_v38  ;;  %v6445_v1 = vsel %vm51_vm15, %v6270_v45, %v38_v20  ;;  %v1976_v45 = vmul.f32 %v1939_v33, %v5878_v8 }
 0x107   :  { %2322 = vmatpush2.msra.mxu0 %v9894_v7  ;;  %v9895_v8 = vrot.slane %v6308_v17, %v5549_v11 }
 0x108   :  { %2323 = vmatprep.subr.mxu0 %v2038_v42  ;;  %v6447_v18 = vpop.permute.xlu0 %39  ;;  %2380 = vmatprep.subr.mxu1 %v193_v32  ;;  %v6449_v27 = vpop.permute.xlu1 %730  ;;  %v1512_v32 = vrot.slane %v6440_v46, %v5549_v11  ;;  %v1638_v42 = vrot.slane %v6360_v13, %v5552_v12 }
 0x109   :  { %v6457_v4 = vsel %vm51_vm15, %v38_v20, %v6447_v18  ;;  %2324 = vmatpush2.msra.mxu0 %v2037_v15  ;;  %2381 = vmatpush1.msra.mxu1 %v192_v9  ;;  %v1915_v33 = vmul.f32 %v9895_v8, %v5921_v47  ;;  %v106_v20 = vmul.f32 %v75_v58, %v6445_v1 }
 0x10a   :  { %2325 = vmatprep.subr.mxu0 %v1977_v35  ;;  %1342 = vrot.lane.b32.xlu0 %v5858_v57, %s5370_s25  ;;  %v107_v3 = vmul.f32 %v79_v23, %v6457_v4  ;;  %v1855_v23 = vmul.f32 %v1821_v37, %v6118_v21  ;;  %v6490_v58 = vsel %vm738_vm6, %v5938_v2, %v6449_v27  ;;  %v6501_v37 = vld [vmem:[%s9605_s0 + $0x38] sm:$0xff] }
 0x10b   :  { %1344 = vrot.lane.b32.xlu1 %v5863_v60, %s5370_s25  ;;  %2326 = vmatpush2.msra.mxu0 %v1976_v45  ;;  %v2012_v60 = vrot.slane %v6304_v44, %v5582_v25  ;;  %v9896_v47 = vrot.slane %v6328_v22, %v5549_v11  ;;  %v1577_v21 = vrot.slane %v6423_v53, %v5552_v12 }
 0x10c   :  { %2327 = vmatprep.subr.mxu0 %v1916_v0  ;;  %v6477_v43 = vpop.permute.xlu0 %644  ;;  %2382 = vmatprep.subr.mxu1 %v107_v3  ;;  %v6479_v31 = vpop.permute.xlu1 %558  ;;  %v1794_v2 = vmul.f32 %v1760_v14, %v6171_v55  ;;  %v1951_v9 = vrot.slane %v6306_v41, %v5582_v25  ;;  %v9897_v55 = vrot.slane %v6330_v36, %v5549_v11 }
 0x10d   :  { %2328 = vmatpush2.msra.mxu0 %v1915_v33  ;;  %2383 = vmatpush1.msra.mxu1 %v106_v20  ;;  %v1854_v15 = vmul.f32 %v9896_v47, %v5986_v40  ;;  %v1516_v40 = vrot.slane %v6440_v46, %v5552_v12  ;;  %v6514_v35 = vsel %vm652_vm8, %v6006_v6, %v6477_v43 }
 0x10e   :  { %2329 = vmatprep.subr.mxu0 %v1855_v23  ;;  %1432 = vrot.lane.b32.xlu0 %v6501_v37, %s5369_s14  ;;  %v1793_v14 = vmul.f32 %v9897_v55, %v6035_v39  ;;  %v1890_v45 = vrot.slane %v6308_v17, %v5582_v25  ;;  %v2040_v6 = vmul.f32 %v2012_v60, %v6490_v58 }
 0x10f   :  { %1346 = vrot.lane.b32.xlu1 %v6501_v37, %s5370_s25  ;;  %2330 = vmatpush2.msra.mxu0 %v1854_v15  ;;  %v1733_v8 = vmul.f32 %v1699_v61, %v6232_v26  ;;  %v1829_v33 = vrot.slane %v6328_v22, %v5582_v25  ;;  %v6537_v39 = vsel %vm9692_vm9, %v6052_v59, %v6479_v31 }
 0x110   :  { %2392 = vmatprep.subr.mxu1 %v9894_v7  ;;  %2331 = vmatprep.subr.mxu0 %v1794_v2  ;;  %v6525_v0 = vpop.permute.xlu0 %472  ;;  %v6528_v3 = vpop.permute.xlu1 %386  ;;  %v9898_v20 = vrot.slane %v6304_v44, %v5579_v24  ;;  %v9899_v26 = vrot.slane %v6356_v51, %v5549_v11  ;;  %v1979_v60 = vmul.f32 %v1951_v9, %v6514_v35  ;;  %v5233_v2 = vld [vmem:[%s9606_s2 + $0x81] ss:$8 sm:$0xf] }
 0x111   :  { %2393 = vmatpush2.msra.mxu1 %v9894_v7  ;;  %2332 = vmatpush2.msra.mxu0 %v1793_v14  ;;  %v1672_v59 = vmul.f32 %v1638_v42, %v6321_v48  ;;  %v1768_v47 = vrot.slane %v6330_v36, %v5582_v25  ;;  %v6556_v15 = vsel %vm9698_vm10, %v6120_v30, %v6525_v0  ;;  %v5234_v30 = vld [vmem:[%s9606_s2 + $0x81] ss:$8 sm:$0xf0] }
 0x112   :  { %v2039_v23 = vmul.f32 %v9898_v20, %v5948_v62  ;;  %v1732_v61 = vmul.f32 %v9899_v26, %v6100_v63  ;;  %2394 = vmatprep.subr.mxu1 %v2040_v6  ;;  %2333 = vmatprep.subr.mxu0 %v1733_v8  ;;  %v9900_v62 = vrot.slane %v6306_v41, %v5579_v24 }
 0x113   :  { %v9901_v48 = vrot.slane %v6360_v13, %v5549_v11  ;;  %v1918_v55 = vmul.f32 %v1890_v45, %v6537_v39  ;;  %v1611_v14 = vmul.f32 %v1577_v21, %v6399_v56  ;;  %v6584_v6 = vsel %vm9697_vm11, %v6166_v50, %v6528_v3 }
 0x114   :  { %2395 = vmatpush2.msra.mxu1 %v2039_v23  ;;  %2334 = vmatpush2.msra.mxu0 %v1732_v61  ;;  %v1978_v63 = vmul.f32 %v9900_v62, %v6013_v5  ;;  %v6572_v9 = vpop.permute.xlu0 %300  ;;  %v6575_v5 = vpop.permute.xlu1 %214  ;;  %v9902_v8 = vrot.slane %v6308_v17, %v5579_v24  ;;  %v1610_v56 = vmul.f32 %v1573_v19, %v6214_v28  ;;  %v9904_v19 = vld [vmem:[#allocation53_spill] sm:$0xff] }
 0x115   :  { %v1671_v42 = vmul.f32 %v9901_v48, %v6149_v54  ;;  %2396 = vmatprep.subr.mxu1 %v1979_v60  ;;  %2335 = vmatprep.subr.mxu0 %v1672_v59  ;;  %v1707_v54 = vrot.slane %v6356_v51, %v5582_v25  ;;  %v1857_v21 = vmul.f32 %v1829_v33, %v6556_v15 }
 0x116   :  { %2397 = vmatpush2.msra.mxu1 %v1978_v63  ;;  %v1917_v45 = vmul.f32 %v9902_v8, %v6062_v16  ;;  %v1550_v20 = vmul.f32 %v1516_v40, %v6445_v1  ;;  %v6596_v50 = vor.u32 %v5234_v30, %v5233_v2  ;;  %v6602_v23 = vsel %vm9678_vm12, %v6234_v29, %v6572_v9  ;;  %v9908_v2 = vld [vmem:[#allocation58_spill] sm:$0xff] }
 0x117   :  { %2336 = vmatpush2.msra.mxu0 %v1671_v42  ;;  %2398 = vmatprep.subr.mxu1 %v1918_v55  ;;  %v9903_v16 = vrot.slane %v6328_v22, %v5579_v24  ;;  %v1549_v1 = vmul.f32 %v1512_v32, %v9904_v19  ;;  %v1796_v33 = vmul.f32 %v1768_v47, %v6584_v6  ;;  %v9906_v32 = vld [vmem:[#allocation46_spill] sm:$0xff]  ;;  %vm1434_vm12 = vcmp.lt.s32.totalorder %v5542_v10, 119  ;;  %v9909_v55 = vld [vmem:[#allocation51_spill] sm:$0xff] }
 0x118   :  { %2337 = vmatprep.subr.mxu0 %v1611_v14  ;;  %2399 = vmatpush2.msra.mxu1 %v1917_v45  ;;  %v6612_v40 = vpop.permute.xlu0 %128  ;;  %v1421_v29 = vpop.permute.xlu1 %1420  ;;  %v1646_v26 = vrot.slane %v6360_v13, %v5582_v25  ;;  %v1642_v61 = vrot.slane %v6360_v13, %v5579_v24  ;;  %v9907_v59 = vrot.slane %v6330_v36, %v5579_v24  ;;  %v5231_v8 = vld [vmem:[%s9606_s2 + $0x80] ss:$8 sm:$0xf] }
 0x119   :  { %2338 = vmatpush2.msra.mxu0 %v1610_v56  ;;  %v1856_v28 = vmul.f32 %v9903_v16, %v6127_v49  ;;  %2400 = vmatprep.subr.mxu1 %v1857_v21  ;;  %v9905_v49 = vld [vmem:[#allocation54_spill] sm:$0xff]  ;;  %v1585_v62 = vrot.slane %v6423_v53, %v5582_v25  ;;  %v1735_v63 = vmul.f32 %v1707_v54, %v6602_v23 }
 0x11a   :  { %2339 = vmatprep.subr.mxu0 %v1550_v20  ;;  %v6623_v60 = vsel %vm222_vm13, %v9905_v49, %v6575_v5  ;;  %v1795_v47 = vmul.f32 %v9907_v59, %v9906_v32  ;;  %v1455_v48 = vrot.slane %v6596_v50, %v5552_v12  ;;  %v1451_v42 = vrot.slane %v6596_v50, %v5549_v11  ;;  %v5232_v45 = vld [vmem:[%s9606_s2 + $0x80] ss:$8 sm:$0xf0] }
 0x11b   :  { %2401 = vmatpush2.msra.mxu1 %v1856_v28  ;;  %2340 = vmatpush2.msra.mxu0 %v1549_v1  ;;  %v6641_v30 = vsel %vm9679_vm14, %v9908_v2, %v6612_v40  ;;  %v1734_v14 = vmul.f32 %v1703_v34, %v9909_v55  ;;  %v1581_v54 = vrot.slane %v6423_v53, %v5579_v24  ;;  %v9911_v28 = vld [vmem:[#allocation55_spill] sm:$0xff]  ;;  %vm1348_vm14 = vcmp.lt.s32.totalorder %v5542_v10, 120 }
 0x11c   :  { %2402 = vmatprep.subr.mxu1 %v1796_v33  ;;  %v1423_v56 = vpop.permute.xlu0 %1422  ;;  %v1674_v21 = vmul.f32 %v1646_v26, %v6623_v60  ;;  %v6656_v20 = vpop.permute.xlu1 %1418  ;;  %v1673_v19 = vmul.f32 %v1642_v61, %v9911_v28  ;;  %v1524_v1 = vrot.slane %v6440_v46, %v5582_v25  ;;  %v1613_v33 = vmul.f32 %v1585_v62, %v6641_v30 }
 0x11d   :  { %2403 = vmatpush2.msra.mxu1 %v1795_v47  ;;  %9910 = vst [vmem:[#allocation53_spill] sm:$0xff] %v6656_v20  ;;  %v1440_v34 = vsel %vm1434_vm12, %v1421_v29, %v1423_v56  ;;  %v1441_v16 = vsel %vm1434_vm12, %v6656_v20, %v1421_v29  ;;  %v6667_v32 = vor.u32 %v5232_v45, %v5231_v8 }
 0x11e   :  { %2404 = vmatprep.subr.mxu1 %v1735_v63  ;;  %v1489_v49 = vmul.f32 %v1455_v48, %v1440_v34  ;;  %v1488_v26 = vmul.f32 %v1451_v42, %v1441_v16  ;;  %v1612_v59 = vmul.f32 %v1581_v54, %v6418_v38  ;;  %v1520_v47 = vrot.slane %v6440_v46, %v5579_v24  ;;  %v9913_v63 = vld [vmem:[#allocation3_spill] sm:$0xff] }
 0x11f   :  { %2405 = vmatpush2.msra.mxu1 %v1734_v14  ;;  %9912 = vst [vmem:[#allocation54_spill] sm:$0xff] %v6667_v32  ;;  %v6675_v2 = vsub.s32 5, %v9913_v63  ;;  %v1369_v48 = vrot.slane %v6667_v32, %v5552_v12  ;;  %v1365_v42 = vrot.slane %v6667_v32, %v5549_v11  ;;  %v6691_v14 = vsub.s32 4, %v9913_v63 }
 0x120   :  { %2406 = vmatprep.subr.mxu1 %v1674_v21  ;;  %v6672_v29 = vpop.permute.xlu0 %41  ;;  %2341 = vmatprep.subr.mxu0 %v1489_v49  ;;  %v1335_v61 = vpop.permute.xlu1 %1334  ;;  %v1551_v55 = vmul.f32 %v1520_v47, %v6457_v4  ;;  %v9917_v21 = vld [vmem:[#allocation6_spill] sm:$0xff]  ;;  %v9919_v49 = vld [vmem:[#allocation13_spill] sm:$0xff] }
 0x121   :  { %2407 = vmatpush2.msra.mxu1 %v1673_v19  ;;  %9914 = vst [vmem:[#allocation46_spill] sm:$0xff] %v6675_v2  ;;  %v6681_v62 = vsel %vm51_vm15, %v6447_v18, %v6672_v29  ;;  %2342 = vmatpush2.msra.mxu0 %v1488_v26  ;;  %9915 = vst [vmem:[#allocation58_spill] sm:$0xff] %v6691_v14  ;;  %v1295_v34 = vrot.slane %v9917_v21, %v6691_v14  ;;  %v6707_v19 = vld [vmem:[%s9607_s1] sm:$0xff] }
 0x122   :  { %2408 = vmatprep.subr.mxu1 %v1613_v33  ;;  %v1552_v38 = vmul.f32 %v1524_v1, %v6681_v62  ;;  %v1299_v28 = vrot.slane %v9917_v21, %v6675_v2  ;;  %9918 = vst [vmem:[#allocation55_spill] sm:$0xff] %v6707_v19 }
 0x123   :  { %2409 = vmatpush2.msra.mxu1 %v1612_v59 }
 0x124   :  { %v1337_v54 = vpop.permute.xlu0 %1336  ;;  %2410 = vmatprep.subr.mxu1 %v1552_v38  ;;  %v6693_v18 = vpop.permute.xlu1 %1332  ;;  %v1463_v38 = vrot.slane %v6596_v50, %v5582_v25 }
 0x125   :  { %9916 = vst [vmem:[#allocation51_spill] sm:$0xff] %v6693_v18  ;;  %v1354_v8 = vsel %vm1348_vm14, %v1335_v61, %v1337_v54  ;;  %v1355_v45 = vsel %vm1348_vm14, %v6693_v18, %v1335_v61  ;;  %2411 = vmatpush2.msra.mxu1 %v1551_v55 }
 0x126   :  { %v1403_v16 = vmul.f32 %v1369_v48, %v1354_v8  ;;  %v1402_v4 = vmul.f32 %v1365_v42, %v1355_v45  ;;  %v1459_v48 = vrot.slane %v6596_v50, %v5579_v24  ;;  %v9920_v42 = vld [vmem:[#allocation25_spill] sm:$0xff] }
 0x128   :  { %v1257_v1 = vpop.permute.xlu0 %1256  ;;  %2343 = vmatprep.subr.mxu0 %v1403_v16  ;;  %v1259_v33 = vpop.permute.xlu1 %1258  ;;  %v9922_v16 = vld [vmem:[#allocation8_spill] sm:$0xff] }
 0x129   :  { %v1265_v26 = vsel %vm1262_vm0, %v9919_v49, %v1257_v1  ;;  %v1264_v59 = vsel %vm1262_vm0, %v1257_v1, %v1259_v33  ;;  %2344 = vmatpush2.msra.mxu0 %v1402_v4  ;;  %v1209_v4 = vrot.slane %v9922_v16, %v6691_v14  ;;  %v1213_v49 = vrot.slane %v9922_v16, %v6675_v2 }
 0x12a   :  { %v1320_v47 = vmul.f32 %v1295_v34, %v1265_v26  ;;  %v1321_v61 = vmul.f32 %v1299_v28, %v1264_v59  ;;  %2346 = vmatmul.mubr.f32.vlgmr.msra.gmra.mxu0 %v6707_v19 }
 0x12b   :  { %5255 = vmatprep.mubr.msk.f32.mxu0 %vm2277_vm7, %v9920_v42 }
 0x12c   :  { %v1425_v55 = vpop.permute.xlu0 %1424  ;;  %2423 = vmatprep.subr.mxu0 %v1321_v61  ;;  %v6721_v8 = vpop.permute.xlu1 %1426  ;;  %v6733_v61 = vsub.s32 6, %v9913_v63 }
 0x12d   :  { %9921 = vst [vmem:[#allocation3_spill] sm:$0xff] %v6721_v8  ;;  %v1439_v45 = vsel %vm1434_vm12, %v1423_v56, %v1425_v55  ;;  %v1438_v34 = vsel %vm1434_vm12, %v1425_v55, %v6721_v8  ;;  %2424 = vmatpush1.msra.mxu0 %v1320_v47  ;;  %v9924_v56 = vld [vmem:[#allocation14_spill] sm:$0xff]  ;;  %v9956_v8 = vld [vmem:[#allocation33_spill] sm:$0xff] }
 0x12e   :  { %v1491_v28 = vmul.f32 %v1463_v38, %v1438_v34  ;;  %v1490_v1 = vmul.f32 %v1459_v48, %v1439_v45  ;;  %9923 = vst [vmem:[#allocation6_spill] sm:$0xff] %v6733_v61  ;;  %v1377_v48 = vrot.slane %v6667_v32, %v5582_v25  ;;  %v1373_v45 = vrot.slane %v6667_v32, %v5579_v24 }
 0x12f   :  { %v6745_v34 = vsub.s32 7, %v9913_v63 }
 0x130   :  { %v1171_v26 = vpop.permute.xlu0 %1170  ;;  %2412 = vmatprep.subr.mxu1 %v1491_v28  ;;  %v1173_v59 = vpop.permute.xlu1 %1172 }
 0x131   :  { %v1179_v42 = vsel %vm1176_vm1, %v9924_v56, %v1171_v26  ;;  %v1178_v47 = vsel %vm1176_vm1, %v1171_v26, %v1173_v59  ;;  %2413 = vmatpush2.msra.mxu1 %v1490_v1  ;;  %9925 = vst [vmem:[#allocation13_spill] sm:$0xff] %v6745_v34  ;;  %v1303_v1 = vrot.slane %v9917_v21, %v6733_v61 }
 0x132   :  { %v1234_v55 = vmul.f32 %v1209_v4, %v1179_v42  ;;  %v1235_v38 = vmul.f32 %v1213_v49, %v1178_v47  ;;  %v1307_v63 = vrot.slane %v9917_v21, %v6745_v34  ;;  %v5342_v42 = vld [vmem:[%s9605_s0 + $0x20] sm:$0xff]  ;;  %v1217_v21 = vrot.slane %v9922_v16, %v6733_v61 }
 0x134   :  { %v1339_v28 = vpop.permute.xlu0 %1338  ;;  %2425 = vmatprep.subr.mxu0 %v1235_v38  ;;  %v6747_v11 = vpop.permute.xlu1 %1340  ;;  %v9927_v38 = vld [vmem:[#allocation7_spill] sm:$0xff] }
 0x135   :  { %9926 = vst [vmem:[#allocation25_spill] sm:$0xff] %v6747_v11  ;;  %v1353_v56 = vsel %vm1348_vm14, %v1337_v54, %v1339_v28  ;;  %v1352_v4 = vsel %vm1348_vm14, %v1339_v28, %v6747_v11  ;;  %2426 = vmatpush1.msra.mxu0 %v1234_v55  ;;  %v9928_v28 = vld [vmem:[#allocation12_spill] sm:$0xff] }
 0x136   :  { %v1405_v49 = vmul.f32 %v1377_v48, %v1352_v4  ;;  %v1404_v26 = vmul.f32 %v1373_v45, %v1353_v56  ;;  %2427 = vmatprep.subr.mxu0 %v5858_v57  ;;  %v1119_v56 = vrot.slane %v9928_v28, %v6675_v2  ;;  %v1221_v4 = vrot.slane %v9922_v16, %v6745_v34 }
 0x137   :  { %2428 = vmatpush1.msra.mxu0 %v5342_v42 }
 0x138   :  { %v1261_v54 = vpop.permute.xlu0 %1260  ;;  %2414 = vmatprep.subr.mxu1 %v1405_v49  ;;  %v1075_v47 = vpop.permute.xlu1 %1074  ;;  %v5343_v49 = vld [vmem:[%s9607_s1 + $0x8] sm:$0xff] }
 0x139   :  { %v1263_v55 = vsel %vm1262_vm0, %v1259_v33, %v1261_v54  ;;  %v1270_v48 = vsel %vm1262_vm0, %v1261_v54, %v9927_v38  ;;  %2415 = vmatpush2.msra.mxu1 %v1404_v26  ;;  %v1115_v33 = vrot.slane %v9928_v28, %v6691_v14  ;;  %v9929_v26 = vld [vmem:[#allocation19_spill] sm:$0xff] }
 0x13a   :  { %v1322_v57 = vmul.f32 %v1303_v1, %v1263_v55  ;;  %2417 = vmatmul.mubr.f32.vlgmr.msra.gmra.mxu1 %v6707_v19  ;;  %v1323_v45 = vmul.f32 %v1307_v63, %v1270_v48  ;;  %v1086_v1 = vsel %vm1082_vm2, %v9929_v26, %v1075_v47  ;;  %v9930_v55 = vld [vmem:[#allocation11_spill] sm:$0xff] }
 0x13b   :  { %5256 = vmatprep.mubr.msk.f32.mxu1 %vm2277_vm7, %v5343_v49  ;;  %v9931_v48 = vld [vmem:[#allocation15_spill] sm:$0xff]  ;;  %v1140_v12 = vmul.f32 %v1115_v33, %v1086_v1 }
 0x13c   :  { %v1077_v63 = vpop.permute.xlu0 %1076  ;;  %2494 = vmatprep.subr.mxu1 %v1323_v45  ;;  %v1175_v42 = vpop.permute.xlu1 %1174  ;;  %v1029_v49 = vrot.slane %v9931_v48, %v6691_v14  ;;  %v1033_v45 = vrot.slane %v9931_v48, %v6675_v2 }
 0x13d   :  { %v1085_v54 = vsel %vm1082_vm2, %v1075_v47, %v1077_v63  ;;  %v1177_v16 = vsel %vm1176_vm1, %v1173_v59, %v1175_v42  ;;  %v1184_v38 = vsel %vm1176_vm1, %v1175_v42, %v9930_v55  ;;  %2495 = vmatpush1.msra.mxu1 %v1322_v57  ;;  %v9932_v59 = vld [vmem:[#allocation23_spill] sm:$0xff]  ;;  %v1127_v55 = vrot.slane %v9928_v28, %v6745_v34 }
 0x13e   :  { %v1236_v25 = vmul.f32 %v1217_v21, %v1177_v16  ;;  %v1141_v24 = vmul.f32 %v1119_v56, %v1085_v54  ;;  %v1237_v26 = vmul.f32 %v1221_v4, %v1184_v38  ;;  %v9933_v56 = vld [vmem:[#allocation17_spill] sm:$0xff] }
 0x13f   :  { %v943_v4 = vrot.slane %v9933_v56, %v6691_v14  ;;  %v947_v33 = vrot.slane %v9933_v56, %v6675_v2 }
 0x140   :  { %v989_v19 = vpop.permute.xlu0 %988  ;;  %2429 = vmatprep.subr.mxu0 %v1141_v24  ;;  %2496 = vmatprep.subr.mxu1 %v1237_v26  ;;  %v991_v47 = vpop.permute.xlu1 %990  ;;  %v5344_v24 = vld [vmem:[%s9605_s0 + $0x30] sm:$0xff]  ;;  %v9935_v26 = vld [vmem:[#allocation16_spill] sm:$0xff] }
 0x141   :  { %v1000_v18 = vsel %vm996_vm3, %v9932_v59, %v989_v19  ;;  %v999_v57 = vsel %vm996_vm3, %v989_v19, %v991_v47  ;;  %2430 = vmatpush1.msra.mxu0 %v1140_v12  ;;  %2497 = vmatpush1.msra.mxu1 %v1236_v25  ;;  %v9934_v12 = vld [vmem:[#allocation26_spill] sm:$0xff] }
 0x142   :  { %v1054_v21 = vmul.f32 %v1029_v49, %v1000_v18  ;;  %v1055_v42 = vmul.f32 %v1033_v45, %v999_v57  ;;  %2498 = vmatprep.subr.mxu1 %v6501_v37  ;;  %v1123_v37 = vrot.slane %v9928_v28, %v6733_v61  ;;  %v1037_v57 = vrot.slane %v9931_v48, %v6733_v61 }
 0x143   :  { %2499 = vmatpush1.msra.mxu1 %v5344_v24  ;;  %v1041_v28 = vrot.slane %v9931_v48, %v6745_v34 }
 0x144   :  { %v903_v1 = vpop.permute.xlu0 %902  ;;  %2431 = vmatprep.subr.mxu0 %v1055_v42  ;;  %v905_v19 = vpop.permute.xlu1 %904  ;;  %v9936_v42 = vld [vmem:[#allocation20_spill] sm:$0xff] }
 0x145   :  { %v914_v25 = vsel %vm910_vm4, %v9934_v12, %v903_v1  ;;  %v913_v18 = vsel %vm910_vm4, %v903_v1, %v905_v19  ;;  %2432 = vmatpush1.msra.mxu0 %v1054_v21  ;;  %v857_v24 = vrot.slane %v9936_v42, %v6691_v14  ;;  %v9937_v1 = vld [vmem:[#allocation31_spill] sm:$0xff] }
 0x146   :  { %v968_v54 = vmul.f32 %v943_v4, %v914_v25  ;;  %v969_v16 = vmul.f32 %v947_v33, %v913_v18  ;;  %v861_v33 = vrot.slane %v9936_v42, %v6675_v2  ;;  %v951_v18 = vrot.slane %v9933_v56, %v6733_v61 }
 0x148   :  { %v1079_v38 = vpop.permute.xlu0 %1078  ;;  %2433 = vmatprep.subr.mxu0 %v969_v16  ;;  %v817_v49 = vpop.permute.xlu1 %816 }
 0x149   :  { %v1083_v45 = vsel %vm1082_vm2, %v1079_v38, %v9935_v26  ;;  %v1084_v59 = vsel %vm1082_vm2, %v1077_v63, %v1079_v38  ;;  %2434 = vmatpush1.msra.mxu0 %v968_v54  ;;  %v828_v12 = vsel %vm824_vm5, %v9937_v1, %v817_v49 }
 0x14a   :  { %v1142_v21 = vmul.f32 %v1123_v37, %v1084_v59  ;;  %v1143_v4 = vmul.f32 %v1127_v55, %v1083_v45  ;;  %v9938_v37 = vld [vmem:[#allocation18_spill] sm:$0xff]  ;;  %v882_v1 = vmul.f32 %v857_v24, %v828_v12 }
 0x14b   :  { %v9939_v55 = vld [vmem:[#allocation22_spill] sm:$0xff] }
 0x14c   :  { %v819_v63 = vpop.permute.xlu0 %818  ;;  %2500 = vmatprep.subr.mxu1 %v1143_v4  ;;  %v993_v25 = vpop.permute.xlu1 %992  ;;  %v775_v38 = vrot.slane %v9939_v55, %v6675_v2  ;;  %v955_v4 = vrot.slane %v9933_v56, %v6745_v34  ;;  %v9941_v56 = vld [vmem:[#allocation21_spill] sm:$0xff] }
 0x14d   :  { %v827_v54 = vsel %vm824_vm5, %v817_v49, %v819_v63  ;;  %v997_v48 = vsel %vm996_vm3, %v993_v25, %v9938_v37  ;;  %v998_v16 = vsel %vm996_vm3, %v991_v47, %v993_v25  ;;  %2501 = vmatpush1.msra.mxu1 %v1142_v21  ;;  %v771_v49 = vrot.slane %v9939_v55, %v6691_v14  ;;  %v9940_v21 = vld [vmem:[#allocation27_spill] sm:$0xff] }
 0x14e   :  { %v1056_v26 = vmul.f32 %v1037_v57, %v998_v16  ;;  %v883_v45 = vmul.f32 %v861_v33, %v827_v54  ;;  %v1057_v59 = vmul.f32 %v1041_v28, %v997_v48  ;;  %v865_v47 = vrot.slane %v9936_v42, %v6733_v61 }
 0x14f   :  { %v689_v25 = vrot.slane %v9940_v21, %v6675_v2  ;;  %v869_v48 = vrot.slane %v9936_v42, %v6745_v34  ;;  %v796_v16 = vmul.f32 %v771_v49, %v6490_v58 }
 0x150   :  { %v733_v20 = vpop.permute.xlu0 %732  ;;  %2435 = vmatprep.subr.mxu0 %v883_v45  ;;  %2502 = vmatprep.subr.mxu1 %v1057_v59  ;;  %v907_v37 = vpop.permute.xlu1 %906 }
 0x151   :  { %v6854_v57 = vsel %vm738_vm6, %v6449_v27, %v733_v20  ;;  %v911_v33 = vsel %vm910_vm4, %v907_v37, %v9941_v56  ;;  %v912_v28 = vsel %vm910_vm4, %v905_v19, %v907_v37  ;;  %2436 = vmatpush1.msra.mxu0 %v882_v1  ;;  %2503 = vmatpush1.msra.mxu1 %v1056_v26  ;;  %v9943_v1 = vld [vmem:[#allocation30_spill] sm:$0xff] }
 0x152   :  { %v970_v24 = vmul.f32 %v951_v18, %v912_v28  ;;  %v797_v12 = vmul.f32 %v775_v38, %v6854_v57  ;;  %v971_v54 = vmul.f32 %v955_v4, %v911_v33  ;;  %v685_v27 = vrot.slane %v9940_v21, %v6691_v14  ;;  %v9942_v38 = vld [vmem:[#allocation24_spill] sm:$0xff] }
 0x153   :  { %v779_v19 = vrot.slane %v9939_v55, %v6733_v61  ;;  %v603_v37 = vrot.slane %v9943_v1, %v6675_v2  ;;  %v783_v33 = vrot.slane %v9939_v55, %v6745_v34 }
 0x154   :  { %v647_v45 = vpop.permute.xlu0 %646  ;;  %2437 = vmatprep.subr.mxu0 %v797_v12  ;;  %2504 = vmatprep.subr.mxu1 %v971_v54  ;;  %v821_v59 = vpop.permute.xlu1 %820  ;;  %v710_v56 = vmul.f32 %v685_v27, %v6514_v35  ;;  %v693_v54 = vrot.slane %v9940_v21, %v6733_v61 }
 0x155   :  { %v6872_v18 = vsel %vm652_vm8, %v6477_v43, %v647_v45  ;;  %v825_v42 = vsel %vm824_vm5, %v821_v59, %v9942_v38  ;;  %v826_v58 = vsel %vm824_vm5, %v819_v63, %v821_v59  ;;  %2438 = vmatpush1.msra.mxu0 %v796_v16  ;;  %2505 = vmatpush1.msra.mxu1 %v970_v24 }
 0x156   :  { %v884_v26 = vmul.f32 %v865_v47, %v826_v58  ;;  %v711_v4 = vmul.f32 %v689_v25, %v6872_v18  ;;  %v885_v49 = vmul.f32 %v869_v48, %v825_v42  ;;  %v599_v43 = vrot.slane %v9943_v1, %v6691_v14  ;;  %v9944_v25 = vld [vmem:[#allocation28_spill] sm:$0xff] }
 0x157   :  { %v697_v59 = vrot.slane %v9940_v21, %v6745_v34  ;;  %v9946_v58 = vld [vmem:[#allocation32_spill] sm:$0xff] }
 0x158   :  { %v561_v28 = vpop.permute.xlu0 %560  ;;  %2439 = vmatprep.subr.mxu0 %v711_v4  ;;  %2506 = vmatprep.subr.mxu1 %v885_v49  ;;  %v735_v63 = vpop.permute.xlu1 %734  ;;  %v624_v16 = vmul.f32 %v599_v43, %v6537_v39  ;;  %v9947_v49 = vld [vmem:[#allocation37_spill] sm:$0xff] }
 0x159   :  { %v6890_v47 = vsel %vm9692_vm9, %v6479_v31, %v561_v28  ;;  %v6895_v24 = vsel %vm738_vm6, %v735_v63, %v9944_v25  ;;  %v6899_v35 = vsel %vm738_vm6, %v733_v20, %v735_v63  ;;  %2440 = vmatpush1.msra.mxu0 %v710_v56  ;;  %2507 = vmatpush1.msra.mxu1 %v884_v26  ;;  %v9945_v31 = vld [vmem:[#allocation34_spill] sm:$0xff] }
 0x15a   :  { %v798_v55 = vmul.f32 %v779_v19, %v6899_v35  ;;  %v625_v12 = vmul.f32 %v603_v37, %v6890_v47  ;;  %v517_v48 = vrot.slane %v9945_v31, %v6675_v2  ;;  %v513_v27 = vrot.slane %v9945_v31, %v6691_v14 }
 0x15b   :  { %v799_v20 = vmul.f32 %v783_v33, %v6895_v24  ;;  %v431_v37 = vrot.slane %v9947_v49, %v6675_v2  ;;  %v427_v43 = vrot.slane %v9947_v49, %v6691_v14  ;;  %v611_v33 = vrot.slane %v9943_v1, %v6745_v34 }
 0x15c   :  { %v475_v38 = vpop.permute.xlu0 %474  ;;  %2441 = vmatprep.subr.mxu0 %v625_v12  ;;  %v649_v19 = vpop.permute.xlu1 %648  ;;  %v538_v56 = vmul.f32 %v513_v27, %v6556_v15  ;;  %v9948_v12 = vld [vmem:[#allocation35_spill] sm:$0xff] }
 0x15d   :  { %v6916_v42 = vsel %vm9698_vm10, %v6525_v0, %v475_v38  ;;  %2508 = vmatprep.subr.mxu1 %v799_v20  ;;  %v6921_v39 = vsel %vm652_vm8, %v649_v19, %v9946_v58  ;;  %v6925_v26 = vsel %vm652_vm8, %v647_v45, %v649_v19  ;;  %2442 = vmatpush1.msra.mxu0 %v624_v16  ;;  %v9949_v16 = vld [vmem:[#allocation40_spill] sm:$0xff] }
 0x15e   :  { %v712_v21 = vmul.f32 %v693_v54, %v6925_v26  ;;  %2509 = vmatpush1.msra.mxu1 %v798_v55  ;;  %v539_v4 = vmul.f32 %v517_v48, %v6916_v42  ;;  %v607_v0 = vrot.slane %v9943_v1, %v6733_v61  ;;  %v713_v45 = vmul.f32 %v697_v59, %v6921_v39 }
 0x15f   :  { %v345_v27 = vrot.slane %v9949_v16, %v6675_v2  ;;  %v452_v20 = vmul.f32 %v427_v43, %v6584_v6  ;;  %v341_v59 = vrot.slane %v9949_v16, %v6691_v14  ;;  %v525_v19 = vrot.slane %v9945_v31, %v6745_v34 }
 0x160   :  { %v389_v63 = vpop.permute.xlu0 %388  ;;  %2443 = vmatprep.subr.mxu0 %v539_v4  ;;  %v563_v25 = vpop.permute.xlu1 %562  ;;  %2510 = vmatprep.subr.mxu1 %v713_v45  ;;  %v2028_v4 = vrot.slane %v6304_v44, %v6745_v34  ;;  %v1906_v6 = vrot.slane %v6308_v17, %v6745_v34 }
 0x161   :  { %v6942_v55 = vsel %vm9697_vm11, %v6528_v3, %v389_v63  ;;  %v6947_v15 = vsel %vm9692_vm9, %v563_v25, %v9948_v12  ;;  %v6951_v54 = vsel %vm9692_vm9, %v561_v28, %v563_v25  ;;  %2444 = vmatpush1.msra.mxu0 %v538_v56  ;;  %2511 = vmatpush1.msra.mxu1 %v712_v21  ;;  %vm9950_vm9 = vcmp.lt.s32.totalorder %v5542_v10, 65  ;;  %v9952_v12 = vld [vmem:[#allocation43_spill] sm:$0xff] }
 0x162   :  { %v626_v1 = vmul.f32 %v607_v0, %v6951_v54  ;;  %v453_v48 = vmul.f32 %v431_v37, %v6942_v55  ;;  %v521_v3 = vrot.slane %v9945_v31, %v6733_v61  ;;  %v627_v28 = vmul.f32 %v611_v33, %v6947_v15  ;;  %v9951_v31 = vld [vmem:[#allocation38_spill] sm:$0xff] }
 0x163   :  { %v1967_v0 = vrot.slane %v6306_v41, %v6745_v34 }
 0x164   :  { %v303_v58 = vpop.permute.xlu0 %302  ;;  %2445 = vmatprep.subr.mxu0 %v453_v48  ;;  %v477_v21 = vpop.permute.xlu1 %476  ;;  %2512 = vmatprep.subr.mxu1 %v627_v28  ;;  %v259_v48 = vrot.slane %v9952_v12, %v6675_v2  ;;  %v366_v28 = vmul.f32 %v341_v59, %v6602_v23 }
 0x165   :  { %v6976_v56 = vsel %vm9950_vm9, %v6572_v9, %v303_v58  ;;  %v6981_v43 = vsel %vm9698_vm10, %v477_v21, %v9951_v31  ;;  %v6985_v45 = vsel %vm9698_vm10, %v475_v38, %v477_v21  ;;  %2446 = vmatpush1.msra.mxu0 %v452_v20  ;;  %2513 = vmatpush1.msra.mxu1 %v626_v1  ;;  %vm9957_vm9 = vcmp.lt.s32.totalorder %v5542_v10, 72 }
 0x166   :  { %v540_v33 = vmul.f32 %v521_v3, %v6985_v45  ;;  %v367_v25 = vmul.f32 %v345_v27, %v6976_v56  ;;  %v435_v9 = vrot.slane %v9947_v49, %v6733_v61  ;;  %v255_v31 = vrot.slane %v9952_v12, %v6691_v14 }
 0x167   :  { %v541_v38 = vmul.f32 %v525_v19, %v6981_v43  ;;  %v439_v20 = vrot.slane %v9947_v49, %v6745_v34  ;;  %v9953_v49 = vld [vmem:[#allocation41_spill] sm:$0xff]  ;;  %v7039_v32 = vmul.f32 %v1967_v0, %v9956_v8 }
 0x168   :  { %v217_v3 = vpop.permute.xlu0 %216  ;;  %2447 = vmatprep.subr.mxu0 %v367_v25  ;;  %v391_v1 = vpop.permute.xlu1 %390  ;;  %v280_v37 = vmul.f32 %v255_v31, %v6623_v60 }
 0x169   :  { %v7010_v19 = vsel %vm222_vm13, %v6575_v5, %v217_v3  ;;  %2514 = vmatprep.subr.mxu1 %v541_v38  ;;  %v7015_v25 = vsel %vm9697_vm11, %v391_v1, %v9953_v49  ;;  %v7019_v21 = vsel %vm9697_vm11, %v389_v63, %v391_v1  ;;  %2448 = vmatpush1.msra.mxu0 %v366_v28  ;;  %v9954_v38 = vld [vmem:[#allocation47_spill] sm:$0xff]  ;;  %v9955_v1 = vld [vmem:[#allocation29_spill] sm:$0xff]  ;;  %vm9960_vm11 = vcmp.lt.s32.totalorder %v5542_v10, 65 }
 0x16a   :  { %v454_v23 = vmul.f32 %v435_v9, %v7019_v21  ;;  %2515 = vmatpush1.msra.mxu1 %v540_v33  ;;  %v281_v59 = vmul.f32 %v259_v48, %v7010_v19  ;;  %v349_v5 = vrot.slane %v9949_v16, %v6733_v61  ;;  %v173_v27 = vrot.slane %v9954_v38, %v6675_v2  ;;  %vm9962_vm10 = vmmov %vm9960_vm11 }
 0x16b   :  { %v169_v49 = vrot.slane %v9954_v38, %v6691_v14  ;;  %v455_v63 = vmul.f32 %v439_v20, %v7015_v25  ;;  %v353_v28 = vrot.slane %v9949_v16, %v6745_v34  ;;  %v83_v33 = vrot.slane %v6225_v52, %v6691_v14  ;;  %v9959_v16 = vld [vmem:[#allocation44_spill] sm:$0xff] }
 0x16c   :  { %v131_v9 = vpop.permute.xlu0 %130  ;;  %2449 = vmatprep.subr.mxu0 %v281_v59  ;;  %v305_v48 = vpop.permute.xlu1 %304  ;;  %v7036_v11 = vmul.f32 %v2028_v4, %v9955_v1  ;;  %v9963_v59 = vld [vmem:[#allocation36_spill] sm:$0xff] }
 0x16d   :  { %v7046_v31 = vsel %vm9957_vm9, %v6612_v40, %v131_v9  ;;  %2516 = vmatprep.subr.mxu1 %v455_v63  ;;  %v7051_v20 = vsel %vm9960_vm11, %v305_v48, %v9959_v16  ;;  %v7055_v4 = vsel %vm9962_vm10, %v303_v58, %v305_v48  ;;  %2450 = vmatpush1.msra.mxu0 %v280_v37  ;;  %vm9970_vm10 = vmmov %vm9957_vm9 }
 0x16e   :  { %9958 = vst [vmem:[#allocation8_spill] sm:$0xff] %v7046_v31  ;;  %9961 = vst [vmem:[#allocation14_spill] sm:$0xff] %v7051_v20  ;;  %v368_v8 = vmul.f32 %v349_v5, %v7055_v4  ;;  %2517 = vmatpush1.msra.mxu1 %v454_v23  ;;  %v195_v0 = vmul.f32 %v173_v27, %v7046_v31  ;;  %v87_v40 = vrot.slane %v6225_v52, %v6675_v2 }
 0x16f   :  { %v7062_v63 = vmul.f32 %v1906_v6, %v9963_v59  ;;  %v194_v1 = vmul.f32 %v169_v49, %v6641_v30  ;;  %v369_v16 = vmul.f32 %v353_v28, %v7051_v20  ;;  %v263_v58 = vrot.slane %v9952_v12, %v6733_v61  ;;  %v9964_v49 = vld [vmem:[#allocation39_spill] sm:$0xff]  ;;  %v9967_v59 = vld [vmem:[#allocation48_spill] sm:$0xff]  ;;  %vm9971_vm11 = vmmov %vm9957_vm9 }
 0x170   :  { %v267_v37 = vrot.slane %v9952_v12, %v6745_v34  ;;  %v2016_v23 = vrot.slane %v6304_v44, %v6691_v14  ;;  %v1955_v27 = vrot.slane %v6306_v41, %v6691_v14  ;;  %v44_v5 = vpop.permute.xlu0 %43  ;;  %2451 = vmatprep.subr.mxu0 %v195_v0  ;;  %v219_v6 = vpop.permute.xlu1 %218  ;;  %v2020_v30 = vrot.slane %v6304_v44, %v6675_v2 }
 0x171   :  { %v9965_v28 = vrot.slane %v6328_v22, %v6745_v34  ;;  %v7085_v12 = vsel %vm51_vm15, %v6672_v29, %v44_v5  ;;  %2518 = vmatprep.subr.mxu1 %v369_v16  ;;  %v7090_v0 = vsel %vm222_vm13, %v219_v6, %v9967_v59  ;;  %v7094_v60 = vsel %vm222_vm13, %v217_v3, %v219_v6 }
 0x172   :  { %9966 = vst [vmem:[#allocation7_spill] sm:$0xff] %v7085_v12  ;;  %9968 = vst [vmem:[#allocation12_spill] sm:$0xff] %v7090_v0  ;;  %2452 = vmatpush1.msra.mxu0 %v194_v1  ;;  %2519 = vmatpush1.msra.mxu1 %v368_v8  ;;  %v177_v29 = vrot.slane %v9954_v38, %v6733_v61  ;;  %v109_v16 = vmul.f32 %v87_v40, %v7085_v12  ;;  %v9972_v12 = vld [vmem:[#allocation56_spill] sm:$0xff]  ;;  %vm10092_vm9 = vcmp.lt.s32.totalorder %v5542_v10, 57 }
 0x173   :  { %v7080_v48 = vmul.f32 %v9965_v28, %v9964_v49  ;;  %v1894_v49 = vrot.slane %v6308_v17, %v6691_v14  ;;  %v2024_v28 = vrot.slane %v6304_v44, %v6733_v61  ;;  %v282_v59 = vmul.f32 %v263_v58, %v7094_v60 }
 0x174   :  { %v283_v20 = vmul.f32 %v267_v37, %v7090_v0  ;;  %v181_v3 = vrot.slane %v9954_v38, %v6745_v34  ;;  %v1959_v1 = vrot.slane %v6306_v41, %v6675_v2  ;;  %v108_v6 = vmul.f32 %v83_v33, %v6681_v62  ;;  %v133_v31 = vpop.permute.xlu0 %132  ;;  %2453 = vmatprep.subr.mxu0 %v109_v16  ;;  %v46_v8 = vpop.permute.xlu1 %45  ;;  %v9969_v37 = vld [vmem:[#allocation50_spill] sm:$0xff] }
 0x175   :  { %v91_v44 = vrot.slane %v6225_v52, %v6733_v61  ;;  %v95_v40 = vrot.slane %v6225_v52, %v6745_v34  ;;  %v1898_v58 = vrot.slane %v6308_v17, %v6675_v2  ;;  %v7119_v38 = vsel %vm9970_vm10, %v133_v31, %v9969_v37 }
 0x176   :  { %v7123_v62 = vsel %vm9971_vm11, %v131_v9, %v133_v31  ;;  %2520 = vmatprep.subr.mxu1 %v283_v20  ;;  %v7127_v33 = vsel %vm51_vm15, %v44_v5, %v46_v8  ;;  %v2042_v16 = vmul.f32 %v2020_v30, %v6899_v35  ;;  %v1833_v52 = vrot.slane %v6328_v22, %v6691_v14  ;;  %v9973_v9 = vld [vmem:[#allocation42_spill] sm:$0xff] }
 0x177   :  { %v196_v0 = vmul.f32 %v177_v29, %v7123_v62  ;;  %v7136_v37 = vsel %vm51_vm15, %v46_v8, %v9972_v12  ;;  %2454 = vmatpush1.msra.mxu0 %v108_v6  ;;  %v9974_v31 = vrot.slane %v6330_v36, %v6745_v34  ;;  %2521 = vmatpush1.msra.mxu1 %v282_v59  ;;  %vm10103_vm10 = vcmp.lt.s32.totalorder %v5542_v10, 63 }
 0x178   :  { %2463 = vmatprep.subr.mxu0 %v9894_v7  ;;  %v197_v35 = vmul.f32 %v181_v3, %v7119_v38  ;;  %v1981_v5 = vmul.f32 %v1959_v1, %v6925_v26  ;;  %v1837_v30 = vrot.slane %v6328_v22, %v6675_v2  ;;  %v2041_v12 = vmul.f32 %v2016_v23, %v6854_v57 }
 0x179   :  { %v7142_v20 = vmul.f32 %v9974_v31, %v9973_v9  ;;  %v1963_v29 = vrot.slane %v6306_v41, %v6733_v61  ;;  %v1772_v6 = vrot.slane %v6330_v36, %v6691_v14  ;;  %v110_v8 = vmul.f32 %v91_v44, %v7127_v33  ;;  %2464 = vmatpush2.msra.mxu0 %v9894_v7  ;;  %v9975_v44 = vld [vmem:[#allocation45_spill] sm:$0xff]  ;;  %v7192_v31 = vpop.permute.xlu1 %1430 }
 0x17a   :  { %2465 = vmatprep.subr.mxu0 %v2042_v16  ;;  %2522 = vmatprep.subr.mxu1 %v197_v35  ;;  %v111_v59 = vmul.f32 %v95_v40, %v7136_v37  ;;  %v1920_v26 = vmul.f32 %v1898_v58, %v6951_v54  ;;  %v1776_v3 = vrot.slane %v6330_v36, %v6675_v2  ;;  %v1429_v58 = vpop.permute.xlu0 %1428  ;;  %vm10116_vm11 = vcmp.lt.s32.totalorder %v5542_v10, 64 }
 0x17b   :  { %v1980_v57 = vmul.f32 %v1955_v27, %v6872_v18  ;;  %v1902_v41 = vrot.slane %v6308_v17, %v6733_v61  ;;  %v1711_v23 = vrot.slane %v6356_v51, %v6691_v14  ;;  %2466 = vmatpush2.msra.mxu0 %v2041_v12  ;;  %2523 = vmatpush1.msra.mxu1 %v196_v0 }
 0x17c   :  { %2467 = vmatprep.subr.mxu0 %v1981_v5  ;;  %2524 = vmatprep.subr.mxu1 %v111_v59  ;;  %v1859_v1 = vmul.f32 %v1837_v30, %v6985_v45  ;;  %v1715_v54 = vrot.slane %v6356_v51, %v6675_v2  ;;  %v9976_v40 = vrot.slane %v6356_v51, %v6745_v34  ;;  %v9980_v59 = vld [vmem:[#allocation8_spill] sm:$0xff] }
 0x17d   :  { %v1919_v17 = vmul.f32 %v1894_v49, %v6890_v47  ;;  %v1841_v27 = vrot.slane %v6328_v22, %v6733_v61  ;;  %v1650_v0 = vrot.slane %v6360_v13, %v6691_v14  ;;  %2468 = vmatpush2.msra.mxu0 %v1980_v57  ;;  %2525 = vmatpush1.msra.mxu1 %v110_v8  ;;  %v1345_v8 = vpop.permute.xlu1 %1344 }
 0x17e   :  { %v7172_v18 = vmul.f32 %v9976_v40, %v9975_v44  ;;  %v1780_v45 = vrot.slane %v6330_v36, %v6733_v61  ;;  %2469 = vmatprep.subr.mxu0 %v1920_v26  ;;  %2534 = vmatprep.subr.mxu1 %v9894_v7  ;;  %v1798_v16 = vmul.f32 %v1776_v3, %v7019_v21  ;;  %v9984_v40 = vld [vmem:[#allocation25_spill] sm:$0xff] }
 0x17f   :  { %v1654_v47 = vrot.slane %v6360_v13, %v6675_v2  ;;  %v2043_v49 = vmul.f32 %v2024_v28, %v6895_v24  ;;  %v1858_v22 = vmul.f32 %v1833_v52, %v6916_v42  ;;  %v1589_v9 = vrot.slane %v6423_v53, %v6691_v14  ;;  %2470 = vmatpush2.msra.mxu0 %v1919_v17 }
 0x180   :  { %2535 = vmatpush2.msra.mxu1 %v9894_v7  ;;  %v1719_v36 = vrot.slane %v6356_v51, %v6733_v61  ;;  %2471 = vmatprep.subr.mxu0 %v1859_v1  ;;  %v1737_v21 = vmul.f32 %v1715_v54, %v7055_v4  ;;  %v1593_v24 = vrot.slane %v6423_v53, %v6675_v2  ;;  %v9977_v4 = vld [vmem:[#allocation49_spill] sm:$0xff]  ;;  %v9983_v1 = vld [vmem:[#allocation7_spill] sm:$0xff] }
 0x181   :  { %2536 = vmatprep.subr.mxu1 %v7036_v11  ;;  %v1982_v42 = vmul.f32 %v1963_v29, %v6921_v39  ;;  %v1797_v28 = vmul.f32 %v1772_v6, %v6942_v55  ;;  %v1528_v52 = vrot.slane %v6440_v46, %v6691_v14  ;;  %2472 = vmatpush2.msra.mxu0 %v1858_v22  ;;  %v5276_v7 = vld [vmem:[%s9606_s2 + $0x42] ss:$8 sm:$0xf0] }
 0x182   :  { %2537 = vmatpush2.msra.mxu1 %v2043_v49  ;;  %2473 = vmatprep.subr.mxu0 %v1798_v16  ;;  %v1676_v51 = vmul.f32 %v1654_v47, %v7094_v60  ;;  %v1532_v11 = vrot.slane %v6440_v46, %v6675_v2  ;;  %v9978_v35 = vrot.slane %v6360_v13, %v6745_v34  ;;  %v1343_v60 = vpop.permute.xlu0 %1342  ;;  %v9987_v16 = vld [vmem:[#allocation12_spill] sm:$0xff] }
 0x183   :  { %2538 = vmatprep.subr.mxu1 %v7039_v32  ;;  %v1921_v55 = vmul.f32 %v1902_v41, %v6947_v15  ;;  %v1736_v5 = vmul.f32 %v1711_v23, %v6976_v56  ;;  %v1658_v30 = vrot.slane %v6360_v13, %v6733_v61  ;;  %2474 = vmatpush2.msra.mxu0 %v1797_v28  ;;  %v9981_v41 = vld [vmem:[#allocation3_spill] sm:$0xff]  ;;  %v9982_v23 = vld [vmem:[#allocation14_spill] sm:$0xff] }
 0x184   :  { %v1678_v39 = vmul.f32 %v9978_v35, %v9977_v4  ;;  %2539 = vmatpush2.msra.mxu1 %v1982_v42  ;;  %v1597_v32 = vrot.slane %v6423_v53, %v6733_v61  ;;  %2475 = vmatprep.subr.mxu0 %v1737_v21  ;;  %v1615_v12 = vmul.f32 %v1593_v24, %v7123_v62  ;;  %v9979_v62 = vld [vmem:[#allocation54_spill] sm:$0xff]  ;;  %v9988_v42 = vld [vmem:[#allocation53_spill] sm:$0xff]  ;;  %v9991_v35 = vld [vmem:[#allocation51_spill] sm:$0xff] }
 0x185   :  { %2540 = vmatprep.subr.mxu1 %v7062_v63  ;;  %v1471_v29 = vrot.slane %v6596_v50, %v6675_v2  ;;  %v1860_v15 = vmul.f32 %v1841_v27, %v6981_v43  ;;  %v1675_v56 = vmul.f32 %v1650_v0, %v7010_v19  ;;  %v1436_v13 = vsel %vm1434_vm12, %v1429_v58, %v7192_v31 }
 0x186   :  { %2476 = vmatpush2.msra.mxu0 %v1736_v5  ;;  %2541 = vmatpush2.msra.mxu1 %v1921_v55  ;;  %v1467_v6 = vrot.slane %v6596_v50, %v6691_v14  ;;  %v1554_v63 = vmul.f32 %v1532_v11, %v7127_v33  ;;  %v1385_v43 = vrot.slane %v9979_v62, %v6675_v2  ;;  %v1433_v27 = vpop.permute.xlu0 %1432  ;;  %v9992_v55 = vld [vmem:[#allocation55_spill] sm:$0xff] }
 0x187   :  { %2477 = vmatprep.subr.mxu0 %v1676_v51  ;;  %2542 = vmatprep.subr.mxu1 %v7080_v48  ;;  %v1799_v19 = vmul.f32 %v1780_v45, %v7015_v25  ;;  %v1614_v26 = vmul.f32 %v1589_v9, %v9980_v59  ;;  %v1350_v3 = vsel %vm1348_vm14, %v1343_v60, %v1345_v8  ;;  %v5278_v2 = vld [vmem:[%s9606_s2 + $0x43] ss:$8 sm:$0xf0] }
 0x188   :  { %2478 = vmatpush2.msra.mxu0 %v1675_v56  ;;  %2543 = vmatpush2.msra.mxu1 %v1860_v15  ;;  %v1536_v57 = vrot.slane %v6440_v46, %v6733_v61  ;;  %v1437_v48 = vsel %vm1434_vm12, %v9981_v41, %v1429_v58  ;;  %v1493_v33 = vmul.f32 %v1471_v29, %v1436_v13 }
 0x189   :  { %2479 = vmatprep.subr.mxu0 %v1615_v12  ;;  %2544 = vmatprep.subr.mxu1 %v7142_v20  ;;  %v1738_v25 = vmul.f32 %v1719_v36, %v9982_v23  ;;  %v1553_v54 = vmul.f32 %v1528_v52, %v9983_v1  ;;  %v1381_v44 = vrot.slane %v9979_v62, %v6691_v14  ;;  %v9985_v20 = vld [vmem:[#allocation52_spill] sm:$0xff]  ;;  %v1347_v36 = vpop.permute.xlu1 %1346  ;;  %v9989_v52 = vld [vmem:[#allocation57_spill] sm:$0xff] }
 0x18a   :  { %2480 = vmatpush2.msra.mxu0 %v1614_v26  ;;  %2545 = vmatpush2.msra.mxu1 %v1799_v19  ;;  %v1351_v17 = vsel %vm1348_vm14, %v9984_v40, %v1343_v60  ;;  %v1407_v0 = vmul.f32 %v1385_v43, %v1350_v3  ;;  %v9986_v45 = vrot.slane %v6423_v53, %v6745_v34  ;;  %v5275_v14 = vld [vmem:[%s9606_s2 + $0x42] ss:$8 sm:$0xf] }
 0x18b   :  { %2481 = vmatprep.subr.mxu0 %v1554_v63  ;;  %2546 = vmatprep.subr.mxu1 %v7172_v18  ;;  %v1677_v47 = vmul.f32 %v1658_v30, %v9987_v16  ;;  %v1492_v49 = vmul.f32 %v1467_v6, %v1437_v48  ;;  %v1475_v22 = vrot.slane %v6596_v50, %v6733_v61 }
 0x18c   :  { %v1617_v58 = vmul.f32 %v9986_v45, %v9985_v20  ;;  %2482 = vmatpush2.msra.mxu0 %v1553_v54  ;;  %2547 = vmatpush2.msra.mxu1 %v1738_v25  ;;  %v1435_v9 = vsel %vm1434_vm12, %v7192_v31, %v1433_v27  ;;  %v1389_v18 = vrot.slane %v9979_v62, %v6733_v61  ;;  %v5277_v61 = vld [vmem:[%s9606_s2 + $0x43] ss:$8 sm:$0xf] }
 0x18d   :  { %2483 = vmatprep.subr.mxu0 %v1493_v33  ;;  %2548 = vmatprep.subr.mxu1 %v1678_v39  ;;  %v1479_v53 = vrot.slane %v6596_v50, %v6745_v34  ;;  %v1616_v21 = vmul.f32 %v1597_v32, %v7119_v38  ;;  %v1406_v24 = vmul.f32 %v1381_v44, %v1351_v17 }
 0x18e   :  { %v1442_v28 = vsel %vm1434_vm12, %v1433_v27, %v9988_v42  ;;  %2484 = vmatpush2.msra.mxu0 %v1492_v49  ;;  %2549 = vmatpush2.msra.mxu1 %v1677_v47  ;;  %v1349_v31 = vsel %vm1348_vm14, %v1345_v8, %v1347_v36  ;;  %v9990_v51 = vrot.slane %v6440_v46, %v6745_v34 }
 0x18f   :  { %2485 = vmatprep.subr.mxu0 %v1407_v0  ;;  %2550 = vmatprep.subr.mxu1 %v1617_v58  ;;  %v1393_v50 = vrot.slane %v9979_v62, %v6745_v34  ;;  %v1555_v38 = vmul.f32 %v1536_v57, %v7136_v37  ;;  %v1494_v4 = vmul.f32 %v1475_v22, %v1435_v9 }
 0x190   :  { %v1556_v11 = vmul.f32 %v9990_v51, %v9989_v52  ;;  %v1356_v39 = vsel %vm1348_vm14, %v1347_v36, %v9991_v35  ;;  %2486 = vmatpush2.msra.mxu0 %v1406_v24  ;;  %2551 = vmatpush2.msra.mxu1 %v1616_v21  ;;  %v1495_v5 = vmul.f32 %v1479_v53, %v1442_v28 }
 0x191   :  { %2488 = vmatmul.mubr.f32.vlgmr.msra.gmra.mxu0 %v9992_v55  ;;  %v1408_v30 = vmul.f32 %v1389_v18, %v1349_v31  ;;  %v1409_v46 = vmul.f32 %v1393_v50, %v1356_v39 }
 0x192   :  { %2552 = vmatprep.subr.mxu1 %v1556_v11 }
 0x193   :  { %2553 = vmatpush2.msra.mxu1 %v1555_v38 }
 0x194   :  { %2554 = vmatprep.subr.mxu1 %v1495_v5  ;;  %v5283_v5 = vld [vmem:[%s9606_s2 + $0x47] ss:$8 sm:$0xf] }
 0x195   :  { %2555 = vmatpush2.msra.mxu1 %v1494_v4 }
 0x196   :  { %2556 = vmatprep.subr.mxu1 %v1409_v46 }
 0x197   :  { %2557 = vmatpush2.msra.mxu1 %v1408_v30  ;;  %v5284_v30 = vld [vmem:[%s9606_s2 + $0x47] ss:$8 sm:$0xf0] }
 0x198   :  { %2559 = vmatmul.mubr.f32.vlgmr.msra.gmra.mxu1 %v9992_v55 }
 0x1ea   :  { %v2347_v37 = vpop.f32.mrf.mxu0 }
 0x1eb   :  { %v2565_v60 = vmul.f32 %v2347_v37, %v2347_v37 }
 0x1ec   :  { %v2349_v32 = vpop.f32.mrf.mxu0 }
 0x1ed   :  { %v2566_v12 = vmul.f32 %v2349_v32, %v2349_v32  ;;  %v2573_v29 = vadd.f32 %v2349_v32, %v2347_v37 }
 0x1ef   :  { %v2578_v56 = vadd.f32 %v2566_v12, %v2565_v60  ;;  %v9995_v60 = vld [vmem:[#allocation5_spill] sm:$0xff] }
 0x1fa   :  { %v2418_v15 = vpop.f32.mrf.mxu1 }
 0x1fb   :  { %v2567_v13 = vmul.f32 %v2418_v15, %v2418_v15  ;;  %v2574_v6 = vadd.f32 %v2573_v29, %v2418_v15  ;;  %v5281_v29 = vld [vmem:[%s9606_s2 + $0x46] ss:$8 sm:$0xf] }
 0x1fc   :  { %v2420_v8 = vpop.f32.mrf.mxu1 }
 0x1fd   :  { %v2579_v63 = vadd.f32 %v2578_v56, %v2567_v13  ;;  %v2568_v62 = vmul.f32 %v2420_v8, %v2420_v8  ;;  %v2575_v43 = vadd.f32 %v2574_v6, %v2420_v8 }
 0x1ff   :  { %2576 = vadd.xlane.f32.xlu0 %v2575_v43  ;;  %v2580_v19 = vadd.f32 %v2579_v63, %v2568_v62  ;;  %v9996_v63 = vld [vmem:[#allocation4_spill] sm:$0xff] }
 0x201   :  { %2581 = vadd.xlane.f32.xlu1 %v2580_v19 }
 0x251   :  { %v7281_v59 = vpop.f32.mrf.mxu0 }
 0x252   :  { %v2569_v26 = vmul.f32 %v7281_v59, %v7281_v59 }
 0x253   :  { %v7285_v3 = vpop.f32.mrf.mxu0 }
 0x254   :  { %v2570_v57 = vmul.f32 %v7285_v3, %v7285_v3  ;;  %v2598_v41 = vadd.f32 %v7285_v3, %v7281_v59 }
 0x256   :  { %v2603_v48 = vadd.f32 %v2570_v57, %v2569_v26 }
 0x258   :  { %v7291_v33 = vpop.f32.mrf.mxu1 }
 0x259   :  { %v2571_v23 = vmul.f32 %v7291_v33, %v7291_v33  ;;  %v2599_v25 = vadd.f32 %v2598_v41, %v7291_v33 }
 0x25a   :  { %v7296_v1 = vpop.f32.mrf.mxu1 }
 0x25b   :  { %v2604_v54 = vadd.f32 %v2603_v48, %v2571_v23  ;;  %v2572_v44 = vmul.f32 %v7296_v1, %v7296_v1  ;;  %v2600_v40 = vadd.f32 %v2599_v25, %v7296_v1  ;;  %v5279_v23 = vld [vmem:[%s9606_s2 + $0x44] ss:$8 sm:$0xf] }
 0x25c   :  { %v5280_v25 = vld [vmem:[%s9606_s2 + $0x44] ss:$8 sm:$0xf0] }
 0x25d   :  { %2601 = vadd.xlane.f32.xlu0 %v2600_v40  ;;  %v2605_v17 = vadd.f32 %v2604_v54, %v2572_v44 }
 0x261   :  { %2606 = vadd.xlane.f32.xlu0 %v2605_v17 }
 0x288   :  { %v2577_v27 = vpop.xlane.xlu0 %2576 }
 0x289   :  { %v2583_v0 = vmul.f32 0.001953125, %v2577_v27 }
 0x28a   :  { %v2582_v20 = vpop.xlane.xlu1 %2581 }
 0x28b   :  { %v2585_v45 = vmul.f32 %v2583_v0, %v2583_v0  ;;  %v2584_v58 = vmul.f32 0.001953125, %v2582_v20  ;;  %v2589_v22 = vsub.f32 %v2349_v32, %v2583_v0  ;;  %v2590_v9 = vsub.f32 %v2418_v15, %v2583_v0  ;;  %v5282_v15 = vld [vmem:[%s9606_s2 + $0x46] ss:$8 sm:$0xf0] }
 0x28c   :  { %v2588_v36 = vsub.f32 %v2347_v37, %v2583_v0  ;;  %v2591_v31 = vsub.f32 %v2420_v8, %v2583_v0  ;;  %v7429_v37 = vor.u32 %v5284_v30, %v5283_v5  ;;  %v7454_v43 = vor.u32 %v5282_v15, %v5281_v29 }
 0x28d   :  { %v2586_v16 = vsub.f32 %v2584_v58, %v2585_v45  ;;  %v7486_v0 = vor.u32 %v5280_v25, %v5279_v23 }
 0x28e   :  { %v3852_v12 = vrot.slane %v7429_v37, %v9995_v60  ;;  %v3848_v62 = vrot.slane %v7429_v37, %v9996_v63  ;;  %9997 = vst [vmem:[#allocation15_spill] sm:$0xff] %v7454_v43  ;;  %v3768_v48 = vrot.slane %v7454_v43, %v9995_v60  ;;  %v3764_v27 = vrot.slane %v7454_v43, %v9996_v63 }
 0x28f   :  { %v2587_v47 = vmax.f32 %v2586_v16, 0.0  ;;  %9999 = vst [vmem:[#allocation17_spill] sm:$0xff] %v7486_v0 }
 0x291   :  { %v2592_v49 = vadd.f32 1e-05, %v2587_v47 }
 0x293   :  { %5333 = vrsqrt.f32 %v2592_v49 }
 0x2a0   :  { %v5334_v18 = vpop.eup %5333 }
 0x2a1   :  { %v2595_v53 = vmul.f32 %v5334_v18, %v2589_v22  ;;  %v2596_v21 = vmul.f32 %v5334_v18, %v2590_v9  ;;  %v2594_v24 = vmul.f32 %v5334_v18, %v2588_v36  ;;  %v2597_v52 = vmul.f32 %v5334_v18, %v2591_v31 }
 0x2a2   :  { %v3676_v22 = vrot.slane %v7486_v0, %v9995_v60 }
 0x2a3   :  { %v7301_v42 = vmax.f32 %v2595_v53, 0.0  ;;  %v7303_v28 = vmax.f32 %v2596_v21, 0.0  ;;  %v7309_v51 = vmax.f32 %v2594_v24, 0.0  ;;  %v7315_v11 = vmax.f32 %v2597_v52, 0.0 }
 0x2a5   :  { %9993 = vst [vmem:[#allocation19_spill] sm:$0xff] %v7303_v28  ;;  %3821 = vrot.lane.b32.xlu0 %v7303_v28, %s5354_s16  ;;  %3819 = vrot.lane.b32.xlu1 %v7301_v42, %s5354_s16  ;;  %9994 = vst [vmem:[#allocation11_spill] sm:$0xff] %v7315_v11 }
 0x2a9   :  { %3737 = vrot.lane.b32.xlu0 %v7303_v28, %s5355_s19  ;;  %3817 = vrot.lane.b32.xlu1 %v7309_v51, %s5354_s16 }
 0x2ad   :  { %3823 = vrot.lane.b32.xlu0 %v7315_v11, %s5354_s16  ;;  %3735 = vrot.lane.b32.xlu1 %v7301_v42, %s5355_s19 }
 0x2b1   :  { %3641 = vrot.lane.b32.xlu0 %v7309_v51, %s5356_s24  ;;  %3733 = vrot.lane.b32.xlu1 %v7309_v51, %s5355_s19 }
 0x2b5   :  { %3739 = vrot.lane.b32.xlu0 %v7315_v11, %s5355_s19  ;;  %3643 = vrot.lane.b32.xlu1 %v7301_v42, %s5356_s24 }
 0x2b9   :  { %3559 = vrot.lane.b32.xlu0 %v7301_v42, %s5357_s27  ;;  %3557 = vrot.lane.b32.xlu1 %v7309_v51, %s5357_s27 }
 0x2bd   :  { %3473 = vrot.lane.b32.xlu0 %v7309_v51, %s5358_s28  ;;  %3475 = vrot.lane.b32.xlu1 %v7301_v42, %s5358_s28 }
 0x2c1   :  { %3645 = vrot.lane.b32.xlu0 %v7303_v28, %s5356_s24  ;;  %3647 = vrot.lane.b32.xlu1 %v7315_v11, %s5356_s24 }
 0x2c5   :  { %3391 = vrot.lane.b32.xlu0 %v7301_v42, %s5359_s29  ;;  %3389 = vrot.lane.b32.xlu1 %v7309_v51, %s5359_s29 }
 0x2c9   :  { %3563 = vrot.lane.b32.xlu0 %v7315_v11, %s5357_s27  ;;  %3561 = vrot.lane.b32.xlu1 %v7303_v28, %s5357_s27 }
 0x2cd   :  { %3305 = vrot.lane.b32.xlu0 %v7309_v51, %s5360_s30  ;;  %3307 = vrot.lane.b32.xlu1 %v7301_v42, %s5360_s30 }
 0x2d1   :  { %3477 = vrot.lane.b32.xlu0 %v7303_v28, %s5358_s28  ;;  %3479 = vrot.lane.b32.xlu1 %v7315_v11, %s5358_s28 }
 0x2d5   :  { %3223 = vrot.lane.b32.xlu0 %v7301_v42, %s5361_s4  ;;  %3221 = vrot.lane.b32.xlu1 %v7309_v51, %s5361_s4 }
 0x2d9   :  { %3395 = vrot.lane.b32.xlu0 %v7315_v11, %s5359_s29  ;;  %3393 = vrot.lane.b32.xlu1 %v7303_v28, %s5359_s29 }
 0x2dd   :  { %3137 = vrot.lane.b32.xlu0 %v7309_v51, %s5362_s5  ;;  %3139 = vrot.lane.b32.xlu1 %v7301_v42, %s5362_s5 }
 0x2e1   :  { %3309 = vrot.lane.b32.xlu0 %v7303_v28, %s5360_s30  ;;  %3311 = vrot.lane.b32.xlu1 %v7315_v11, %s5360_s30 }
 0x2e5   :  { %3055 = vrot.lane.b32.xlu0 %v7301_v42, %s5363_s6  ;;  %3053 = vrot.lane.b32.xlu1 %v7309_v51, %s5363_s6 }
 0x2e6   :  { %v2602_v50 = vpop.xlane.xlu0 %2601 }
 0x2e7   :  { %v7405_v4 = vmul.f32 0.001953125, %v2602_v50 }
 0x2e9   :  { %3227 = vrot.lane.b32.xlu0 %v7315_v11, %s5361_s4  ;;  %3225 = vrot.lane.b32.xlu1 %v7303_v28, %s5361_s4  ;;  %v2610_v35 = vmul.f32 %v7405_v4, %v7405_v4  ;;  %v2616_v47 = vsub.f32 %v7296_v1, %v7405_v4  ;;  %v2613_v9 = vsub.f32 %v7281_v59, %v7405_v4 }
 0x2ea   :  { %v2607_v38 = vpop.xlane.xlu0 %2606  ;;  %v2614_v23 = vsub.f32 %v7285_v3, %v7405_v4  ;;  %v2615_v25 = vsub.f32 %v7291_v33, %v7405_v4 }
 0x2eb   :  { %v2609_v39 = vmul.f32 0.001953125, %v2607_v38 }
 0x2ed   :  { %2969 = vrot.lane.b32.xlu0 %v7309_v51, %s5364_s7  ;;  %2971 = vrot.lane.b32.xlu1 %v7301_v42, %s5364_s7  ;;  %v2611_v55 = vsub.f32 %v2609_v39, %v2610_v35 }
 0x2ef   :  { %v2612_v46 = vmax.f32 %v2611_v55, 0.0 }
 0x2f1   :  { %3141 = vrot.lane.b32.xlu0 %v7303_v28, %s5362_s5  ;;  %3143 = vrot.lane.b32.xlu1 %v7315_v11, %s5362_s5  ;;  %v2617_v32 = vadd.f32 1e-05, %v2612_v46 }
 0x2f3   :  { %5335 = vrsqrt.f32 %v2617_v32 }
 0x2f5   :  { %2887 = vrot.lane.b32.xlu0 %v7301_v42, %s5365_s8  ;;  %2885 = vrot.lane.b32.xlu1 %v7309_v51, %s5365_s8 }
 0x2f9   :  { %3059 = vrot.lane.b32.xlu0 %v7315_v11, %s5363_s6  ;;  %3057 = vrot.lane.b32.xlu1 %v7303_v28, %s5363_s6 }
 0x2fd   :  { %2801 = vrot.lane.b32.xlu0 %v7309_v51, %s5366_s13  ;;  %2803 = vrot.lane.b32.xlu1 %v7301_v42, %s5366_s13 }
 0x300   :  { %v7494_v58 = vpop.eup %5335 }
 0x301   :  { %2973 = vrot.lane.b32.xlu0 %v7303_v28, %s5364_s7  ;;  %2975 = vrot.lane.b32.xlu1 %v7315_v11, %s5364_s7  ;;  %v2622_v18 = vmul.f32 %v7494_v58, %v2616_v47  ;;  %v2619_v1 = vmul.f32 %v7494_v58, %v2613_v9 }
 0x303   :  { %v7525_v24 = vmax.f32 %v2622_v18, 0.0  ;;  %v7531_v50 = vmax.f32 %v2619_v1, 0.0 }
 0x305   :  { %2719 = vrot.lane.b32.xlu0 %v7301_v42, %s5367_s20  ;;  %2717 = vrot.lane.b32.xlu1 %v7309_v51, %s5367_s20  ;;  %10001 = vst [vmem:[#allocation16_spill] sm:$0xff] %v7525_v24  ;;  %10002 = vst [vmem:[#allocation20_spill] sm:$0xff] %v7531_v50 }
 0x309   :  { %2891 = vrot.lane.b32.xlu0 %v7315_v11, %s5365_s8  ;;  %2889 = vrot.lane.b32.xlu1 %v7303_v28, %s5365_s8 }
 0x30d   :  { %2633 = vrot.lane.b32.xlu0 %v7309_v51, %s5368_s26  ;;  %2635 = vrot.lane.b32.xlu1 %v7301_v42, %s5368_s26 }
 0x311   :  { %2805 = vrot.lane.b32.xlu0 %v7303_v28, %s5366_s13  ;;  %2807 = vrot.lane.b32.xlu1 %v7315_v11, %s5366_s13 }
 0x315   :  { %2723 = vrot.lane.b32.xlu0 %v7315_v11, %s5367_s20  ;;  %2721 = vrot.lane.b32.xlu1 %v7303_v28, %s5367_s20 }
 0x317   :  { %v7445_v56 = vpop.permute.xlu0 %3821  ;;  %v3820_v13 = vpop.permute.xlu1 %3819 }
 0x318   :  { %v3838_v6 = vsel %vm1262_vm0, %v3820_v13, %v7445_v56 }
 0x319   :  { %2639 = vrot.lane.b32.xlu0 %v7315_v11, %s5368_s26  ;;  %v3886_v8 = vmul.f32 %v3852_v12, %v3838_v6  ;;  %2637 = vrot.lane.b32.xlu1 %v7303_v28, %s5368_s26 }
 0x31b   :  { %v7458_v19 = vpop.permute.xlu0 %3737  ;;  %4836 = vmatprep.subr.mxu0 %v3886_v8  ;;  %v7460_v26 = vpop.permute.xlu1 %3817 }
 0x31c   :  { %9998 = vst [vmem:[#allocation23_spill] sm:$0xff] %v7460_v26  ;;  %v3839_v57 = vsel %vm1262_vm0, %v7460_v26, %v3820_v13 }
 0x31d   :  { %v3885_v41 = vmul.f32 %v3848_v62, %v3839_v57  ;;  %3989 = vrot.lane.b32.xlu0 %v7303_v28, %s5369_s14  ;;  %3987 = vrot.lane.b32.xlu1 %v7301_v42, %s5369_s14 }
 0x31f   :  { %v7477_v54 = vpop.permute.xlu0 %3823  ;;  %4837 = vmatpush1.msra.mxu0 %v3885_v41  ;;  %v3736_v44 = vpop.permute.xlu1 %3735 }
 0x320   :  { %v3754_v40 = vsel %vm1176_vm1, %v3736_v44, %v7458_v19 }
 0x321   :  { %3905 = vrot.lane.b32.xlu0 %v7303_v28, %s5370_s25  ;;  %v3802_v17 = vmul.f32 %v3768_v48, %v3754_v40  ;;  %3985 = vrot.lane.b32.xlu1 %v7309_v51, %s5369_s14 }
 0x323   :  { %v7490_v20 = vpop.permute.xlu0 %3641  ;;  %4838 = vmatprep.subr.mxu0 %v3802_v17  ;;  %v7492_v45 = vpop.permute.xlu1 %3733  ;;  %v2621_v17 = vmul.f32 %v7494_v58, %v2615_v25 }
 0x324   :  { %10000 = vst [vmem:[#allocation26_spill] sm:$0xff] %v7492_v45  ;;  %v3755_v16 = vsel %vm1176_vm1, %v7492_v45, %v3736_v44  ;;  %v2620_v44 = vmul.f32 %v7494_v58, %v2614_v23  ;;  %v2632_v58 = vld [vmem:[%s9607_s1 + $0x18] sm:$0xff] }
 0x325   :  { %v3801_v49 = vmul.f32 %v3764_v27, %v3755_v16  ;;  %3991 = vrot.lane.b32.xlu0 %v7315_v11, %s5369_s14  ;;  %3903 = vrot.lane.b32.xlu1 %v7301_v42, %s5370_s25  ;;  %v7635_v4 = vmax.f32 %v2621_v17, 0.0 }
 0x326   :  { %v7631_v3 = vmax.f32 %v2620_v44, 0.0  ;;  %5307 = vmatprep.mubr.msk.f32.mxu0 %vm2277_vm7, %v2632_v58  ;;  %5308 = vmatprep.mubr.msk.f32.mxu1 %vm2277_vm7, %v2632_v58 }
 0x327   :  { %v7510_v36 = vpop.permute.xlu0 %3739  ;;  %4839 = vmatpush1.msra.mxu0 %v3801_v49  ;;  %v7512_v53 = vpop.permute.xlu1 %3643  ;;  %10015 = vst [vmem:[#allocation40_spill] sm:$0xff] %v7635_v4 }
 0x328   :  { %v3663_v21 = vsel %vm1082_vm2, %v7490_v20, %v7512_v53  ;;  %4840 = vmatprep.subr.mxu0 %v7301_v42  ;;  %10013 = vst [vmem:[#allocation37_spill] sm:$0xff] %v7631_v3 }
 0x329   :  { %3907 = vrot.lane.b32.xlu0 %v7315_v11, %s5370_s25  ;;  %4841 = vmatpush1.msra.mxu0 %v7309_v51  ;;  %v3710_v59 = vmul.f32 %v3676_v22, %v3663_v21  ;;  %v2657_v11 = vld [vmem:[%s9606_s2] ss:$8 sm:$0xf] }
 0x32a   :  { %3901 = vrot.lane.b32.xlu1 %v7309_v51, %s5370_s25 }
 0x32b   :  { %v7527_v31 = vpop.permute.xlu0 %3559  ;;  %4842 = vmatprep.subr.mxu0 %v3710_v59  ;;  %v7529_v52 = vpop.permute.xlu1 %3557 }
 0x32d   :  { %3655 = vrot.lane.b32.xlu0 %v7525_v24, %s5356_s24 }
 0x32e   :  { %3825 = vrot.lane.b32.xlu1 %v7531_v50, %s5354_s16 }
 0x32f   :  { %v7537_v42 = vpop.permute.xlu0 %3473  ;;  %v7539_v38 = vpop.permute.xlu1 %3475 }
 0x331   :  { %3487 = vrot.lane.b32.xlu0 %v7525_v24, %s5358_s28 }
 0x332   :  { %3741 = vrot.lane.b32.xlu1 %v7531_v50, %s5355_s19 }
 0x333   :  { %v7545_v51 = vpop.permute.xlu0 %3645  ;;  %v7547_v35 = vpop.permute.xlu1 %3647 }
 0x334   :  { %10003 = vst [vmem:[#allocation31_spill] sm:$0xff] %v7547_v35 }
 0x335   :  { %3319 = vrot.lane.b32.xlu0 %v7525_v24, %s5360_s30 }
 0x336   :  { %3571 = vrot.lane.b32.xlu1 %v7525_v24, %s5357_s27 }
 0x337   :  { %v7553_v39 = vpop.permute.xlu0 %3391  ;;  %v7555_v55 = vpop.permute.xlu1 %3389 }
 0x339   :  { %3151 = vrot.lane.b32.xlu0 %v7525_v24, %s5362_s5 }
 0x33a   :  { %3403 = vrot.lane.b32.xlu1 %v7525_v24, %s5359_s29 }
 0x33b   :  { %v7561_v5 = vpop.permute.xlu0 %3563  ;;  %v7563_v30 = vpop.permute.xlu1 %3561 }
 0x33c   :  { %10004 = vst [vmem:[#allocation18_spill] sm:$0xff] %v7561_v5 }
 0x33d   :  { %2983 = vrot.lane.b32.xlu0 %v7525_v24, %s5364_s7 }
 0x33e   :  { %3235 = vrot.lane.b32.xlu1 %v7525_v24, %s5361_s4 }
 0x33f   :  { %v7569_v46 = vpop.permute.xlu0 %3305  ;;  %v7571_v32 = vpop.permute.xlu1 %3307 }
 0x341   :  { %2815 = vrot.lane.b32.xlu0 %v7525_v24, %s5366_s13 }
 0x342   :  { %3067 = vrot.lane.b32.xlu1 %v7525_v24, %s5363_s6 }
 0x343   :  { %v7577_v12 = vpop.permute.xlu0 %3477  ;;  %v7579_v29 = vpop.permute.xlu1 %3479 }
 0x344   :  { %10005 = vst [vmem:[#allocation22_spill] sm:$0xff] %v7579_v29 }
 0x345   :  { %2647 = vrot.lane.b32.xlu0 %v7525_v24, %s5368_s26 }
 0x346   :  { %2899 = vrot.lane.b32.xlu1 %v7525_v24, %s5365_s8 }
 0x347   :  { %v7585_v15 = vpop.permute.xlu0 %3223  ;;  %v7587_v13 = vpop.permute.xlu1 %3221 }
 0x349   :  { %3229 = vrot.lane.b32.xlu0 %v7531_v50, %s5361_s4 }
 0x34a   :  { %2731 = vrot.lane.b32.xlu1 %v7525_v24, %s5367_s20 }
 0x34b   :  { %v7593_v6 = vpop.permute.xlu0 %3395  ;;  %v7595_v8 = vpop.permute.xlu1 %3393 }
 0x34c   :  { %10006 = vst [vmem:[#allocation27_spill] sm:$0xff] %v7593_v6 }
 0x34d   :  { %3061 = vrot.lane.b32.xlu0 %v7531_v50, %s5363_s6 }
 0x34e   :  { %3313 = vrot.lane.b32.xlu1 %v7531_v50, %s5360_s30 }
 0x34f   :  { %v7601_v62 = vpop.permute.xlu0 %3137  ;;  %v7603_v57 = vpop.permute.xlu1 %3139 }
 0x350   :  { %10007 = vst [vmem:[#allocation21_spill] sm:$0xff] %v7601_v62  ;;  %10008 = vst [vmem:[#allocation24_spill] sm:$0xff] %v7603_v57  ;;  %v5257_v62 = vld [vmem:[%s9606_s2 + $0x1] ss:$8 sm:$0xf] }
 0x351   :  { %2893 = vrot.lane.b32.xlu0 %v7531_v50, %s5365_s8 }
 0x352   :  { %3145 = vrot.lane.b32.xlu1 %v7531_v50, %s5362_s5 }
 0x353   :  { %v7609_v41 = vpop.permute.xlu0 %3309  ;;  %v7611_v48 = vpop.permute.xlu1 %3311 }
 0x354   :  { %10009 = vst [vmem:[#allocation30_spill] sm:$0xff] %v7609_v41  ;;  %10010 = vst [vmem:[#allocation28_spill] sm:$0xff] %v7611_v48  ;;  %v5294_v41 = vld [vmem:[%s9606_s2 + $0x84] ss:$8 sm:$0xf0] }
 0x355   :  { %2725 = vrot.lane.b32.xlu0 %v7531_v50, %s5367_s20 }
 0x356   :  { %2977 = vrot.lane.b32.xlu1 %v7531_v50, %s5364_s7 }
 0x357   :  { %v7622_v40 = vpop.permute.xlu0 %3055  ;;  %v7625_v27 = vpop.permute.xlu1 %3053 }
 0x358   :  { %10011 = vst [vmem:[#allocation34_spill] sm:$0xff] %v7622_v40  ;;  %10012 = vst [vmem:[#allocation32_spill] sm:$0xff] %v7625_v27 }
 0x359   :  { %2641 = vrot.lane.b32.xlu0 %v7531_v50, %s5368_s26 }
 0x35a   :  { %2809 = vrot.lane.b32.xlu1 %v7531_v50, %s5366_s13 }
 0x35b   :  { %v7633_v33 = vpop.permute.xlu0 %3227  ;;  %v7637_v16 = vpop.permute.xlu1 %3225 }
 0x35c   :  { %10014 = vst [vmem:[#allocation35_spill] sm:$0xff] %v7633_v33  ;;  %10016 = vst [vmem:[#allocation38_spill] sm:$0xff] %v7637_v16  ;;  %v5297_v33 = vld [vmem:[%s9606_s2 + $0x86] ss:$8 sm:$0xf] }
 0x35d   :  { %3827 = vrot.lane.b32.xlu0 %v7631_v3, %s5354_s16 }
 0x35e   :  { %3829 = vrot.lane.b32.xlu1 %v7635_v4, %s5354_s16 }
 0x35f   :  { %v7647_v47 = vpop.permute.xlu0 %2969  ;;  %v7650_v49 = vpop.permute.xlu1 %2971 }
 0x360   :  { %10017 = vst [vmem:[#allocation43_spill] sm:$0xff] %v7647_v47  ;;  %10018 = vst [vmem:[#allocation41_spill] sm:$0xff] %v7650_v49  ;;  %v10040_v47 = vld [vmem:[#allocation9_spill] sm:$0xff] }
 0x361   :  { %3743 = vrot.lane.b32.xlu0 %v7631_v3, %s5355_s19 }
 0x362   :  { %3993 = vrot.lane.b32.xlu1 %v7531_v50, %s5369_s14 }
 0x363   :  { %v7656_v22 = vpop.permute.xlu0 %3141  ;;  %v7658_v9 = vpop.permute.xlu1 %3143 }
 0x364   :  { %10019 = vst [vmem:[#allocation47_spill] sm:$0xff] %v7656_v22  ;;  %10020 = vst [vmem:[#allocation29_spill] sm:$0xff] %v7658_v9  ;;  %v5267_v22 = vld [vmem:[%s9606_s2 + $0x6] ss:$8 sm:$0xf] }
 0x365   :  { %3831 = vrot.lane.b32.xlu0 %v7525_v24, %s5354_s16 }
 0x366   :  { %3745 = vrot.lane.b32.xlu1 %v7635_v4, %s5355_s19 }
 0x367   :  { %v7664_v18 = vpop.permute.xlu0 %2887  ;;  %v7666_v1 = vpop.permute.xlu1 %2885 }
 0x368   :  { %10021 = vst [vmem:[#allocation33_spill] sm:$0xff] %v7664_v18  ;;  %10022 = vst [vmem:[#allocation44_spill] sm:$0xff] %v7666_v1  ;;  %v7764_v1 = vor.u32 %v5276_v7, %v5275_v14  ;;  %v5301_v18 = vld [vmem:[%s9606_s2 + $0xc0] ss:$8 sm:$0xf] }
 0x369   :  { %3651 = vrot.lane.b32.xlu0 %v7631_v3, %s5356_s24  ;;  %v5268_v7 = vld [vmem:[%s9606_s2 + $0x6] ss:$8 sm:$0xf0] }
 0x36a   :  { %3909 = vrot.lane.b32.xlu1 %v7531_v50, %s5370_s25  ;;  %10036 = vst [vmem:[#allocation25_spill] sm:$0xff] %v7764_v1 }
 0x36b   :  { %v7672_v21 = vpop.permute.xlu0 %3059  ;;  %v7674_v59 = vpop.permute.xlu1 %3057 }
 0x36c   :  { %10023 = vst [vmem:[#allocation36_spill] sm:$0xff] %v7672_v21  ;;  %10024 = vst [vmem:[#allocation39_spill] sm:$0xff] %v7674_v59  ;;  %v5269_v21 = vld [vmem:[%s9606_s2 + $0x7] ss:$8 sm:$0xf] }
 0x36d   :  { %3565 = vrot.lane.b32.xlu0 %v7531_v50, %s5357_s27  ;;  %v5270_v59 = vld [vmem:[%s9606_s2 + $0x7] ss:$8 sm:$0xf0] }
 0x36e   :  { %3649 = vrot.lane.b32.xlu1 %v7531_v50, %s5356_s24  ;;  %v7802_v49 = vor.u32 %v5270_v59, %v5269_v21  ;;  %v10046_v59 = vld [vmem:[#allocation10_spill] sm:$0xff] }
 0x36f   :  { %v7680_v23 = vpop.permute.xlu0 %2801  ;;  %v7682_v25 = vpop.permute.xlu1 %2803 }
 0x370   :  { %10025 = vst [vmem:[#allocation48_spill] sm:$0xff] %v7680_v23  ;;  %10026 = vst [vmem:[#allocation50_spill] sm:$0xff] %v7682_v25  ;;  %v5304_v23 = vld [vmem:[%s9606_s2 + $0xc1] ss:$8 sm:$0xf0] }
 0x371   :  { %3481 = vrot.lane.b32.xlu0 %v7531_v50, %s5358_s28  ;;  %v5272_v25 = vld [vmem:[%s9606_s2 + $0x40] ss:$8 sm:$0xf0]  ;;  %10043 = vst [vmem:[#allocation55_spill] sm:$0xff] %v7802_v49 }
 0x372   :  { %3747 = vrot.lane.b32.xlu1 %v7525_v24, %s5355_s19 }
 0x373   :  { %v7688_v44 = vpop.permute.xlu0 %2973  ;;  %v7690_v17 = vpop.permute.xlu1 %2975 }
 0x374   :  { %10027 = vst [vmem:[#allocation56_spill] sm:$0xff] %v7688_v44  ;;  %10028 = vst [vmem:[#allocation42_spill] sm:$0xff] %v7690_v17  ;;  %v5306_v17 = vld [vmem:[%s9606_s2 + $0xc2] ss:$8 sm:$0xf0] }
 0x375   :  { %3653 = vrot.lane.b32.xlu0 %v7635_v4, %s5356_s24 }
 0x376   :  { %3567 = vrot.lane.b32.xlu1 %v7631_v3, %s5357_s27 }
 0x377   :  { %v7696_v58 = vpop.permute.xlu0 %2719  ;;  %v7698_v45 = vpop.permute.xlu1 %2717 }
 0x378   :  { %10029 = vst [vmem:[#allocation45_spill] sm:$0xff] %v7696_v58  ;;  %10030 = vst [vmem:[#allocation49_spill] sm:$0xff] %v7698_v45  ;;  %v5305_v58 = vld [vmem:[%s9606_s2 + $0xc2] ss:$8 sm:$0xf] }
 0x379   :  { %3399 = vrot.lane.b32.xlu0 %v7631_v3, %s5359_s29  ;;  %v7788_v16 = vor.u32 %v5306_v17, %v5305_v58  ;;  %v5265_v17 = vld [vmem:[%s9606_s2 + $0x5] ss:$8 sm:$0xf] }
 0x37a   :  { %3483 = vrot.lane.b32.xlu1 %v7631_v3, %s5358_s28  ;;  %v5266_v58 = vld [vmem:[%s9606_s2 + $0x5] ss:$8 sm:$0xf0] }
 0x37b   :  { %v7704_v26 = vpop.permute.xlu0 %2891  ;;  %v7706_v34 = vpop.permute.xlu1 %2889  ;;  %10041 = vst [vmem:[#allocation57_spill] sm:$0xff] %v7788_v16  ;;  %v7846_v40 = vor.u32 %v5266_v58, %v5265_v17  ;;  %v5262_v17 = vld [vmem:[%s9606_s2 + $0x3] ss:$8 sm:$0xf0] }
 0x37c   :  { %10031 = vst [vmem:[#allocation54_spill] sm:$0xff] %v7704_v26  ;;  %10032 = vst [vmem:[#allocation8_spill] sm:$0xff] %v7706_v34  ;;  %v5273_v34 = vld [vmem:[%s9606_s2 + $0x41] ss:$8 sm:$0xf] }
 0x37d   :  { %3315 = vrot.lane.b32.xlu0 %v7631_v3, %s5360_s30  ;;  %v5274_v26 = vld [vmem:[%s9606_s2 + $0x41] ss:$8 sm:$0xf0]  ;;  %10050 = vst [vmem:[#allocation60_spill] sm:$0xff] %v7846_v40 }
 0x37e   :  { %3397 = vrot.lane.b32.xlu1 %v7531_v50, %s5359_s29  ;;  %v5303_v50 = vld [vmem:[%s9606_s2 + $0xc1] ss:$8 sm:$0xf]  ;;  %v7774_v9 = vor.u32 %v5274_v26, %v5273_v34  ;;  %v5299_v34 = vld [vmem:[%s9606_s2 + $0x87] ss:$8 sm:$0xf] }
 0x37f   :  { %v7730_v45 = vpop.permute.xlu0 %2633  ;;  %v7738_v44 = vpop.permute.xlu1 %2635  ;;  %v5300_v26 = vld [vmem:[%s9606_s2 + $0x87] ss:$8 sm:$0xf0] }
 0x380   :  { %10033 = vst [vmem:[#allocation3_spill] sm:$0xff] %v7730_v45  ;;  %10034 = vst [vmem:[#allocation14_spill] sm:$0xff] %v7738_v44  ;;  %v5271_v45 = vld [vmem:[%s9606_s2 + $0x40] ss:$8 sm:$0xf]  ;;  %v7754_v44 = vor.u32 %v5278_v2, %v5277_v61  ;;  %v7844_v27 = vor.u32 %v5300_v26, %v5299_v34 }
 0x381   :  { %3231 = vrot.lane.b32.xlu0 %v7631_v3, %s5361_s4  ;;  %v5302_v2 = vld [vmem:[%s9606_s2 + $0xc0] ss:$8 sm:$0xf0]  ;;  %10038 = vst [vmem:[#allocation12_spill] sm:$0xff] %v7774_v9 }
 0x382   :  { %10035 = vst [vmem:[#allocation7_spill] sm:$0xff] %v7754_v44  ;;  %3569 = vrot.lane.b32.xlu1 %v7635_v4, %s5357_s27  ;;  %10049 = vst [vmem:[#allocation59_spill] sm:$0xff] %v7844_v27  ;;  %v5295_v34 = vld [vmem:[%s9606_s2 + $0x85] ss:$8 sm:$0xf]  ;;  %v10070_v27 = vrot.slane %v7429_v37, %v10040_v47 }
 0x383   :  { %v7772_v61 = vpop.permute.xlu0 %2805  ;;  %v7782_v14 = vpop.permute.xlu1 %2807  ;;  %v5296_v26 = vld [vmem:[%s9606_s2 + $0x85] ss:$8 sm:$0xf0] }
 0x384   :  { %10037 = vst [vmem:[#allocation52_spill] sm:$0xff] %v7772_v61  ;;  %10039 = vst [vmem:[#allocation53_spill] sm:$0xff] %v7782_v14  ;;  %v7798_v61 = vor.u32 %v5304_v23, %v5303_v50  ;;  %v7800_v14 = vor.u32 %v5272_v25, %v5271_v45  ;;  %v7816_v50 = vor.u32 %v5302_v2, %v5301_v18  ;;  %v5298_v18 = vld [vmem:[%s9606_s2 + $0x86] ss:$8 sm:$0xf0] }
 0x385   :  { %3147 = vrot.lane.b32.xlu0 %v7631_v3, %s5362_s5  ;;  %v7832_v2 = vor.u32 %v5268_v7, %v5267_v22  ;;  %v5263_v22 = vld [vmem:[%s9606_s2 + $0x4] ss:$8 sm:$0xf]  ;;  %v7876_v25 = vor.u32 %v5298_v18, %v5297_v33  ;;  %v5259_v18 = vld [vmem:[%s9606_s2 + $0x2] ss:$8 sm:$0xf]  ;;  %v7924_v28 = vor.u32 %v5296_v26, %v5295_v34 }
 0x386   :  { %10042 = vst [vmem:[#allocation51_spill] sm:$0xff] %v7800_v14  ;;  %3485 = vrot.lane.b32.xlu1 %v7635_v4, %s5358_s28  ;;  %10044 = vst [vmem:[#allocation5_spill] sm:$0xff] %v7816_v50  ;;  %v5264_v7 = vld [vmem:[%s9606_s2 + $0x4] ss:$8 sm:$0xf0] }
 0x387   :  { %v7818_v21 = vpop.permute.xlu0 %2723  ;;  %10047 = vst [vmem:[#allocation9_spill] sm:$0xff] %v7832_v2  ;;  %v7834_v45 = vpop.permute.xlu1 %2721  ;;  %10051 = vst [vmem:[#allocation61_spill] sm:$0xff] %v7876_v25  ;;  %v5260_v23 = vld [vmem:[%s9606_s2 + $0x2] ss:$8 sm:$0xf0]  ;;  %v7898_v48 = vor.u32 %v5264_v7, %v5263_v22  ;;  %v3495_v25 = vsel %vm910_vm4, %v7537_v42, %v7539_v38 }
 0x388   :  { %10045 = vst [vmem:[#allocation4_spill] sm:$0xff] %v7818_v21  ;;  %10048 = vst [vmem:[#allocation10_spill] sm:$0xff] %v7834_v45  ;;  %v5261_v45 = vld [vmem:[%s9606_s2 + $0x3] ss:$8 sm:$0xf]  ;;  %v7952_v57 = vor.u32 %v5260_v23, %v5259_v18 }
 0x389   :  { %3063 = vrot.lane.b32.xlu0 %v7631_v3, %s5363_s6  ;;  %10053 = vst [vmem:[#allocation63_spill] sm:$0xff] %v7898_v48  ;;  %v5293_v33 = vld [vmem:[%s9606_s2 + $0x84] ss:$8 sm:$0xf]  ;;  %v7946_v7 = vor.u32 %v5262_v17, %v5261_v45 }
 0x38a   :  { %3401 = vrot.lane.b32.xlu1 %v7635_v4, %s5359_s29  ;;  %v5258_v22 = vld [vmem:[%s9606_s2 + $0x1] ss:$8 sm:$0xf0]  ;;  %v5291_v26 = vld [vmem:[%s9606_s2 + $0x83] ss:$8 sm:$0xf]  ;;  %v7954_v34 = vor.u32 %v5294_v41, %v5293_v33 }
 0x38b   :  { %v7884_v58 = vpop.permute.xlu0 %2639  ;;  %10055 = vst [vmem:[#allocation65_spill] sm:$0xff] %v7946_v7  ;;  %10056 = vst [vmem:[#allocation66_spill] sm:$0xff] %v7952_v57  ;;  %v2658_v45 = vld [vmem:[%s9606_s2] ss:$8 sm:$0xf0]  ;;  %v7966_v6 = vor.u32 %v5258_v22, %v5257_v62 }
 0x38c   :  { %10052 = vst [vmem:[#allocation62_spill] sm:$0xff] %v7884_v58  ;;  %v7900_v58 = vpop.permute.xlu1 %2637  ;;  %v5289_v41 = vld [vmem:[%s9606_s2 + $0x82] ss:$8 sm:$0xf] }
 0x38d   :  { %10054 = vst [vmem:[#allocation64_spill] sm:$0xff] %v7900_v58  ;;  %2979 = vrot.lane.b32.xlu0 %v7631_v3, %s5364_s7  ;;  %v5292_v58 = vld [vmem:[%s9606_s2 + $0x83] ss:$8 sm:$0xf0]  ;;  %10058 = vst [vmem:[#allocation68_spill] sm:$0xff] %v7966_v6 }
 0x38e   :  { %3317 = vrot.lane.b32.xlu1 %v7635_v4, %s5360_s30  ;;  %v5290_v23 = vld [vmem:[%s9606_s2 + $0x82] ss:$8 sm:$0xf0]  ;;  %v5286_v21 = vld [vmem:[%s9606_s2 + $0x80] ss:$8 sm:$0xf0] }
 0x38f   :  { %v3990_v16 = vpop.permute.xlu0 %3989  ;;  %v8011_v62 = vor.u32 %v5290_v23, %v5289_v41  ;;  %v5285_v41 = vld [vmem:[%s9606_s2 + $0x80] ss:$8 sm:$0xf] }
 0x390   :  { %v7962_v17 = vpop.permute.xlu1 %3987  ;;  %v8076_v50 = vor.u32 %v5286_v21, %v5285_v41  ;;  %v3837_v21 = vsel %vm1262_vm0, %v7445_v56, %v7477_v54  ;;  %v3672_v56 = vrot.slane %v7486_v0, %v9996_v63  ;;  %v3579_v41 = vsel %vm996_vm3, %v7529_v52, %v7527_v31 }
 0x391   :  { %10057 = vst [vmem:[#allocation67_spill] sm:$0xff] %v7962_v17  ;;  %v7977_v33 = vsel %vm1434_vm12, %v7962_v17, %v3990_v16  ;;  %2895 = vrot.lane.b32.xlu0 %v7631_v3, %s5365_s8  ;;  %v7991_v17 = vor.u32 %v5292_v58, %v5291_v26 }
 0x392   :  { %10059 = vst [vmem:[#allocation69_spill] sm:$0xff] %v7977_v33  ;;  %3233 = vrot.lane.b32.xlu1 %v7635_v4, %s5361_s4  ;;  %v7999_v33 = vor.u32 %v2658_v45, %v2657_v11  ;;  %v5287_v11 = vld [vmem:[%s9606_s2 + $0x81] ss:$8 sm:$0xf]  ;;  %10066 = vst [vmem:[#allocation76_spill] sm:$0xff] %v8076_v50 }
 0x393   :  { %v8001_v22 = vpop.permute.xlu0 %3905  ;;  %v5288_v45 = vld [vmem:[%s9606_s2 + $0x81] ss:$8 sm:$0xf0] }
 0x394   :  { %10060 = vst [vmem:[#allocation70_spill] sm:$0xff] %v7999_v33  ;;  %10061 = vst [vmem:[#allocation71_spill] sm:$0xff] %v8001_v22  ;;  %v8019_v18 = vpop.permute.xlu1 %3985  ;;  %v8053_v23 = vor.u32 %v5288_v45, %v5287_v11  ;;  %v3753_v45 = vsel %vm1176_vm1, %v7458_v19, %v7510_v36  ;;  %v3860_v19 = vrot.slane %v7429_v37, %v10046_v59 }
 0x395   :  { %10062 = vst [vmem:[#allocation72_spill] sm:$0xff] %v8019_v18  ;;  %2811 = vrot.lane.b32.xlu0 %v7631_v3, %s5366_s13 }
 0x396   :  { %3149 = vrot.lane.b32.xlu1 %v7635_v4, %s5362_s5 }
 0x397   :  { %v8055_v18 = vpop.permute.xlu0 %3991 }
 0x398   :  { %10063 = vst [vmem:[#allocation73_spill] sm:$0xff] %v8055_v18  ;;  %v8066_v24 = vsel %vm1434_vm12, %v3990_v16, %v8055_v18  ;;  %v8068_v58 = vpop.permute.xlu1 %3903 }
 0x399   :  { %10064 = vst [vmem:[#allocation74_spill] sm:$0xff] %v8066_v24  ;;  %10065 = vst [vmem:[#allocation75_spill] sm:$0xff] %v8068_v58  ;;  %2727 = vrot.lane.b32.xlu0 %v7631_v3, %s5367_s20 }
 0x39a   :  { %3065 = vrot.lane.b32.xlu1 %v7635_v4, %s5363_s6 }
 0x39b   :  { %v8100_v11 = vpop.permute.xlu0 %3907 }
 0x39c   :  { %10067 = vst [vmem:[#allocation77_spill] sm:$0xff] %v8100_v11  ;;  %v8114_v26 = vsel %vm1348_vm14, %v8001_v22, %v8100_v11  ;;  %v8116_v16 = vpop.permute.xlu1 %3901  ;;  %v10071_v11 = vrot.slane %v7454_v43, %v10040_v47 }
 0x39d   :  { %10068 = vst [vmem:[#allocation78_spill] sm:$0xff] %v8114_v26  ;;  %10069 = vst [vmem:[#allocation79_spill] sm:$0xff] %v8116_v16  ;;  %2643 = vrot.lane.b32.xlu0 %v7631_v3, %s5368_s26  ;;  %v3887_v26 = vmul.f32 %v10070_v27, %v3837_v21  ;;  %v3776_v27 = vrot.slane %v7454_v43, %v10046_v59  ;;  %v3588_v16 = vrot.slane %v7754_v44, %v9996_v63 }
 0x39e   :  { %2981 = vrot.lane.b32.xlu1 %v7635_v4, %s5364_s7  ;;  %v3803_v24 = vmul.f32 %v10071_v11, %v3753_v45  ;;  %v3662_v11 = vsel %vm1082_vm2, %v7512_v53, %v7545_v51  ;;  %v3661_v45 = vsel %vm1082_vm2, %v7545_v51, %v7547_v35  ;;  %v10074_v53 = vrot.slane %v7754_v44, %v9995_v60 }
 0x39f   :  { %v8144_v18 = vpop.permute.xlu0 %3655 }
 0x3a0   :  { %10072 = vst [vmem:[#allocation80_spill] sm:$0xff] %v8144_v18  ;;  %v3664_v21 = vsel %vm1082_vm2, %v8144_v18, %v7490_v20  ;;  %v8168_v58 = vpop.permute.xlu1 %3825  ;;  %v3626_v51 = vmul.f32 %v10074_v53, %v3579_v41  ;;  %v3411_v20 = vsel %vm824_vm5, %v7555_v55, %v7553_v39  ;;  %v10075_v41 = vrot.slane %v7486_v0, %v10040_v47 }
 0x3a1   :  { %10073 = vst [vmem:[#allocation81_spill] sm:$0xff] %v8168_v58  ;;  %v3709_v22 = vmul.f32 %v3672_v56, %v3664_v21  ;;  %v3836_v50 = vsel %vm1262_vm0, %v7477_v54, %v8168_v58  ;;  %2729 = vrot.lane.b32.xlu0 %v7635_v4, %s5367_s20  ;;  %v10077_v18 = vrot.slane %v7486_v0, %v10046_v59 }
 0x3a2   :  { %v3888_v56 = vmul.f32 %v3860_v19, %v3836_v50  ;;  %2897 = vrot.lane.b32.xlu1 %v7635_v4, %s5365_s8  ;;  %v3711_v53 = vmul.f32 %v10075_v41, %v3662_v11  ;;  %v10078_v19 = vrot.slane %v7764_v1, %v9995_v60  ;;  %v3577_v21 = vsel %vm996_vm3, %v7563_v30, %v7561_v5  ;;  %v10102_v5 = vld [vmem:[#allocation32_spill] sm:$0xff] }
 0x3a3   :  { %v8194_v35 = vpop.permute.xlu0 %3487  ;;  %4843 = vmatpush1.msra.mxu0 %v3709_v22  ;;  %v3712_v50 = vmul.f32 %v10077_v18, %v3661_v45  ;;  %v3578_v22 = vsel %vm996_vm3, %v7527_v31, %v7563_v30  ;;  %v10080_v45 = vrot.slane %v7774_v9, %v9995_v60  ;;  %v10121_v0 = vrot.slane %v7800_v14, %v9996_v63 }
 0x3a4   :  { %10076 = vst [vmem:[#allocation82_spill] sm:$0xff] %v8194_v35  ;;  %v3542_v58 = vmul.f32 %v10078_v19, %v3495_v25  ;;  %4907 = vmatprep.subr.mxu1 %v3888_v56  ;;  %v8212_v11 = vpop.permute.xlu1 %3741  ;;  %4844 = vmatprep.subr.mxu0 %v3626_v51  ;;  %v8231_v51 = vsel %vm738_vm6, %v7569_v46, %v7571_v32 }
 0x3a5   :  { %10079 = vst [vmem:[#allocation83_spill] sm:$0xff] %v8212_v11  ;;  %v3752_v18 = vsel %vm1176_vm1, %v7510_v36, %v8212_v11  ;;  %4908 = vmatpush1.msra.mxu1 %v3887_v26  ;;  %3995 = vrot.lane.b32.xlu0 %v7631_v3, %s5369_s14  ;;  %v3458_v31 = vmul.f32 %v10080_v45, %v3411_v20 }
 0x3a6   :  { %v3804_v56 = vmul.f32 %v3776_v27, %v3752_v18  ;;  %2813 = vrot.lane.b32.xlu1 %v7635_v4, %s5366_s13  ;;  %v10081_v20 = vrot.slane %v7754_v44, %v10040_v47  ;;  %v3494_v19 = vsel %vm910_vm4, %v7539_v38, %v7577_v12  ;;  %v10083_v27 = vrot.slane %v7754_v44, %v10046_v59 }
 0x3a7   :  { %v8246_v45 = vpop.permute.xlu0 %3319  ;;  %v3493_v25 = vsel %vm910_vm4, %v7577_v12, %v7579_v29  ;;  %v3410_v38 = vsel %vm824_vm5, %v7553_v39, %v7595_v8  ;;  %v10086_v39 = vrot.slane %v7800_v14, %v9995_v60  ;;  %v10101_v29 = vld [vmem:[#allocation34_spill] sm:$0xff]  ;;  %v10104_v44 = vrot.slane %v7764_v1, %v9996_v63 }
 0x3a8   :  { %v3627_v41 = vmul.f32 %v10081_v20, %v3578_v22  ;;  %10082 = vst [vmem:[#allocation84_spill] sm:$0xff] %v8246_v45  ;;  %v3628_v18 = vmul.f32 %v10083_v27, %v3577_v21  ;;  %v8261_v22 = vsel %vm652_vm8, %v7587_v13, %v7585_v15  ;;  %4909 = vmatprep.subr.mxu1 %v3804_v56  ;;  %v8267_v21 = vpop.permute.xlu1 %3571  ;;  %v10085_v27 = vld [vmem:[#allocation27_spill] sm:$0xff] }
 0x3a9   :  { %10084 = vst [vmem:[#allocation85_spill] sm:$0xff] %v8267_v21  ;;  %v3409_v12 = vsel %vm824_vm5, %v7595_v8, %v10085_v27  ;;  %v3580_v36 = vsel %vm996_vm3, %v8267_v21, %v7529_v52  ;;  %4910 = vmatpush1.msra.mxu1 %v3803_v24  ;;  %3911 = vrot.lane.b32.xlu0 %v7631_v3, %s5370_s25  ;;  %v10088_v24 = vld [vmem:[#allocation11_spill] sm:$0xff]  ;;  %v10091_v21 = vld [vmem:[#allocation21_spill] sm:$0xff] }
 0x3aa   :  { %v3374_v56 = vmul.f32 %v10086_v39, %v8231_v51  ;;  %v10087_v20 = vrot.slane %v7764_v1, %v10040_v47  ;;  %v3496_v8 = vsel %vm910_vm4, %v8194_v35, %v7537_v42  ;;  %v3625_v30 = vmul.f32 %v3588_v16, %v3580_v36  ;;  %2645 = vrot.lane.b32.xlu1 %v7635_v4, %s5368_s26  ;;  %v10090_v39 = vld [vmem:[#allocation24_spill] sm:$0xff] }
 0x3ab   :  { %4911 = vmatprep.subr.mxu1 %v10088_v24  ;;  %v10089_v52 = vrot.slane %v7774_v9, %v10040_v47  ;;  %v8305_v27 = vpop.permute.xlu0 %3151  ;;  %v10095_v42 = vrot.slane %v7764_v1, %v10046_v59  ;;  %v10096_v36 = vrot.slane %v7802_v49, %v9995_v60  ;;  %v10098_v35 = vld [vmem:[#allocation28_spill] sm:$0xff]  ;;  %v3541_v3 = vmul.f32 %v10104_v44, %v3496_v8  ;;  %v10120_v1 = vld [vmem:[#allocation47_spill] sm:$0xff] }
 0x3ac   :  { %v3543_v26 = vmul.f32 %v10087_v20, %v3494_v19  ;;  %v8302_v19 = vsel %vm10092_vm9, %v10091_v21, %v10090_v39  ;;  %v10093_v20 = vld [vmem:[#allocation19_spill] sm:$0xff]  ;;  %10094 = vst [vmem:[#allocation11_spill] sm:$0xff] %v8305_v27  ;;  %4845 = vmatpush1.msra.mxu0 %v3625_v30  ;;  %v8348_v30 = vsel %vm738_vm6, %v8246_v45, %v7569_v46 }
 0x3ad   :  { %v3459_v54 = vmul.f32 %v10089_v52, %v3410_v38  ;;  %4912 = vmatpush1.msra.mxu1 %v10093_v20  ;;  %v3544_v16 = vmul.f32 %v10095_v42, %v3493_v25  ;;  %v3290_v24 = vmul.f32 %v10096_v36, %v8261_v22  ;;  %v10097_v38 = vld [vmem:[#allocation30_spill] sm:$0xff]  ;;  %v8326_v25 = vpop.permute.xlu1 %3403  ;;  %v10100_v42 = vrot.slane %v7774_v9, %v10046_v59  ;;  %v10113_v45 = vld [vmem:[#allocation35_spill] sm:$0xff] }
 0x3ae   :  { %v8318_v52 = vsel %vm738_vm6, %v7571_v32, %v10097_v38  ;;  %v8324_v20 = vsel %vm738_vm6, %v10097_v38, %v10098_v35  ;;  %4913 = vmatprep.subr.mxu1 %v3712_v50  ;;  %10099 = vst [vmem:[#allocation24_spill] sm:$0xff] %v8326_v25  ;;  %v8335_v32 = vsel %vm10103_vm10, %v10102_v5, %v10101_v29  ;;  %10105 = vst [vmem:[#allocation21_spill] sm:$0xff] %v8348_v30 }
 0x3af   :  { %v3460_v36 = vmul.f32 %v10100_v42, %v3409_v12  ;;  %v3412_v50 = vsel %vm824_vm5, %v8326_v25, %v7555_v55  ;;  %4846 = vmatprep.subr.mxu0 %v3542_v58  ;;  %4914 = vmatpush1.msra.mxu1 %v3711_v53  ;;  %v10106_v12 = vrot.slane %v7774_v9, %v9996_v63  ;;  %v10107_v42 = vld [vmem:[#allocation16_spill] sm:$0xff]  ;;  %v10110_v53 = vld [vmem:[#allocation38_spill] sm:$0xff]  ;;  %v10114_v25 = vld [vmem:[#allocation41_spill] sm:$0xff] }
 0x3b0   :  { %3999 = vrot.lane.b32.xlu0 %v10107_v42, %s5369_s14  ;;  %3997 = vrot.lane.b32.xlu1 %v7635_v4, %s5369_s14  ;;  %v10108_v55 = vrot.slane %v7832_v2, %v9995_v60  ;;  %v10109_v46 = vrot.slane %v7800_v14, %v10040_v47  ;;  %v8369_v8 = vsel %vm652_vm8, %v7585_v15, %v10110_v53  ;;  %v10115_v9 = vld [vmem:[#allocation43_spill] sm:$0xff]  ;;  %vm10125_vm10 = vmmov %vm10092_vm9 }
 0x3b1   :  { %v3457_v38 = vmul.f32 %v10106_v12, %v3412_v50  ;;  %4847 = vmatpush1.msra.mxu0 %v3541_v3  ;;  %4915 = vmatprep.subr.mxu1 %v3628_v18  ;;  %v8371_v50 = vpop.permute.xlu0 %2983  ;;  %v10112_v12 = vrot.slane %v7800_v14, %v10046_v59  ;;  %v8387_v15 = vsel %vm10116_vm11, %v10115_v9, %v10114_v25  ;;  %v8389_v3 = vpop.permute.xlu1 %3235  ;;  %vm10129_vm11 = vcmp.lt.s32.totalorder %v5542_v10, 65 }
 0x3b2   :  { %v3206_v44 = vmul.f32 %v10108_v55, %v8302_v19  ;;  %v3375_v58 = vmul.f32 %v10109_v46, %v8318_v52  ;;  %10111 = vst [vmem:[#allocation19_spill] sm:$0xff] %v8371_v50  ;;  %v8381_v46 = vsel %vm652_vm8, %v10110_v53, %v10113_v45  ;;  %10117 = vst [vmem:[#allocation30_spill] sm:$0xff] %v8387_v15  ;;  %4848 = vmatprep.subr.mxu0 %v3458_v31 }
 0x3b3   :  { %v3376_v55 = vmul.f32 %v10112_v12, %v8324_v20  ;;  %4916 = vmatpush1.msra.mxu1 %v3627_v41  ;;  %10118 = vst [vmem:[#allocation28_spill] sm:$0xff] %v8389_v3  ;;  %v10119_v18 = vrot.slane %v7846_v40, %v9995_v60  ;;  %v8399_v53 = vsel %vm10092_vm9, %v10090_v39, %v10120_v1  ;;  %v10124_v39 = vld [vmem:[#allocation29_spill] sm:$0xff] }
 0x3b4   :  { %v3373_v11 = vmul.f32 %v10121_v0, %v8348_v30  ;;  %4849 = vmatpush1.msra.mxu0 %v3457_v38  ;;  %4917 = vmatprep.subr.mxu1 %v3544_v16  ;;  %v8409_v31 = vsel %vm652_vm8, %v8389_v3, %v7587_v13  ;;  %v10123_v41 = vrot.slane %v7802_v49, %v10040_v47  ;;  %v10127_v13 = vld [vmem:[#allocation33_spill] sm:$0xff]  ;;  %v10128_v38 = vld [vmem:[#allocation44_spill] sm:$0xff]  ;;  %v10135_v3 = vld [vmem:[#allocation39_spill] sm:$0xff] }
 0x3b5   :  { %v3122_v12 = vmul.f32 %v10119_v18, %v8335_v32  ;;  %10122 = vst [vmem:[#allocation34_spill] sm:$0xff] %v8409_v31  ;;  %v8419_v43 = vsel %vm10125_vm10, %v10120_v1, %v10124_v39  ;;  %v10126_v0 = vrot.slane %v7802_v49, %v9996_v63  ;;  %4850 = vmatprep.subr.mxu0 %v3374_v56  ;;  %v8439_v1 = vpop.permute.xlu0 %2815  ;;  %vm10136_vm10 = vcmp.lt.s32.totalorder %v5542_v10, 63 }
 0x3b6   :  { %v3291_v18 = vmul.f32 %v10123_v41, %v8369_v8  ;;  %4918 = vmatpush1.msra.mxu1 %v3543_v26  ;;  %v8429_v30 = vsel %vm10129_vm11, %v10128_v38, %v10127_v13  ;;  %v8435_v41 = vsel %vm10092_vm9, %v8305_v27, %v10091_v21  ;;  %3913 = vrot.lane.b32.xlu1 %v7635_v4, %s5370_s25  ;;  %vm10140_vm11 = vmmov %vm10136_vm10  ;;  %v10149_v4 = vld [vmem:[#allocation50_spill] sm:$0xff] }
 0x3b7   :  { %v3289_v16 = vmul.f32 %v10126_v0, %v8409_v31  ;;  %10130 = vst [vmem:[#allocation32_spill] sm:$0xff] %v8429_v30  ;;  %10131 = vst [vmem:[#allocation38_spill] sm:$0xff] %v8435_v41  ;;  %4851 = vmatpush1.msra.mxu0 %v3373_v11  ;;  %v10133_v26 = vrot.slane %v7802_v49, %v10046_v59  ;;  %v10134_v0 = vrot.slane %v7832_v2, %v10040_v47  ;;  %v8455_v11 = vpop.permute.xlu1 %3067  ;;  %v10139_v49 = vld [vmem:[#allocation36_spill] sm:$0xff] }
 0x3b8   :  { %10132 = vst [vmem:[#allocation35_spill] sm:$0xff] %v8439_v1  ;;  %v8453_v21 = vsel %vm10136_vm10, %v10101_v29, %v10135_v3  ;;  %4919 = vmatprep.subr.mxu1 %v3460_v36  ;;  %4852 = vmatprep.subr.mxu0 %v3290_v24  ;;  %10137 = vst [vmem:[#allocation41_spill] sm:$0xff] %v8455_v11  ;;  %v10138_v27 = vrot.slane %v7898_v48, %v9995_v60 }
 0x3b9   :  { %v3292_v56 = vmul.f32 %v10133_v26, %v8381_v46  ;;  %v3207_v31 = vmul.f32 %v10134_v0, %v8399_v53  ;;  %v8465_v0 = vsel %vm10140_vm11, %v10135_v3, %v10139_v49  ;;  %4920 = vmatpush1.msra.mxu1 %v3459_v54  ;;  %4853 = vmatpush1.msra.mxu0 %v3289_v16  ;;  %vm10142_vm9 = vmmov %vm10136_vm10  ;;  %vm10152_vm10 = vcmp.lt.s32.totalorder %v5542_v10, 64 }
 0x3ba   :  { %v3038_v26 = vmul.f32 %v10138_v27, %v8387_v15  ;;  %10141 = vst [vmem:[#allocation43_spill] sm:$0xff] %v8465_v0  ;;  %v8471_v29 = vsel %vm10142_vm9, %v8455_v11, %v10102_v5  ;;  %v10144_v24 = vrot.slane %v7832_v2, %v10046_v59  ;;  %v10145_v27 = vrot.slane %v7832_v2, %v9996_v63  ;;  %v10150_v2 = vld [vmem:[#allocation48_spill] sm:$0xff]  ;;  %vm10157_vm11 = vmmov %vm10152_vm10 }
 0x3bb   :  { %10143 = vst [vmem:[#allocation47_spill] sm:$0xff] %v8471_v29  ;;  %4921 = vmatprep.subr.mxu1 %v3376_v55  ;;  %v10146_v54 = vrot.slane %v7846_v40, %v9996_v63  ;;  %4854 = vmatprep.subr.mxu0 %v3206_v44  ;;  %v10147_v5 = vrot.slane %v7946_v7, %v9995_v60  ;;  %vm10159_vm9 = vmmov %vm10152_vm10 }
 0x3bc   :  { %v3208_v36 = vmul.f32 %v10144_v24, %v8419_v43  ;;  %v3205_v14 = vmul.f32 %v10145_v27, %v8435_v41  ;;  %v10148_v24 = vrot.slane %v7846_v40, %v10040_v47  ;;  %v8497_v55 = vsel %vm222_vm13, %v10150_v2, %v10149_v4  ;;  %4922 = vmatpush1.msra.mxu1 %v3375_v58  ;;  %v8507_v27 = vpop.permute.xlu0 %2647  ;;  %v10158_v41 = vld [vmem:[#allocation42_spill] sm:$0xff]  ;;  %v8525_v58 = vpop.permute.xlu1 %2899 }
 0x3bd   :  { %v3121_v3 = vmul.f32 %v10146_v54, %v8471_v29  ;;  %v2954_v16 = vmul.f32 %v10147_v5, %v8429_v30  ;;  %10151 = vst [vmem:[#allocation29_spill] sm:$0xff] %v8497_v55  ;;  %v8503_v44 = vsel %vm10152_vm10, %v8371_v50, %v10115_v9  ;;  %3915 = vrot.lane.b32.xlu1 %v10107_v42, %s5370_s25  ;;  %10154 = vst [vmem:[#allocation44_spill] sm:$0xff] %v8507_v27  ;;  %v10161_v50 = vld [vmem:[#allocation45_spill] sm:$0xff]  ;;  %v10165_v30 = vld [vmem:[#allocation8_spill] sm:$0xff] }
 0x3be   :  { %v3123_v11 = vmul.f32 %v10148_v24, %v8453_v21  ;;  %10153 = vst [vmem:[#allocation33_spill] sm:$0xff] %v8503_v44  ;;  %v10155_v54 = vrot.slane %v7846_v40, %v10046_v59  ;;  %v10156_v24 = vld [vmem:[#allocation56_spill] sm:$0xff]  ;;  %4855 = vmatpush1.msra.mxu0 %v3205_v14  ;;  %4923 = vmatprep.subr.mxu1 %v3292_v56  ;;  %10160 = vst [vmem:[#allocation39_spill] sm:$0xff] %v8525_v58  ;;  %v10162_v42 = vld [vmem:[#allocation49_spill] sm:$0xff]  ;;  %vm10163_vm10 = vcmp.lt.s32.totalorder %v5542_v10, 72 }
 0x3bf   :  { %v8517_v29 = vsel %vm10157_vm11, %v10114_v25, %v10156_v24  ;;  %v8523_v9 = vsel %vm10159_vm9, %v10156_v24, %v10158_v41  ;;  %v10164_v40 = vld [vmem:[#allocation54_spill] sm:$0xff]  ;;  %vm10166_vm11 = vcmp.lt.s32.totalorder %v5542_v10, 65  ;;  %4856 = vmatprep.subr.mxu0 %v3122_v12  ;;  %4924 = vmatpush1.msra.mxu1 %v3291_v18  ;;  %v10169_v56 = vrot.slane %v7952_v57, %v9995_v60 }
 0x3c0   :  { %v3124_v5 = vmul.f32 %v10155_v54, %v8465_v0  ;;  %v8531_v54 = vsel %vm10163_vm10, %v10162_v42, %v10161_v50  ;;  %v8537_v25 = vsel %vm10166_vm11, %v10165_v30, %v10164_v40  ;;  %vm10167_vm9 = vmmov %vm10166_vm11  ;;  %v10170_v0 = vrot.slane %v7898_v48, %v9996_v63  ;;  %4857 = vmatpush1.msra.mxu0 %v3121_v3 }
 0x3c1   :  { %v8543_v14 = vsel %vm10167_vm9, %v8525_v58, %v10128_v38  ;;  %v2870_v24 = vmul.f32 %v10169_v56, %v8497_v55  ;;  %4925 = vmatprep.subr.mxu1 %v3208_v36  ;;  %v10171_v12 = vrot.slane %v7946_v7, %v9996_v63  ;;  %v10172_v38 = vrot.slane %v7898_v48, %v10040_v47  ;;  %v8571_v36 = vpop.permute.xlu0 %3229  ;;  %vm10176_vm10 = vmmov %vm10167_vm9 }
 0x3c2   :  { %10168 = vst [vmem:[#allocation36_spill] sm:$0xff] %v8543_v14  ;;  %v3037_v15 = vmul.f32 %v10170_v0, %v8503_v44  ;;  %v10173_v56 = vrot.slane %v7898_v48, %v10046_v59  ;;  %v8569_v0 = vsel %vm222_vm13, %v8439_v1, %v10150_v2  ;;  %4858 = vmatprep.subr.mxu0 %v3038_v26  ;;  %v10179_v26 = vld [vmem:[#allocation14_spill] sm:$0xff]  ;;  %v10181_v44 = vld [vmem:[#allocation53_spill] sm:$0xff]  ;;  %v10182_v1 = vld [vmem:[#allocation52_spill] sm:$0xff]  ;;  %vm10183_vm11 = vcmp.lt.s32.totalorder %v5542_v10, 72 }
 0x3c3   :  { %v2953_v18 = vmul.f32 %v10171_v12, %v8543_v14  ;;  %v3039_v58 = vmul.f32 %v10172_v38, %v8517_v29  ;;  %10174 = vst [vmem:[#allocation50_spill] sm:$0xff] %v8569_v0  ;;  %4926 = vmatpush1.msra.mxu1 %v3207_v31  ;;  %v10175_v3 = vrot.slane %v7966_v6, %v9995_v60  ;;  %v8587_v31 = vpop.permute.xlu1 %2731  ;;  %v10180_v14 = vld [vmem:[#allocation3_spill] sm:$0xff]  ;;  %v10188_v48 = vld [vmem:[#allocation4_spill] sm:$0xff]  ;;  %vm10190_vm9 = vmmov %vm10183_vm11 }
 0x3c4   :  { %v3040_v55 = vmul.f32 %v10173_v56, %v8523_v9  ;;  %v8581_v38 = vsel %vm10176_vm10, %v10127_v13, %v10165_v30  ;;  %v10177_v2 = vrot.slane %v7946_v7, %v10046_v59  ;;  %4859 = vmatpush1.msra.mxu0 %v3037_v15  ;;  %4927 = vmatprep.subr.mxu1 %v3124_v5  ;;  %vm10196_vm10 = vmmov %vm10190_vm9 }
 0x3c5   :  { %v2786_v12 = vmul.f32 %v10175_v3, %v8531_v54  ;;  %10178 = vst [vmem:[#allocation48_spill] sm:$0xff] %v8587_v31  ;;  %v8593_v3 = vsel %vm51_vm15, %v10180_v14, %v10179_v26  ;;  %v8599_v30 = vsel %vm222_vm13, %v10182_v1, %v10181_v44  ;;  %4860 = vmatprep.subr.mxu0 %v2954_v16 }
 0x3c6   :  { %v2956_v56 = vmul.f32 %v10177_v2, %v8537_v25  ;;  %4928 = vmatpush1.msra.mxu1 %v3123_v11  ;;  %v8605_v15 = vsel %vm10183_vm11, %v8587_v31, %v10162_v42  ;;  %v8611_v13 = vsel %vm222_vm13, %v10149_v4, %v10182_v1  ;;  %v10185_v5 = vrot.slane %v7952_v57, %v9996_v63  ;;  %v10189_v4 = vld [vmem:[#allocation10_spill] sm:$0xff] }
 0x3c7   :  { %10184 = vst [vmem:[#allocation56_spill] sm:$0xff] %v8605_v15  ;;  %4861 = vmatpush1.msra.mxu0 %v2953_v18  ;;  %4929 = vmatprep.subr.mxu1 %v3040_v55  ;;  %v10186_v11 = vrot.slane %v7966_v6, %v9996_v63  ;;  %v10187_v42 = vrot.slane %v7946_v7, %v10040_v47  ;;  %v8637_v18 = vpop.permute.xlu0 %3061  ;;  %v10201_v7 = vld [vmem:[#allocation64_spill] sm:$0xff]  ;;  %vm10216_vm11 = vcmp.lt.s32.totalorder %v5542_v10, 57 }
 0x3c8   :  { %v2869_v2 = vmul.f32 %v10185_v5, %v8569_v0  ;;  %v8629_v1 = vsel %vm10190_vm9, %v10189_v4, %v10188_v48  ;;  %v8635_v55 = vsel %vm51_vm15, %v8507_v27, %v10180_v14  ;;  %4862 = vmatprep.subr.mxu0 %v2870_v24  ;;  %4930 = vmatpush1.msra.mxu1 %v3039_v58  ;;  %v10193_v5 = vld [vmem:[#allocation57_spill] sm:$0xff]  ;;  %v8653_v58 = vpop.permute.xlu1 %3313  ;;  %v10200_v27 = vld [vmem:[#allocation62_spill] sm:$0xff]  ;;  %vm10223_vm9 = vcmp.lt.s32.totalorder %v5542_v10, 63 }
 0x3c9   :  { %v2785_v16 = vmul.f32 %v10186_v11, %v8605_v15  ;;  %v2955_v31 = vmul.f32 %v10187_v42, %v8581_v38  ;;  %10191 = vst [vmem:[#allocation42_spill] sm:$0xff] %v8629_v1  ;;  %10192 = vst [vmem:[#allocation45_spill] sm:$0xff] %v8635_v55  ;;  %v10194_v11 = vrot.slane %v10193_v5, %v9996_v63  ;;  %4931 = vmatprep.subr.mxu1 %v2956_v56 }
 0x3ca   :  { %v10195_v15 = vrot.slane %v7952_v57, %v10046_v59  ;;  %v8651_v14 = vsel %vm10196_vm10, %v10161_v50, %v10189_v4  ;;  %4863 = vmatpush1.msra.mxu0 %v2869_v2  ;;  %10197 = vst [vmem:[#allocation49_spill] sm:$0xff] %v8653_v58  ;;  %v10198_v24 = vrot.slane %v7999_v33, %v9995_v60  ;;  %vm10227_vm10 = vcmp.lt.s32.totalorder %v5542_v10, 64 }
 0x3cb   :  { %v4593_v42 = vmul.f32 %v10194_v11, %v8231_v51  ;;  %v10199_v11 = vrot.slane %v7952_v57, %v10040_v47  ;;  %v8667_v50 = vsel %vm51_vm15, %v10201_v7, %v10200_v27  ;;  %4864 = vmatprep.subr.mxu0 %v2786_v12  ;;  %4932 = vmatpush1.msra.mxu1 %v2955_v31 }
 0x3cc   :  { %v2872_v0 = vmul.f32 %v10195_v15, %v8599_v30  ;;  %v2702_v51 = vmul.f32 %v10198_v24, %v8593_v3  ;;  %v10202_v56 = vrot.slane %v7966_v6, %v10046_v59  ;;  %v8677_v4 = vsel %vm51_vm15, %v10179_v26, %v10201_v7  ;;  %4865 = vmatpush1.msra.mxu0 %v2785_v16  ;;  %v8691_v7 = vpop.permute.xlu0 %2893 }
 0x3cd   :  { %v2871_v15 = vmul.f32 %v10199_v11, %v8611_v13  ;;  %v10203_v24 = vrot.slane %v7999_v33, %v9996_v63  ;;  %v10204_v12 = vrot.slane %v7966_v6, %v10040_v47  ;;  %v10206_v26 = vrot.slane %v7999_v33, %v10046_v59 }
 0x3ce   :  { %v2788_v2 = vmul.f32 %v10202_v56, %v8629_v1  ;;  %4933 = vmatprep.subr.mxu1 %v2872_v0  ;;  %v10205_v56 = vld [vmem:[#allocation59_spill] sm:$0xff]  ;;  %v4568_v1 = vrot.slane %v10193_v5, %v10046_v59  ;;  %4866 = vmatprep.subr.mxu0 %v2702_v51  ;;  %v10208_v51 = vrot.slane %v7999_v33, %v10040_v47 }
 0x3cf   :  { %v2701_v11 = vmul.f32 %v10203_v24, %v8635_v55  ;;  %v2787_v31 = vmul.f32 %v10204_v12, %v8651_v14  ;;  %v4388_v57 = vrot.slane %v10205_v56, %v10046_v59  ;;  %4934 = vmatpush1.msra.mxu1 %v2871_v15  ;;  %v2704_v0 = vmul.f32 %v10206_v26, %v8667_v50  ;;  %v10207_v24 = vld [vmem:[#allocation5_spill] sm:$0xff]  ;;  %v8701_v55 = vpop.permute.xlu1 %3145 }
 0x3d0   :  { %4935 = vmatprep.subr.mxu1 %v2788_v2  ;;  %v4448_v12 = vrot.slane %v10207_v24, %v10046_v59  ;;  %v2703_v15 = vmul.f32 %v10208_v51, %v8677_v4  ;;  %v8711_v26 = vsel %vm738_vm6, %v10098_v35, %v8653_v58  ;;  %v10209_v2 = vmov 1.0   ;;  %v10212_v51 = vld [vmem:[#allocation61_spill] sm:$0xff] }
 0x3d1   :  { %4867 = vmatpush1.msra.mxu0 %v2701_v11  ;;  %4936 = vmatpush1.msra.mxu1 %v2787_v31  ;;  %v10210_v11 = vrot.slane %v10193_v5, %v9995_v60  ;;  %v10211_v6 = vrot.slane %v7798_v61, %v9996_v63  ;;  %v4328_v58 = vrot.slane %v10212_v51, %v10046_v59 }
 0x3d2   :  { %4876 = vmatprep.subr.mxu0 %v10209_v2  ;;  %4937 = vmatprep.subr.mxu1 %v2704_v0  ;;  %v8731_v31 = vsel %vm652_vm8, %v10113_v45, %v8571_v36  ;;  %v4596_v45 = vmul.f32 %v4568_v1, %v8711_v26  ;;  %v10217_v1 = vrot.slane %v10207_v24, %v9995_v60 }
 0x3d3   :  { %v4594_v16 = vmul.f32 %v10210_v11, %v8318_v52  ;;  %v4533_v33 = vmul.f32 %v10211_v6, %v8261_v22  ;;  %4877 = vmatpush2.msra.mxu0 %v10209_v2  ;;  %4938 = vmatpush1.msra.mxu1 %v2703_v15  ;;  %v10213_v6 = vrot.slane %v7798_v61, %v9995_v60  ;;  %v8737_v52 = vpop.permute.xlu0 %2725 }
 0x3d4   :  { %v10214_v11 = vrot.slane %v10207_v24, %v9996_v63  ;;  %4947 = vmatprep.subr.mxu1 %v10209_v2  ;;  %v10215_v15 = vrot.slane %v10193_v5, %v10040_v47 }
 0x3d5   :  { %4878 = vmatprep.subr.mxu0 %v4594_v16  ;;  %v4534_v22 = vmul.f32 %v10213_v6, %v8369_v8  ;;  %v8747_v16 = vpop.permute.xlu1 %2977  ;;  %4948 = vmatpush2.msra.mxu1 %v10209_v2  ;;  %v10221_v8 = vrot.slane %v7798_v61, %v10040_v47 }
 0x3d6   :  { %v4473_v35 = vmul.f32 %v10214_v11, %v8302_v19  ;;  %4879 = vmatpush2.msra.mxu0 %v4593_v42  ;;  %v4595_v6 = vmul.f32 %v10215_v15, %v8324_v20  ;;  %v8759_v19 = vsel %vm10216_vm11, %v10124_v39, %v8701_v55  ;;  %v4474_v42 = vmul.f32 %v10217_v1, %v8399_v53  ;;  %v10219_v20 = vld [vmem:[#allocation58_spill] sm:$0xff] }
 0x3d7   :  { %4880 = vmatprep.subr.mxu0 %v4534_v22  ;;  %v10218_v11 = vrot.slane %v7798_v61, %v10046_v59  ;;  %4949 = vmatprep.subr.mxu1 %v4596_v45  ;;  %v10220_v39 = vld [vmem:[#allocation46_spill] sm:$0xff]  ;;  %v4535_v2 = vmul.f32 %v10221_v8, %v8381_v46  ;;  %v10222_v53 = vrot.slane %v10205_v56, %v9995_v60  ;;  %v8788_v45 = vpop.permute.xlu0 %2641  ;;  %vm10234_vm11 = vcmp.lt.s32.totalorder %v5542_v10, 65 }
 0x3d8   :  { %4881 = vmatpush2.msra.mxu0 %v4533_v33  ;;  %v8786_v33 = vsel %vm10223_vm9, %v10139_v49, %v8637_v18  ;;  %4950 = vmatpush2.msra.mxu1 %v4595_v6  ;;  %v4476_v8 = vmul.f32 %v4448_v12, %v8759_v19  ;;  %v10225_v49 = vrot.slane %v10207_v24, %v10040_v47  ;;  %v10228_v12 = vld [vmem:[#allocation30_spill] sm:$0xff]  ;;  %vm10246_vm9 = vcmp.lt.s32.totalorder %v5542_v10, 72 }
 0x3d9   :  { %v4536_v0 = vmul.f32 %v10218_v11, %v8731_v31  ;;  %v4414_v1 = vmul.f32 %v10222_v53, %v8453_v21  ;;  %4882 = vmatprep.subr.mxu0 %v4474_v42  ;;  %v10224_v11 = vrot.slane %v10205_v56, %v9996_v63  ;;  %v8795_v21 = vpop.permute.xlu1 %2809  ;;  %v4028_v53 = vrot.slane %v8053_v23, %v10046_v59 }
 0x3da   :  { %4883 = vmatpush2.msra.mxu0 %v4473_v35  ;;  %v4475_v6 = vmul.f32 %v10225_v49, %v8419_v43  ;;  %v10226_v42 = vrot.slane %v10212_v51, %v9995_v60  ;;  %v10229_v35 = vrot.slane %v10212_v51, %v9996_v63  ;;  %v4416_v43 = vmul.f32 %v4388_v57, %v8786_v33  ;;  %v10231_v49 = vld [vmem:[#allocation43_spill] sm:$0xff] }
 0x3db   :  { %v4413_v46 = vmul.f32 %v10224_v11, %v8335_v32  ;;  %4951 = vmatprep.subr.mxu1 %v4536_v0  ;;  %v8811_v32 = vsel %vm10227_vm10, %v10158_v41, %v8747_v16  ;;  %4884 = vmatprep.subr.mxu0 %v4414_v1  ;;  %v10230_v11 = vld [vmem:[#allocation15_spill] sm:$0xff]  ;;  %v8832_v57 = vsel %vm10234_vm11, %v10164_v40, %v8691_v7 }
 0x3dc   :  { %v4354_v15 = vmul.f32 %v10226_v42, %v8517_v29  ;;  %4952 = vmatpush2.msra.mxu1 %v4535_v2  ;;  %v4353_v0 = vmul.f32 %v10229_v35, %v10228_v12  ;;  %v10232_v42 = vrot.slane %v10205_v56, %v10040_v47  ;;  %v10233_v2 = vrot.slane %v7924_v28, %v9995_v60 }
 0x3dd   :  { %4885 = vmatpush2.msra.mxu0 %v4413_v46  ;;  %4953 = vmatprep.subr.mxu1 %v4476_v8  ;;  %v3828_v46 = vpop.permute.xlu0 %3827  ;;  %v10235_v8 = vld [vmem:[#allocation32_spill] sm:$0xff]  ;;  %v10236_v12 = vrot.slane %v7924_v28, %v9996_v63  ;;  %v10238_v40 = vrot.slane %v10212_v51, %v10040_v47 }
 0x3de   :  { %v4415_v41 = vmul.f32 %v10232_v42, %v10231_v49  ;;  %v4294_v1 = vmul.f32 %v10233_v2, %v8581_v38  ;;  %4886 = vmatprep.subr.mxu0 %v4354_v15  ;;  %4954 = vmatpush2.msra.mxu1 %v4475_v6  ;;  %v4356_v49 = vmul.f32 %v4328_v58, %v8811_v32  ;;  %v8839_v42 = vpop.permute.xlu1 %3829  ;;  %v10237_v38 = vld [vmem:[#allocation76_spill] sm:$0xff] }
 0x3df   :  { %v4293_v35 = vmul.f32 %v10236_v12, %v10235_v8  ;;  %4887 = vmatpush2.msra.mxu0 %v4353_v0  ;;  %4955 = vmatprep.subr.mxu1 %v4416_v43  ;;  %v4355_v15 = vmul.f32 %v10238_v40, %v8523_v9  ;;  %v10239_v6 = vrot.slane %v7954_v34, %v9995_v60  ;;  %v10240_v0 = vld [vmem:[#allocation29_spill] sm:$0xff] }
 0x3e0   :  { %v8855_v58 = vsel %vm222_vm13, %v10181_v44, %v8795_v21  ;;  %4888 = vmatprep.subr.mxu0 %v4294_v1  ;;  %4956 = vmatpush2.msra.mxu1 %v4415_v41  ;;  %v10241_v43 = vrot.slane %v7954_v34, %v9996_v63  ;;  %v10242_v9 = vrot.slane %v7991_v17, %v9996_v63 }
 0x3e1   :  { %v4234_v29 = vmul.f32 %v10239_v6, %v8611_v13  ;;  %v10243_v13 = vrot.slane %v7924_v28, %v10046_v59  ;;  %4889 = vmatpush2.msra.mxu0 %v4293_v35  ;;  %4957 = vmatprep.subr.mxu1 %v4356_v49  ;;  %v10244_v44 = vrot.slane %v7924_v28, %v10040_v47  ;;  %v3744_v35 = vpop.permute.xlu0 %3743 }
 0x3e2   :  { %v4233_v8 = vmul.f32 %v10241_v43, %v10240_v0  ;;  %v4173_v12 = vmul.f32 %v10242_v9, %v8531_v54  ;;  %v10245_v1 = vrot.slane %v7991_v17, %v9995_v60  ;;  %v8881_v54 = vsel %vm10246_vm9, %v10188_v48, %v8737_v52  ;;  %4958 = vmatpush2.msra.mxu1 %v4355_v15  ;;  %v8895_v48 = vpop.permute.xlu1 %3993 }
 0x3e3   :  { %v4296_v40 = vmul.f32 %v10243_v13, %v8832_v57  ;;  %v4295_v41 = vmul.f32 %v10244_v44, %v8537_v25  ;;  %4890 = vmatprep.subr.mxu0 %v4234_v29  ;;  %v10247_v49 = vrot.slane %v8011_v62, %v9996_v63  ;;  %v10248_v25 = vrot.slane %v7954_v34, %v10040_v47  ;;  %v10252_v13 = vld [vmem:[#allocation72_spill] sm:$0xff] }
 0x3e4   :  { %v4174_v6 = vmul.f32 %v10245_v1, %v8651_v14  ;;  %v10249_v14 = vrot.slane %v7954_v34, %v10046_v59  ;;  %4891 = vmatpush2.msra.mxu0 %v4233_v8  ;;  %v10250_v29 = vrot.slane %v8011_v62, %v9995_v60  ;;  %v10253_v8 = vld [vmem:[#allocation42_spill] sm:$0xff] }
 0x3e5   :  { %v4113_v0 = vmul.f32 %v10247_v49, %v8593_v3  ;;  %v4235_v43 = vmul.f32 %v10248_v25, %v8599_v30  ;;  %4959 = vmatprep.subr.mxu1 %v4296_v40  ;;  %v10251_v3 = vld [vmem:[#allocation67_spill] sm:$0xff]  ;;  %v8909_v30 = vsel %vm51_vm15, %v10200_v27, %v8788_v45  ;;  %v10254_v40 = vrot.slane %v7991_v17, %v10040_v47  ;;  %v10258_v27 = vld [vmem:[#allocation69_spill] sm:$0xff] }
 0x3e6   :  { %v4236_v9 = vmul.f32 %v10249_v14, %v8855_v58  ;;  %v4114_v15 = vmul.f32 %v10250_v29, %v8677_v4  ;;  %v4007_v44 = vsel %vm1434_vm12, %v10252_v13, %v10251_v3  ;;  %4892 = vmatprep.subr.mxu0 %v4174_v6  ;;  %4960 = vmatpush2.msra.mxu1 %v4295_v41  ;;  %v10255_v49 = vld [vmem:[#allocation71_spill] sm:$0xff]  ;;  %v8945_v2 = vpop.permute.xlu1 %3745 }
 0x3e7   :  { %v4175_v1 = vmul.f32 %v10254_v40, %v10253_v8  ;;  %v10256_v4 = vld [vmem:[#allocation75_spill] sm:$0xff]  ;;  %v10257_v14 = vrot.slane %v7991_v17, %v10046_v59  ;;  %4893 = vmatpush2.msra.mxu0 %v4173_v12  ;;  %v10259_v41 = vrot.slane %v8053_v23, %v9995_v60  ;;  %v10261_v40 = vld [vmem:[#allocation73_spill] sm:$0xff]  ;;  %v10262_v12 = vrot.slane %v8053_v23, %v9996_v63 }
 0x3e8   :  { %v3922_v25 = vsel %vm1348_vm14, %v10256_v4, %v10255_v49  ;;  %4961 = vmatprep.subr.mxu1 %v4236_v9  ;;  %v10260_v3 = vld [vmem:[#allocation79_spill] sm:$0xff]  ;;  %v4004_v49 = vsel %vm1434_vm12, %v10261_v40, %v8895_v48  ;;  %4894 = vmatprep.subr.mxu0 %v4114_v15 }
 0x3e9   :  { %v4176_v29 = vmul.f32 %v10257_v14, %v8881_v54  ;;  %v4054_v6 = vmul.f32 %v10259_v41, %v10258_v27  ;;  %v3923_v8 = vsel %vm1348_vm14, %v10260_v3, %v10256_v4  ;;  %4962 = vmatpush2.msra.mxu1 %v4235_v43  ;;  %v3832_v14 = vpop.permute.xlu0 %3831  ;;  %v4053_v9 = vmul.f32 %v10262_v12, %v4007_v44  ;;  %v10300_v3 = vld [vmem:[#allocation9_spill] sm:$0xff] }
 0x3ea   :  { %v10263_v27 = vrot.slane %v8011_v62, %v10046_v59  ;;  %v3834_v4 = vsel %vm1262_vm0, %v3828_v46, %v8839_v42  ;;  %4895 = vmatpush2.msra.mxu0 %v4113_v0  ;;  %v10264_v43 = vrot.slane %v8011_v62, %v10040_v47  ;;  %v10265_v44 = vrot.slane %v10237_v38, %v9995_v60  ;;  %v10268_v60 = vld [vmem:[#allocation74_spill] sm:$0xff] }
 0x3eb   :  { %4963 = vmatprep.subr.mxu1 %v4176_v29  ;;  %4896 = vmatprep.subr.mxu0 %v4054_v6  ;;  %v3750_v12 = vsel %vm1176_vm1, %v3744_v35, %v8945_v2  ;;  %v10266_v0 = vrot.slane %v10237_v38, %v9996_v63  ;;  %v10270_v6 = vrot.slane %v7429_v37, %v10220_v39 }
 0x3ec   :  { %v4116_v41 = vmul.f32 %v10263_v27, %v8909_v30  ;;  %v4115_v15 = vmul.f32 %v10264_v43, %v8667_v50  ;;  %v3970_v40 = vmul.f32 %v10265_v44, %v3922_v25  ;;  %4964 = vmatpush2.msra.mxu1 %v4175_v1  ;;  %v10267_v27 = vld [vmem:[#allocation81_spill] sm:$0xff]  ;;  %v4056_v50 = vmul.f32 %v4028_v53, %v4004_v49  ;;  %v10272_v49 = vld [vmem:[#allocation83_spill] sm:$0xff] }
 0x3ed   :  { %v3969_v29 = vmul.f32 %v10266_v0, %v3923_v8  ;;  %v3835_v22 = vsel %vm1262_vm0, %v10267_v27, %v3828_v46  ;;  %4897 = vmatpush2.msra.mxu0 %v4053_v9  ;;  %v10269_v1 = vrot.slane %v8053_v23, %v10040_v47  ;;  %v3890_v63 = vmul.f32 %v10270_v6, %v3834_v4  ;;  %v3652_v46 = vpop.permute.xlu0 %3651  ;;  %v8978_v53 = vld [vmem:[%s9607_s1 + $0x10] sm:$0xff]  ;;  %v10279_v6 = vld [vmem:[#allocation23_spill] sm:$0xff] }
 0x3ee   :  { %4965 = vmatprep.subr.mxu1 %v4116_v41  ;;  %v3780_v8 = vrot.slane %v10230_v11, %v10219_v20  ;;  %4898 = vmatprep.subr.mxu0 %v3970_v40  ;;  %10271 = vst [vmem:[#allocation54_spill] sm:$0xff] %v8978_v53  ;;  %v3751_v9 = vsel %vm1176_vm1, %v10272_v49, %v3744_v35  ;;  %v10273_v41 = vld [vmem:[#allocation6_spill] sm:$0xff]  ;;  %v10277_v27 = vld [vmem:[#allocation13_spill] sm:$0xff] }
 0x3ef   :  { %v4055_v25 = vmul.f32 %v10269_v1, %v10268_v60  ;;  %4966 = vmatpush2.msra.mxu1 %v4115_v15  ;;  %v3872_v43 = vrot.slane %v7429_v37, %v10273_v41  ;;  %v10274_v4 = vrot.slane %v10230_v11, %v10220_v39  ;;  %4899 = vmatpush2.msra.mxu0 %v3969_v29  ;;  %v8988_v15 = vpop.permute.xlu1 %3909  ;;  %v10278_v35 = vld [vmem:[#allocation77_spill] sm:$0xff] }
 0x3f0   :  { %4967 = vmatprep.subr.mxu1 %v4056_v50  ;;  %10275 = vst [vmem:[#allocation8_spill] sm:$0xff] %v8988_v15  ;;  %v10276_v40 = vrot.slane %v7429_v37, %v10219_v20  ;;  %v3876_v60 = vrot.slane %v7429_v37, %v10277_v27  ;;  %4978 = vmatprep.subr.mxu0 %v3890_v63  ;;  %v10281_v50 = vld [vmem:[#allocation17_spill] sm:$0xff]  ;;  %v10282_v63 = vld [vmem:[#allocation78_spill] sm:$0xff] }
 0x3f1   :  { %v3806_v44 = vmul.f32 %v10274_v4, %v3750_v12  ;;  %4968 = vmatpush2.msra.mxu1 %v4055_v25  ;;  %v3920_v1 = vsel %vm1348_vm14, %v10278_v35, %v8988_v15  ;;  %v3840_v12 = vsel %vm1262_vm0, %v3832_v14, %v10279_v6  ;;  %4901 = vmatmul.mubr.f32.vlgmr.msra.gmra.mxu0 %v8978_v53  ;;  %v3566_v6 = vpop.permute.xlu0 %3565 }
 0x3f2   :  { %v3889_v0 = vmul.f32 %v10276_v40, %v3835_v22  ;;  %v10280_v29 = vrot.slane %v10237_v38, %v10046_v59  ;;  %v3688_v37 = vrot.slane %v10281_v50, %v10219_v20  ;;  %v3692_v25 = vrot.slane %v10281_v50, %v10220_v39  ;;  %v5345_v59 = vld [vmem:[%s9607_s1 + $0x18] sm:$0xff] }
 0x3f3   :  { %v10283_v49 = vrot.slane %v10237_v38, %v10040_v47  ;;  %v3805_v40 = vmul.f32 %v3780_v8, %v3751_v9  ;;  %v3833_v35 = vsel %vm1262_vm0, %v8839_v42, %v3832_v14  ;;  %5309 = vmatprep.mubr.msk.f32.mxu0 %vm2277_vm7, %v5345_v59  ;;  %v3788_v47 = vrot.slane %v10230_v11, %v10273_v41  ;;  %v10284_v14 = vld [vmem:[#allocation31_spill] sm:$0xff] }
 0x3f4   :  { %v3972_v22 = vmul.f32 %v10280_v29, %v3920_v1  ;;  %4979 = vmatpush1.msra.mxu0 %v3889_v0  ;;  %v3650_v1 = vpop.permute.xlu1 %3649  ;;  %v3792_v8 = vrot.slane %v10230_v11, %v10277_v27  ;;  %v3892_v9 = vmul.f32 %v3876_v60, %v3840_v12  ;;  %v3891_v29 = vmul.f32 %v3872_v43, %v3833_v35 }
 0x3f5   :  { %v3971_v4 = vmul.f32 %v10283_v49, %v10282_v63  ;;  %4980 = vmatprep.subr.mxu0 %v3806_v44  ;;  %v3659_v42 = vsel %vm1082_vm2, %v3650_v1, %v3652_v46  ;;  %v3660_v0 = vsel %vm1082_vm2, %v10284_v14, %v3650_v1  ;;  %v10285_v44 = vld [vmem:[#allocation37_spill] sm:$0xff]  ;;  %v10286_v49 = vld [vmem:[#allocation20_spill] sm:$0xff]  ;;  %v3482_v11 = vpop.permute.xlu0 %3481  ;;  %v3696_v12 = vrot.slane %v10281_v50, %v10273_v41  ;;  %v10288_v1 = vld [vmem:[#allocation7_spill] sm:$0xff] }
 0x3f6   :  { %4969 = vmatprep.subr.mxu1 %v3972_v22  ;;  %4981 = vmatpush1.msra.mxu0 %v3805_v40  ;;  %v3713_v22 = vmul.f32 %v3688_v37, %v3660_v0  ;;  %v3714_v63 = vmul.f32 %v3692_v25, %v3659_v42  ;;  %v3700_v25 = vrot.slane %v10281_v50, %v10277_v27  ;;  %vm10303_vm0 = vcmp.lt.s32.totalorder %v5542_v10, 57 }
 0x3f7   :  { %4970 = vmatpush2.msra.mxu1 %v3971_v4  ;;  %4982 = vmatprep.subr.mxu0 %v10285_v44  ;;  %v10287_v4 = vld [vmem:[#allocation26_spill] sm:$0xff]  ;;  %v3604_v42 = vrot.slane %v10288_v1, %v10219_v20 }
 0x3f8   :  { %4972 = vmatmul.mubr.f32.vlgmr.msra.gmra.mxu1 %v8978_v53  ;;  %4983 = vmatpush1.msra.mxu0 %v10286_v49  ;;  %v3748_v60 = vpop.permute.xlu1 %3747  ;;  %v10291_v49 = vld [vmem:[#allocation16_spill] sm:$0xff] }
 0x3f9   :  { %5049 = vmatprep.subr.mxu1 %v3892_v9  ;;  %4984 = vmatprep.subr.mxu0 %v3714_v63  ;;  %v3749_v43 = vsel %vm1176_vm1, %v8945_v2, %v3748_v60  ;;  %v3756_v37 = vsel %vm1176_vm1, %v3748_v60, %v10287_v4  ;;  %v3608_v9 = vrot.slane %v10288_v1, %v10220_v39  ;;  %v3654_v14 = vpop.permute.xlu0 %3653  ;;  %v10289_v2 = vld [vmem:[#allocation18_spill] sm:$0xff]  ;;  %v10292_v60 = vld [vmem:[#allocation25_spill] sm:$0xff]  ;;  %vm10306_vm1 = vcmp.lt.s32.totalorder %v5542_v10, 63 }
 0x3fa   :  { %5050 = vmatpush1.msra.mxu1 %v3891_v29  ;;  %4985 = vmatpush1.msra.mxu0 %v3713_v22  ;;  %v3807_v40 = vmul.f32 %v3788_v47, %v3749_v43  ;;  %v3808_v35 = vmul.f32 %v3792_v8, %v3756_v37  ;;  %v3576_v0 = vsel %vm996_vm3, %v10289_v2, %v3566_v6  ;;  %v10290_v29 = vld [vmem:[#allocation80_spill] sm:$0xff] }
 0x3fb   :  { %5310 = vmatprep.mubr.msk.f32.mxu1 %vm2277_vm7, %v5345_v59  ;;  %v3657_v44 = vsel %vm1082_vm2, %v3654_v14, %v10290_v29  ;;  %v3658_v50 = vsel %vm1082_vm2, %v3652_v46, %v3654_v14  ;;  %v3524_v43 = vrot.slane %v10292_v60, %v10220_v39  ;;  %v3629_v4 = vmul.f32 %v3604_v42, %v3576_v0  ;;  %v10293_v2 = vld [vmem:[#allocation40_spill] sm:$0xff]  ;;  %vm10309_vm2 = vmmov %vm10227_vm10 }
 0x3fc   :  { %5051 = vmatprep.subr.mxu1 %v3808_v35  ;;  %v3568_v59 = vpop.permute.xlu1 %3567  ;;  %v3715_v47 = vmul.f32 %v3696_v12, %v3658_v50  ;;  %v3716_v8 = vmul.f32 %v3700_v25, %v3657_v44  ;;  %v3520_v37 = vrot.slane %v10292_v60, %v10219_v20  ;;  %v10294_v12 = vld [vmem:[#allocation22_spill] sm:$0xff]  ;;  %v10296_v44 = vld [vmem:[#allocation51_spill] sm:$0xff]  ;;  %v3532_v15 = vrot.slane %v10292_v60, %v10277_v27  ;;  %vm10321_vm7 = vmmov %vm10306_vm1 }
 0x3fd   :  { %v3575_v22 = vsel %vm996_vm3, %v3566_v6, %v3568_v59  ;;  %5052 = vmatpush1.msra.mxu1 %v3807_v40  ;;  %v9064_v46 = vpop.permute.xlu0 %3399  ;;  %v3492_v25 = vsel %vm910_vm4, %v10294_v12, %v3482_v11  ;;  %v3352_v50 = vrot.slane %v10296_v44, %v10219_v20  ;;  %vm10324_vm10 = vmmov %vm10309_vm2 }
 0x3fe   :  { %v3630_v63 = vmul.f32 %v3608_v9, %v3575_v22  ;;  %5053 = vmatprep.subr.mxu1 %v10291_v49  ;;  %v10295_v9 = vld [vmem:[#allocation12_spill] sm:$0xff]  ;;  %v3545_v0 = vmul.f32 %v3520_v37, %v3492_v25  ;;  %v10298_v49 = vld [vmem:[#allocation27_spill] sm:$0xff]  ;;  %v3612_v25 = vrot.slane %v10288_v1, %v10273_v41 }
 0x3ff   :  { %5054 = vmatpush1.msra.mxu1 %v10293_v2  ;;  %v3436_v42 = vrot.slane %v10295_v9, %v10219_v20  ;;  %v3440_v14 = vrot.slane %v10295_v9, %v10220_v39 }
 0x400   :  { %4986 = vmatprep.subr.mxu0 %v3630_v63  ;;  %5055 = vmatprep.subr.mxu1 %v3716_v8  ;;  %v3484_v6 = vpop.permute.xlu1 %3483  ;;  %v3356_v8 = vrot.slane %v10296_v44, %v10220_v39 }
 0x401   :  { %v3491_v40 = vsel %vm910_vm4, %v3482_v11, %v3484_v6  ;;  %4987 = vmatpush1.msra.mxu0 %v3629_v4  ;;  %5056 = vmatpush1.msra.mxu1 %v3715_v47  ;;  %v9075_v29 = vpop.permute.xlu0 %3315  ;;  %v10297_v47 = vld [vmem:[#allocation49_spill] sm:$0xff]  ;;  %v10299_v4 = vld [vmem:[#allocation55_spill] sm:$0xff] }
 0x402   :  { %v3546_v35 = vmul.f32 %v3524_v43, %v3491_v40  ;;  %v9085_v22 = vsel %vm738_vm6, %v10297_v47, %v9075_v29  ;;  %v3272_v37 = vrot.slane %v10299_v4, %v10220_v39  ;;  %v3616_v40 = vrot.slane %v10288_v1, %v10277_v27 }
 0x403   :  { %v3188_v1 = vrot.slane %v10300_v3, %v10220_v39 }
 0x404   :  { %4988 = vmatprep.subr.mxu0 %v3546_v35  ;;  %v3398_v11 = vpop.permute.xlu1 %3397  ;;  %v3268_v35 = vrot.slane %v10299_v4, %v10219_v20 }
 0x405   :  { %v3407_v63 = vsel %vm824_vm5, %v3398_v11, %v9064_v46  ;;  %v3408_v43 = vsel %vm824_vm5, %v10298_v49, %v3398_v11  ;;  %4989 = vmatpush1.msra.mxu0 %v3545_v0  ;;  %v9101_v47 = vpop.permute.xlu0 %3231  ;;  %v3184_v11 = vrot.slane %v10300_v3, %v10219_v20  ;;  %v3378_v0 = vmul.f32 %v3356_v8, %v9085_v22 }
 0x406   :  { %v3461_v2 = vmul.f32 %v3436_v42, %v3408_v43  ;;  %v3462_v12 = vmul.f32 %v3440_v14, %v3407_v63  ;;  %v9110_v42 = vsel %vm652_vm8, %v8571_v36, %v9101_v47  ;;  %v3377_v63 = vmul.f32 %v3352_v50, %v8711_v26  ;;  %v10301_v43 = vld [vmem:[#allocation85_spill] sm:$0xff] }
 0x407   :  { %v3294_v49 = vmul.f32 %v3272_v37, %v9110_v42  ;;  %v3293_v26 = vmul.f32 %v3268_v35, %v8731_v31  ;;  %v10302_v37 = vld [vmem:[#allocation60_spill] sm:$0xff]  ;;  %v3209_v35 = vmul.f32 %v3184_v11, %v8759_v19 }
 0x408   :  { %4990 = vmatprep.subr.mxu0 %v3462_v12  ;;  %v3570_v14 = vpop.permute.xlu1 %3569  ;;  %v3528_v12 = vrot.slane %v10292_v60, %v10273_v41  ;;  %v3104_v60 = vrot.slane %v10302_v37, %v10220_v39 }
 0x409   :  { %v3573_v13 = vsel %vm996_vm3, %v3570_v14, %v10301_v43  ;;  %v3574_v8 = vsel %vm996_vm3, %v3568_v59, %v3570_v14  ;;  %4991 = vmatpush1.msra.mxu0 %v3461_v2  ;;  %v9126_v50 = vpop.permute.xlu0 %3147  ;;  %v3100_v43 = vrot.slane %v10302_v37, %v10219_v20  ;;  %v10304_v2 = vld [vmem:[#allocation82_spill] sm:$0xff]  ;;  %vm10312_vm3 = vmmov %vm10234_vm11 }
 0x40a   :  { %v3631_v53 = vmul.f32 %v3612_v25, %v3574_v8  ;;  %v3632_v36 = vmul.f32 %v3616_v40, %v3573_v13  ;;  %4992 = vmatprep.subr.mxu0 %v3378_v0  ;;  %v9134_v13 = vsel %vm10303_vm0, %v8701_v55, %v9126_v50  ;;  %v3444_v55 = vrot.slane %v10295_v9, %v10273_v41  ;;  %vm10325_vm11 = vmmov %vm10309_vm2 }
 0x40b   :  { %4993 = vmatpush1.msra.mxu0 %v3377_v63  ;;  %v3210_v31 = vmul.f32 %v3188_v1, %v9134_v13  ;;  %v3448_v63 = vrot.slane %v10295_v9, %v10277_v27  ;;  %v10307_v9 = vld [vmem:[#allocation24_spill] sm:$0xff] }
 0x40c   :  { %4994 = vmatprep.subr.mxu0 %v3294_v49  ;;  %5057 = vmatprep.subr.mxu1 %v3632_v36  ;;  %v3486_v59 = vpop.permute.xlu1 %3485  ;;  %v10305_v49 = vld [vmem:[#allocation63_spill] sm:$0xff] }
 0x40d   :  { %v3489_v25 = vsel %vm910_vm4, %v3486_v59, %v10304_v2  ;;  %v3490_v40 = vsel %vm910_vm4, %v3484_v6, %v3486_v59  ;;  %4995 = vmatpush1.msra.mxu0 %v3293_v26  ;;  %5058 = vmatpush1.msra.mxu1 %v3631_v53  ;;  %v9149_v1 = vpop.permute.xlu0 %3063  ;;  %v3016_v8 = vrot.slane %v10305_v49, %v10219_v20  ;;  %v10308_v2 = vld [vmem:[#allocation65_spill] sm:$0xff]  ;;  %vm10316_vm4 = vmmov %vm10303_vm0 }
 0x40e   :  { %v3547_v0 = vmul.f32 %v3528_v12, %v3490_v40  ;;  %v3548_v14 = vmul.f32 %v3532_v15, %v3489_v25  ;;  %4996 = vmatprep.subr.mxu0 %v3210_v31  ;;  %v9157_v6 = vsel %vm10306_vm1, %v8637_v18, %v9149_v1  ;;  %v3020_v53 = vrot.slane %v10305_v49, %v10220_v39 }
 0x40f   :  { %4997 = vmatpush1.msra.mxu0 %v3209_v35  ;;  %v3126_v15 = vmul.f32 %v3104_v60, %v9157_v6  ;;  %v3360_v18 = vrot.slane %v10296_v44, %v10273_v41  ;;  %v3125_v12 = vmul.f32 %v3100_v43, %v8786_v33  ;;  %v3364_v31 = vrot.slane %v10296_v44, %v10277_v27  ;;  %v10310_v43 = vld [vmem:[#allocation84_spill] sm:$0xff] }
 0x410   :  { %5059 = vmatprep.subr.mxu1 %v3548_v14  ;;  %v3402_v19 = vpop.permute.xlu1 %3401  ;;  %v2932_v25 = vrot.slane %v10308_v2, %v10219_v20  ;;  %v2936_v33 = vrot.slane %v10308_v2, %v10220_v39 }
 0x411   :  { %v3405_v11 = vsel %vm824_vm5, %v3402_v19, %v10307_v9  ;;  %v3406_v36 = vsel %vm824_vm5, %v9064_v46, %v3402_v19  ;;  %5060 = vmatpush1.msra.mxu1 %v3547_v0  ;;  %v9173_v60 = vpop.permute.xlu0 %2979  ;;  %4998 = vmatprep.subr.mxu0 %v3126_v15  ;;  %v3041_v0 = vmul.f32 %v3016_v8, %v8811_v32  ;;  %v10311_v15 = vld [vmem:[#allocation66_spill] sm:$0xff]  ;;  %vm10317_vm5 = vmmov %vm10303_vm0 }
 0x412   :  { %v3463_v26 = vmul.f32 %v3444_v55, %v3406_v36  ;;  %v3464_v59 = vmul.f32 %v3448_v63, %v3405_v11  ;;  %v9181_v46 = vsel %vm10309_vm2, %v8747_v16, %v9173_v60  ;;  %4999 = vmatpush1.msra.mxu0 %v3125_v12  ;;  %v3276_v16 = vrot.slane %v10299_v4, %v10273_v41  ;;  %v10313_v11 = vld [vmem:[#allocation28_spill] sm:$0xff]  ;;  %vm10329_vm0 = vmmov %vm10312_vm3 }
 0x413   :  { %v3042_v44 = vmul.f32 %v3020_v53, %v9181_v46  ;;  %v3280_v19 = vrot.slane %v10299_v4, %v10277_v27  ;;  %v2852_v8 = vrot.slane %v10311_v15, %v10220_v39  ;;  %v2957_v12 = vmul.f32 %v2932_v25, %v8832_v57 }
 0x414   :  { %5061 = vmatprep.subr.mxu1 %v3464_v59  ;;  %v3318_v40 = vpop.permute.xlu1 %3317 }
 0x415   :  { %v9189_v55 = vsel %vm738_vm6, %v3318_v40, %v10310_v43  ;;  %v9194_v35 = vsel %vm738_vm6, %v9075_v29, %v3318_v40  ;;  %5062 = vmatpush1.msra.mxu1 %v3463_v26  ;;  %v9203_v53 = vpop.permute.xlu0 %2895  ;;  %5000 = vmatprep.subr.mxu0 %v3042_v44  ;;  %v2848_v29 = vrot.slane %v10311_v15, %v10219_v20  ;;  %v10315_v43 = vld [vmem:[#allocation11_spill] sm:$0xff]  ;;  %vm10319_vm6 = vmmov %vm10246_vm9 }
 0x416   :  { %v3379_v14 = vmul.f32 %v3360_v18, %v9194_v35  ;;  %v3380_v63 = vmul.f32 %v3364_v31, %v9189_v55  ;;  %v9211_v9 = vsel %vm10312_vm3, %v8691_v7, %v9203_v53  ;;  %5001 = vmatpush1.msra.mxu0 %v3041_v0  ;;  %v3192_v7 = vrot.slane %v10300_v3, %v10273_v41  ;;  %vm10327_vm9 = vmmov %vm10312_vm3 }
 0x417   :  { %v2958_v4 = vmul.f32 %v2936_v33, %v9211_v9  ;;  %v3196_v31 = vrot.slane %v10300_v3, %v10277_v27  ;;  %v10314_v33 = vld [vmem:[#allocation68_spill] sm:$0xff] }
 0x418   :  { %5063 = vmatprep.subr.mxu1 %v3380_v63  ;;  %v3234_v32 = vpop.permute.xlu1 %3233  ;;  %v2768_v25 = vrot.slane %v10314_v33, %v10220_v39 }
 0x419   :  { %v9219_v36 = vsel %vm652_vm8, %v3234_v32, %v10313_v11  ;;  %v9224_v18 = vsel %vm652_vm8, %v9101_v47, %v3234_v32  ;;  %5064 = vmatpush1.msra.mxu1 %v3379_v14  ;;  %v9233_v40 = vpop.permute.xlu0 %2811  ;;  %5002 = vmatprep.subr.mxu0 %v2958_v4  ;;  %v2764_v47 = vrot.slane %v10314_v33, %v10219_v20  ;;  %v10318_v11 = vld [vmem:[#allocation70_spill] sm:$0xff]  ;;  %vm10322_vm8 = vmmov %vm10306_vm1 }
 0x41a   :  { %v3295_v26 = vmul.f32 %v3276_v16, %v9224_v18  ;;  %v3296_v59 = vmul.f32 %v3280_v19, %v9219_v36  ;;  %v9241_v44 = vsel %vm222_vm13, %v8795_v21, %v9233_v40  ;;  %5003 = vmatpush1.msra.mxu0 %v2957_v12  ;;  %v3108_v21 = vrot.slane %v10302_v37, %v10273_v41  ;;  %vm10333_vm1 = vmmov %vm10319_vm6 }
 0x41b   :  { %v2874_v3 = vmul.f32 %v2852_v8, %v9241_v44  ;;  %v2873_v14 = vmul.f32 %v2848_v29, %v8855_v58  ;;  %v3112_v32 = vrot.slane %v10302_v37, %v10277_v27  ;;  %v2680_v12 = vrot.slane %v10318_v11, %v10219_v20 }
 0x41c   :  { %5065 = vmatprep.subr.mxu1 %v3296_v59  ;;  %v3150_v57 = vpop.permute.xlu1 %3149  ;;  %v2684_v29 = vrot.slane %v10318_v11, %v10220_v39  ;;  %v4396_v8 = vrot.slane %v10205_v56, %v10220_v39 }
 0x41d   :  { %v9249_v16 = vsel %vm10316_vm4, %v3150_v57, %v10315_v43  ;;  %v9254_v0 = vsel %vm10317_vm5, %v9126_v50, %v3150_v57  ;;  %5066 = vmatpush1.msra.mxu1 %v3295_v26  ;;  %v9267_v4 = vpop.permute.xlu0 %2727  ;;  %5004 = vmatprep.subr.mxu0 %v2874_v3  ;;  %v10320_v26 = vld [vmem:[#allocation41_spill] sm:$0xff]  ;;  %v2789_v57 = vmul.f32 %v2764_v47, %v8881_v54 }
 0x41e   :  { %v3211_v63 = vmul.f32 %v3192_v7, %v9254_v0  ;;  %v3212_v19 = vmul.f32 %v3196_v31, %v9249_v16  ;;  %v9275_v58 = vsel %vm10319_vm6, %v8737_v52, %v9267_v4  ;;  %5005 = vmatpush1.msra.mxu0 %v2873_v14  ;;  %v3024_v52 = vrot.slane %v10305_v49, %v10273_v41 }
 0x41f   :  { %v2790_v7 = vmul.f32 %v2768_v25, %v9275_v58  ;;  %v3028_v43 = vrot.slane %v10305_v49, %v10277_v27  ;;  %v4572_v47 = vrot.slane %v10193_v5, %v10219_v20  ;;  %v4512_v49 = vrot.slane %v7798_v61, %v10219_v20 }
 0x420   :  { %5067 = vmatprep.subr.mxu1 %v3212_v19  ;;  %v3066_v37 = vpop.permute.xlu1 %3065  ;;  %v2856_v50 = vrot.slane %v10311_v15, %v10273_v41 }
 0x421   :  { %v9283_v59 = vsel %vm10321_vm7, %v3066_v37, %v10320_v26  ;;  %v9288_v31 = vsel %vm10322_vm8, %v9149_v1, %v3066_v37  ;;  %5068 = vmatpush1.msra.mxu1 %v3211_v63  ;;  %v9305_v54 = vpop.permute.xlu0 %2643  ;;  %5006 = vmatprep.subr.mxu0 %v2790_v7  ;;  %v4452_v37 = vrot.slane %v10207_v24, %v10219_v20  ;;  %v10323_v26 = vld [vmem:[#allocation19_spill] sm:$0xff] }
 0x422   :  { %v3127_v3 = vmul.f32 %v3108_v21, %v9288_v31  ;;  %v3128_v25 = vmul.f32 %v3112_v32, %v9283_v59  ;;  %v9315_v21 = vsel %vm51_vm15, %v8788_v45, %v9305_v54  ;;  %5007 = vmatpush1.msra.mxu0 %v2789_v57  ;;  %v2705_v45 = vmul.f32 %v2680_v12, %v8909_v30  ;;  %v10326_v12 = vld [vmem:[#allocation39_spill] sm:$0xff] }
 0x423   :  { %v2706_v7 = vmul.f32 %v2684_v29, %v9315_v21  ;;  %v4576_v57 = vrot.slane %v10193_v5, %v10220_v39  ;;  %v4392_v63 = vrot.slane %v10205_v56, %v10219_v20  ;;  %v2944_v30 = vrot.slane %v10308_v2, %v10277_v27 }
 0x424   :  { %5069 = vmatprep.subr.mxu1 %v3128_v25  ;;  %v2982_v32 = vpop.permute.xlu1 %2981 }
 0x425   :  { %v9323_v19 = vsel %vm10324_vm10, %v2982_v32, %v10323_v26  ;;  %v9328_v14 = vsel %vm10325_vm11, %v9173_v60, %v2982_v32  ;;  %5070 = vmatpush1.msra.mxu1 %v3127_v3  ;;  %5008 = vmatprep.subr.mxu0 %v2706_v7  ;;  %v2940_v60 = vrot.slane %v10308_v2, %v10273_v41  ;;  %v10330_v32 = vmov 1.0   ;;  %v10332_v26 = vld [vmem:[#allocation48_spill] sm:$0xff] }
 0x426   :  { %v3043_v25 = vmul.f32 %v3024_v52, %v9328_v14  ;;  %v3044_v29 = vmul.f32 %v3028_v43, %v9323_v19  ;;  %v4516_v3 = vrot.slane %v7798_v61, %v10220_v39  ;;  %5009 = vmatpush1.msra.mxu0 %v2705_v45  ;;  %v4456_v2 = vrot.slane %v10207_v24, %v10220_v39 }
 0x427   :  { %v4598_v1 = vmul.f32 %v4576_v57, %v9194_v35  ;;  %5018 = vmatprep.subr.mxu0 %v10330_v32  ;;  %v2860_v7 = vrot.slane %v10311_v15, %v10277_v27  ;;  %v2730_v35 = vpop.permute.xlu0 %2729  ;;  %v2692_v15 = vrot.slane %v10318_v11, %v10277_v27 }
 0x428   :  { %5071 = vmatprep.subr.mxu1 %v3044_v29  ;;  %v2898_v43 = vpop.permute.xlu1 %2897  ;;  %5019 = vmatpush2.msra.mxu0 %v10330_v32 }
 0x429   :  { %5072 = vmatpush1.msra.mxu1 %v3043_v25  ;;  %v9361_v29 = vsel %vm10327_vm9, %v2898_v43, %v10326_v12  ;;  %v2902_v45 = vsel %vm10329_vm0, %v9203_v53, %v2898_v43  ;;  %v4597_v25 = vmul.f32 %v4572_v47, %v9085_v22  ;;  %v2772_v12 = vrot.slane %v10314_v33, %v10273_v41 }
 0x42a   :  { %10328 = vst [vmem:[#allocation14_spill] sm:$0xff] %v9361_v29  ;;  %v2959_v57 = vmul.f32 %v2940_v60, %v2902_v45  ;;  %v2960_v52 = vmul.f32 %v2944_v30, %v9361_v29  ;;  %v2776_v53 = vrot.slane %v10314_v33, %v10277_v27  ;;  %5020 = vmatprep.subr.mxu0 %v4598_v1  ;;  %v10331_v60 = vld [vmem:[#allocation35_spill] sm:$0xff] }
 0x42b   :  { %v2688_v22 = vrot.slane %v10318_v11, %v10273_v41  ;;  %v4538_v47 = vmul.f32 %v4516_v3, %v9224_v18  ;;  %5021 = vmatpush2.msra.mxu0 %v4597_v25  ;;  %v4537_v1 = vmul.f32 %v4512_v49, %v9110_v42  ;;  %v9395_v29 = vsel %vm10333_vm1, %v2730_v35, %v10332_v26 }
 0x42c   :  { %v2814_v43 = vpop.permute.xlu1 %2813  ;;  %5073 = vmatprep.subr.mxu1 %v2960_v52  ;;  %v4460_v52 = vrot.slane %v10207_v24, %v10273_v41  ;;  %v4478_v3 = vmul.f32 %v4456_v2, %v9254_v0  ;;  %v4477_v49 = vmul.f32 %v4452_v37, %v9134_v13  ;;  %v4276_v26 = vrot.slane %v7924_v28, %v10220_v39  ;;  %v10335_v2 = vld [vmem:[#allocation44_spill] sm:$0xff] }
 0x42d   :  { %v9386_v30 = vsel %vm222_vm13, %v2814_v43, %v10331_v60  ;;  %v2818_v33 = vsel %vm222_vm13, %v9233_v40, %v2814_v43  ;;  %5074 = vmatpush1.msra.mxu1 %v2959_v57  ;;  %v4336_v40 = vrot.slane %v10212_v51, %v10220_v39  ;;  %vm10334_vm13 = vmmov %vm10333_vm1  ;;  %5022 = vmatprep.subr.mxu0 %v4538_v47  ;;  %v3996_v43 = vpop.permute.xlu0 %3995 }
 0x42e   :  { %v2875_v11 = vmul.f32 %v2856_v50, %v2818_v33  ;;  %v2876_v18 = vmul.f32 %v2860_v7, %v9386_v30  ;;  %v2734_v42 = vsel %vm10334_vm13, %v9267_v4, %v2730_v35  ;;  %v4418_v50 = vmul.f32 %v4396_v8, %v9288_v31  ;;  %5023 = vmatpush2.msra.mxu0 %v4537_v1 }
 0x42f   :  { %v2792_v0 = vmul.f32 %v2776_v53, %v9395_v29  ;;  %5024 = vmatprep.subr.mxu0 %v4478_v3  ;;  %v4417_v8 = vmul.f32 %v4392_v63, %v9157_v6  ;;  %v2791_v4 = vmul.f32 %v2772_v12, %v2734_v42  ;;  %v4152_v35 = vrot.slane %v7991_v17, %v10219_v20 }
 0x430   :  { %5075 = vmatprep.subr.mxu1 %v2876_v18  ;;  %v2646_v7 = vpop.permute.xlu1 %2645  ;;  %5025 = vmatpush2.msra.mxu0 %v4477_v49  ;;  %v4358_v57 = vmul.f32 %v4336_v40, %v9328_v14  ;;  %v4216_v53 = vrot.slane %v7954_v34, %v10220_v39  ;;  %v4400_v63 = vrot.slane %v10205_v56, %v10273_v41  ;;  %v10338_v18 = vld [vmem:[#allocation21_spill] sm:$0xff] }
 0x431   :  { %v9414_v25 = vsel %vm51_vm15, %v2646_v7, %v10335_v2  ;;  %v2650_v13 = vsel %vm51_vm15, %v9305_v54, %v2646_v7  ;;  %5076 = vmatpush1.msra.mxu1 %v2875_v11  ;;  %5026 = vmatprep.subr.mxu0 %v4418_v50  ;;  %v10336_v54 = vrot.slane %v10212_v51, %v10219_v20 }
 0x432   :  { %v2707_v31 = vmul.f32 %v2688_v22, %v2650_v13  ;;  %v2708_v37 = vmul.f32 %v2692_v15, %v9414_v25  ;;  %5077 = vmatprep.subr.mxu1 %v2792_v0  ;;  %v4092_v12 = vrot.slane %v8011_v62, %v10219_v20  ;;  %5027 = vmatpush2.msra.mxu0 %v4417_v8 }
 0x433   :  { %v4357_v6 = vmul.f32 %v10336_v54, %v9181_v46  ;;  %5078 = vmatpush1.msra.mxu1 %v2791_v4  ;;  %v4340_v22 = vrot.slane %v10212_v51, %v10273_v41  ;;  %v4156_v15 = vrot.slane %v7991_v17, %v10220_v39  ;;  %v4298_v47 = vmul.f32 %v4276_v26, %v2902_v45  ;;  %v10347_v54 = vld [vmem:[#allocation47_spill] sm:$0xff] }
 0x434   :  { %v9434_v14 = vpop.permute.xlu1 %3997  ;;  %5028 = vmatprep.subr.mxu0 %v4358_v57  ;;  %5079 = vmatprep.subr.mxu1 %v2708_v37  ;;  %v10337_v46 = vrot.slane %v7924_v28, %v10219_v20  ;;  %v4032_v1 = vrot.slane %v8053_v23, %v10219_v20  ;;  %v3948_v11 = vrot.slane %v10237_v38, %v10219_v20 }
 0x435   :  { %5029 = vmatpush2.msra.mxu0 %v4357_v6  ;;  %5080 = vmatpush1.msra.mxu1 %v2707_v31  ;;  %v10339_v3 = vrot.slane %v10193_v5, %v10277_v27  ;;  %v4238_v40 = vmul.f32 %v4216_v53, %v2818_v33  ;;  %v4096_v49 = vrot.slane %v8011_v62, %v10220_v39  ;;  %v10342_v33 = vld [vmem:[#allocation34_spill] sm:$0xff]  ;;  %v3912_v31 = vpop.permute.xlu0 %3911  ;;  %v10349_v6 = vld [vmem:[#allocation8_spill] sm:$0xff] }
 0x436   :  { %v4297_v60 = vmul.f32 %v10337_v46, %v9211_v9  ;;  %5030 = vmatprep.subr.mxu0 %v4298_v47  ;;  %5089 = vmatprep.subr.mxu1 %v10330_v32  ;;  %v10340_v9 = vrot.slane %v10193_v5, %v10273_v41  ;;  %v10341_v26 = vrot.slane %v7954_v34, %v10219_v20 }
 0x437   :  { %v4600_v45 = vmul.f32 %v10339_v3, %v10338_v18  ;;  %v4036_v0 = vrot.slane %v8053_v23, %v10220_v39  ;;  %5090 = vmatpush2.msra.mxu1 %v10330_v32  ;;  %v10343_v2 = vrot.slane %v7798_v61, %v10277_v27  ;;  %v4178_v4 = vmul.f32 %v4156_v15, %v2734_v42  ;;  %v10345_v42 = vld [vmem:[#allocation38_spill] sm:$0xff] }
 0x438   :  { %v4599_v50 = vmul.f32 %v10340_v9, %v9189_v55  ;;  %v4237_v7 = vmul.f32 %v10341_v26, %v9241_v44  ;;  %5031 = vmatpush2.msra.mxu0 %v4297_v60  ;;  %v3952_v5 = vrot.slane %v10237_v38, %v10220_v39  ;;  %v9472_v55 = vpop.permute.xlu1 %3913  ;;  %v10344_v20 = vrot.slane %v7798_v61, %v10273_v41 }
 0x439   :  { %v4540_v8 = vmul.f32 %v10343_v2, %v10342_v33  ;;  %5032 = vmatprep.subr.mxu0 %v4238_v40  ;;  %5091 = vmatprep.subr.mxu1 %v4600_v45  ;;  %v4177_v32 = vmul.f32 %v4152_v35, %v9275_v58  ;;  %v4002_v37 = vsel %vm1434_vm12, %v3996_v43, %v9434_v14  ;;  %v10358_v2 = vld [vmem:[#allocation72_spill] sm:$0xff] }
 0x43a   :  { %v4539_v44 = vmul.f32 %v10344_v20, %v9219_v36  ;;  %5033 = vmatpush2.msra.mxu0 %v4237_v7  ;;  %5092 = vmatpush2.msra.mxu1 %v4599_v50  ;;  %v10346_v39 = vrot.slane %v10207_v24, %v10277_v27  ;;  %v4003_v53 = vsel %vm1434_vm12, %v8895_v48, %v3996_v43 }
 0x43b   :  { %v4118_v61 = vmul.f32 %v4096_v49, %v2650_v13  ;;  %5034 = vmatprep.subr.mxu0 %v4178_v4  ;;  %5093 = vmatprep.subr.mxu1 %v4540_v8  ;;  %v4479_v36 = vmul.f32 %v4460_v52, %v9249_v16  ;;  %v4117_v58 = vmul.f32 %v4092_v12, %v9315_v21  ;;  %v10350_v52 = vld [vmem:[#allocation33_spill] sm:$0xff]  ;;  %v4000_v49 = vpop.permute.xlu0 %3999 }
 0x43c   :  { %v4480_v57 = vmul.f32 %v10346_v39, %v10345_v42  ;;  %v3918_v35 = vsel %vm1348_vm14, %v3912_v31, %v9472_v55  ;;  %5035 = vmatpush2.msra.mxu0 %v4177_v32  ;;  %5094 = vmatpush2.msra.mxu1 %v4539_v44  ;;  %v10348_v48 = vrot.slane %v10205_v56, %v10277_v27  ;;  %v10359_v4 = vld [vmem:[#allocation45_spill] sm:$0xff]  ;;  %v10360_v32 = vld [vmem:[#allocation79_spill] sm:$0xff] }
 0x43d   :  { %v3919_v43 = vsel %vm1348_vm14, %v10349_v6, %v3912_v31  ;;  %v4058_v15 = vmul.f32 %v4036_v0, %v4002_v37  ;;  %5036 = vmatprep.subr.mxu0 %v4118_v61  ;;  %v4419_v24 = vmul.f32 %v4400_v63, %v9283_v59  ;;  %v4280_v16 = vrot.slane %v7924_v28, %v10273_v41  ;;  %v3916_v0 = vpop.permute.xlu1 %3915 }
 0x43e   :  { %v4420_v13 = vmul.f32 %v10348_v48, %v10347_v54  ;;  %5095 = vmatprep.subr.mxu1 %v4480_v57  ;;  %v4057_v21 = vmul.f32 %v4032_v1, %v4003_v53  ;;  %5037 = vmatpush2.msra.mxu0 %v4117_v58  ;;  %v10351_v56 = vrot.slane %v10212_v51, %v10277_v27  ;;  %v10352_v1 = vld [vmem:[#allocation36_spill] sm:$0xff] }
 0x43f   :  { %5096 = vmatpush2.msra.mxu1 %v4479_v36  ;;  %v4224_v47 = vrot.slane %v7954_v34, %v10277_v27  ;;  %v3974_v46 = vmul.f32 %v3952_v5, %v3918_v35  ;;  %5038 = vmatprep.subr.mxu0 %v4058_v15  ;;  %v4359_v60 = vmul.f32 %v4340_v22, %v9323_v19  ;;  %v10354_v19 = vld [vmem:[#allocation14_spill] sm:$0xff] }
 0x440   :  { %v4360_v12 = vmul.f32 %v10351_v56, %v10350_v52  ;;  %5097 = vmatprep.subr.mxu1 %v4420_v13  ;;  %v4220_v59 = vrot.slane %v7954_v34, %v10273_v41  ;;  %v3973_v63 = vmul.f32 %v3948_v11, %v3919_v43  ;;  %5039 = vmatpush2.msra.mxu0 %v4057_v21  ;;  %v10355_v34 = vld [vmem:[#allocation50_spill] sm:$0xff] }
 0x441   :  { %5098 = vmatpush2.msra.mxu1 %v4419_v24  ;;  %v10353_v18 = vrot.slane %v7924_v28, %v10277_v27  ;;  %v4164_v3 = vrot.slane %v7991_v17, %v10277_v27  ;;  %5040 = vmatprep.subr.mxu0 %v3974_v46  ;;  %v4160_v45 = vrot.slane %v7991_v17, %v10273_v41  ;;  %v10356_v28 = vld [vmem:[#allocation54_spill] sm:$0xff]  ;;  %v10357_v17 = vld [vmem:[#allocation56_spill] sm:$0xff] }
 0x442   :  { %5099 = vmatprep.subr.mxu1 %v4360_v12  ;;  %v4299_v22 = vmul.f32 %v4280_v16, %v10354_v19  ;;  %5041 = vmatpush2.msra.mxu0 %v3973_v63  ;;  %v4240_v11 = vmul.f32 %v4224_v47, %v10355_v34  ;;  %v4104_v40 = vrot.slane %v8011_v62, %v10277_v27 }
 0x443   :  { %v4300_v51 = vmul.f32 %v10353_v18, %v10352_v1  ;;  %5100 = vmatpush2.msra.mxu1 %v4359_v60  ;;  %5043 = vmatmul.mubr.f32.vlgmr.msra.gmra.mxu0 %v10356_v28  ;;  %v4239_v9 = vmul.f32 %v4220_v59, %v9386_v30  ;;  %v4100_v50 = vrot.slane %v8011_v62, %v10273_v41 }
 0x444   :  { %v4180_v26 = vmul.f32 %v4164_v3, %v10357_v17  ;;  %v4044_v7 = vrot.slane %v8053_v23, %v10277_v27  ;;  %v4179_v33 = vmul.f32 %v4160_v45, %v9395_v29  ;;  %v4008_v8 = vsel %vm1434_vm12, %v4000_v49, %v10358_v2 }
 0x445   :  { %5101 = vmatprep.subr.mxu1 %v4300_v51  ;;  %v4040_v30 = vrot.slane %v8053_v23, %v10273_v41  ;;  %v4120_v62 = vmul.f32 %v4104_v40, %v10359_v4  ;;  %v4001_v5 = vsel %vm1434_vm12, %v9434_v14, %v4000_v49  ;;  %v3960_v20 = vrot.slane %v10237_v38, %v10277_v27  ;;  %v5349_v4 = vld [vmem:[%s9605_s0 + $0x18] sm:$0xff] }
 0x446   :  { %5102 = vmatpush2.msra.mxu1 %v4299_v22  ;;  %v4119_v29 = vmul.f32 %v4100_v50, %v9414_v25  ;;  %v3956_v44 = vrot.slane %v10237_v38, %v10273_v41  ;;  %v3924_v23 = vsel %vm1348_vm14, %v3916_v0, %v10360_v32  ;;  %v4060_v31 = vmul.f32 %v4044_v7, %v4008_v8  ;;  %v5346_v7 = vld [vmem:[%s9605_s0] sm:$0xff]  ;;  %v5348_v8 = vld [vmem:[%s9605_s0 + $0x10] sm:$0xff] }
 0x447   :  { %5103 = vmatprep.subr.mxu1 %v4240_v11  ;;  %v3917_v37 = vsel %vm1348_vm14, %v9472_v55, %v3916_v0  ;;  %v4059_v14 = vmul.f32 %v4040_v30, %v4001_v5  ;;  %v3976_v27 = vmul.f32 %v3960_v20, %v3924_v23 }
 0x448   :  { %5104 = vmatpush2.msra.mxu1 %v4239_v9  ;;  %v3975_v42 = vmul.f32 %v3956_v44, %v3917_v37 }
 0x449   :  { %5105 = vmatprep.subr.mxu1 %v4180_v26 }
 0x44a   :  { %5106 = vmatpush2.msra.mxu1 %v4179_v33  ;;  %v5347_v33 = vld [vmem:[%s9605_s0 + $0x8] sm:$0xff] }
 0x44b   :  { %5107 = vmatprep.subr.mxu1 %v4120_v62 }
 0x44c   :  { %5108 = vmatpush2.msra.mxu1 %v4119_v29 }
 0x44d   :  { %5109 = vmatprep.subr.mxu1 %v4060_v31 }
 0x44e   :  { %5110 = vmatpush2.msra.mxu1 %v4059_v14 }
 0x44f   :  { %5111 = vmatprep.subr.mxu1 %v3976_v27 }
 0x450   :  { %5112 = vmatpush2.msra.mxu1 %v3975_v42 }
 0x451   :  { %5114 = vmatmul.mubr.f32.vlgmr.msra.gmra.mxu1 %v10356_v28 }
 0x4b1   :  { %v4902_v38 = vpop.f32.mrf.mxu0 }
 0x4b2   :  { %v5120_v41 = vmul.f32 %v4902_v38, %v4902_v38 }
 0x4b3   :  { %v4904_v25 = vpop.f32.mrf.mxu0 }
 0x4b4   :  { %v5121_v39 = vmul.f32 %v4904_v25, %v4904_v25  ;;  %v5128_v57 = vadd.f32 %v4904_v25, %v4902_v38 }
 0x4b6   :  { %v5133_v61 = vadd.f32 %v5121_v39, %v5120_v41 }
 0x4b8   :  { %v4973_v53 = vpop.f32.mrf.mxu1 }
 0x4b9   :  { %v5122_v10 = vmul.f32 %v4973_v53, %v4973_v53  ;;  %v5129_v55 = vadd.f32 %v5128_v57, %v4973_v53 }
 0x4ba   :  { %v4975_v36 = vpop.f32.mrf.mxu1 }
 0x4bb   :  { %v5134_v58 = vadd.f32 %v5133_v61, %v5122_v10  ;;  %v5123_v35 = vmul.f32 %v4975_v36, %v4975_v36  ;;  %v5130_v54 = vadd.f32 %v5129_v55, %v4975_v36  ;;  %v5350_v61 = vld [vmem:[%s9605_s0 + $0x20] sm:$0xff]  ;;  %v5351_v55 = vld [vmem:[%s9605_s0 + $0x28] sm:$0xff] }
 0x4bd   :  { %5131 = vadd.xlane.f32.xlu0 %v5130_v54  ;;  %v5135_v48 = vadd.f32 %v5134_v58, %v5123_v35  ;;  %v5352_v58 = vld [vmem:[%s9605_s0 + $0x30] sm:$0xff]  ;;  %v5353_v54 = vld [vmem:[%s9605_s0 + $0x38] sm:$0xff] }
 0x4c1   :  { %5136 = vadd.xlane.f32.xlu0 %v5135_v48 }
 0x503   :  { %v5044_v13 = vpop.f32.mrf.mxu0 }
 0x504   :  { %v5124_v43 = vmul.f32 %v5044_v13, %v5044_v13 }
 0x505   :  { %v5046_v6 = vpop.f32.mrf.mxu0 }
 0x506   :  { %v5125_v15 = vmul.f32 %v5046_v6, %v5046_v6  ;;  %v5153_v24 = vadd.f32 %v5046_v6, %v5044_v13 }
 0x508   :  { %v5158_v21 = vadd.f32 %v5125_v15, %v5124_v43 }
 0x511   :  { %v5115_v16 = vpop.f32.mrf.mxu1 }
 0x512   :  { %v5126_v52 = vmul.f32 %v5115_v16, %v5115_v16  ;;  %v5154_v56 = vadd.f32 %v5153_v24, %v5115_v16 }
 0x513   :  { %v5117_v12 = vpop.f32.mrf.mxu1 }
 0x514   :  { %v5159_v47 = vadd.f32 %v5158_v21, %v5126_v52  ;;  %v5127_v46 = vmul.f32 %v5117_v12, %v5117_v12  ;;  %v5155_v60 = vadd.f32 %v5154_v56, %v5117_v12 }
 0x516   :  { %v5160_v59 = vadd.f32 %v5159_v47, %v5127_v46  ;;  %5156 = vadd.xlane.f32.xlu1 %v5155_v60 }
 0x518   :  { %5161 = vadd.xlane.f32.xlu0 %v5160_v59 }
 0x546   :  { %v5132_v63 = vpop.xlane.xlu0 %5131 }
 0x547   :  { %v5138_v1 = vmul.f32 0.001953125, %v5132_v63 }
 0x549   :  { %v5140_v18 = vmul.f32 %v5138_v1, %v5138_v1  ;;  %v5143_v34 = vsub.f32 %v4902_v38, %v5138_v1  ;;  %v5144_v11 = vsub.f32 %v4904_v25, %v5138_v1  ;;  %v5145_v40 = vsub.f32 %v4973_v53, %v5138_v1 }
 0x54a   :  { %v5137_v51 = vpop.xlane.xlu0 %5136  ;;  %v5146_v49 = vsub.f32 %v4975_v36, %v5138_v1 }
 0x54b   :  { %v5139_v3 = vmul.f32 0.001953125, %v5137_v51 }
 0x54d   :  { %v5141_v45 = vsub.f32 %v5139_v3, %v5140_v18 }
 0x54f   :  { %v5142_v19 = vmax.f32 %v5141_v45, 0.0 }
 0x551   :  { %v5147_v22 = vadd.f32 1e-05, %v5142_v19 }
 0x553   :  { %5337 = vrsqrt.f32 %v5147_v22 }
 0x560   :  { %v5338_v28 = vpop.eup %5337 }
 0x561   :  { %v5149_v9 = vmul.f32 %v5338_v28, %v5143_v34  ;;  %v5150_v50 = vmul.f32 %v5338_v28, %v5144_v11  ;;  %v5151_v17 = vmul.f32 %v5338_v28, %v5145_v40  ;;  %v5152_v26 = vmul.f32 %v5338_v28, %v5146_v49 }
 0x563   :  { %v5178_v0 = vadd.f32 %v5346_v7, %v5149_v9  ;;  %v5179_v2 = vadd.f32 %v5347_v33, %v5150_v50  ;;  %v5180_v30 = vadd.f32 %v5348_v8, %v5151_v17  ;;  %v5181_v62 = vadd.f32 %v5349_v4, %v5152_v26 }
 0x565   :  { %5186 = vst [vmem:[%s9608_s3] sm:$0xff] %v5178_v0  ;;  %5187 = vst [vmem:[%s9608_s3 + $0x8] sm:$0xff] %v5179_v2 }
 0x566   :  { %5188 = vst [vmem:[%s9608_s3 + $0x10] sm:$0xff] %v5180_v30  ;;  %5189 = vst [vmem:[%s9608_s3 + $0x18] sm:$0xff] %v5181_v62 }
 0x59f   :  { %v5157_v5 = vpop.xlane.xlu1 %5156 }
 0x5a0   :  { %v5163_v20 = vmul.f32 0.001953125, %v5157_v5 }
 0x5a1   :  { %v5162_v29 = vpop.xlane.xlu0 %5161 }
 0x5a2   :  { %v5165_v44 = vmul.f32 %v5163_v20, %v5163_v20  ;;  %v5164_v32 = vmul.f32 0.001953125, %v5162_v29  ;;  %v5168_v14 = vsub.f32 %v5044_v13, %v5163_v20  ;;  %v5169_v27 = vsub.f32 %v5046_v6, %v5163_v20 }
 0x5a3   :  { %v5170_v42 = vsub.f32 %v5115_v16, %v5163_v20  ;;  %v5171_v38 = vsub.f32 %v5117_v12, %v5163_v20 }
 0x5a4   :  { %v5166_v23 = vsub.f32 %v5164_v32, %v5165_v44 }
 0x5a6   :  { %v5167_v31 = vmax.f32 %v5166_v23, 0.0 }
 0x5a8   :  { %v5172_v37 = vadd.f32 1e-05, %v5167_v31 }
 0x5aa   :  { %5339 = vrsqrt.f32 %v5172_v37 }
 0x5b7   :  { %v5340_v41 = vpop.eup %5339 }
 0x5b8   :  { %v5174_v25 = vmul.f32 %v5340_v41, %v5168_v14  ;;  %v5175_v39 = vmul.f32 %v5340_v41, %v5169_v27  ;;  %v5176_v57 = vmul.f32 %v5340_v41, %v5170_v42  ;;  %v5177_v53 = vmul.f32 %v5340_v41, %v5171_v38 }
 0x5ba   :  { %v5182_v10 = vadd.f32 %v5350_v61, %v5174_v25  ;;  %v5183_v36 = vadd.f32 %v5351_v55, %v5175_v39  ;;  %v5184_v35 = vadd.f32 %v5352_v58, %v5176_v57  ;;  %v5185_v48 = vadd.f32 %v5353_v54, %v5177_v53 }
 0x5bc   :  { %5311 = vst [vmem:[%s9608_s3 + $0x20] sm:$0xff] %v5182_v10  ;;  %5312 = vst [vmem:[%s9608_s3 + $0x28] sm:$0xff] %v5183_v36 }
 0x5bd   :  { %5313 = vst [vmem:[%s9608_s3 + $0x30] sm:$0xff] %v5184_v35  ;;  %5314 = vst [vmem:[%s9608_s3 + $0x38] sm:$0xff] %v5185_v48 }

</bundles_post_ra>
